<compile_context>
chip_gen: v7x
topology: tpu7x:2x2x1
jax: 0.10.0
libtpu: 0.0.40
codegen_flags: <defaults>
</compile_context>

<pallas_src>
import math

import jax
import jax.numpy as jnp
from jax.experimental import pallas as pl
from jax.experimental.pallas import tpu as pltpu


_LANES = 128
_TS = 8                     # sublane chunk processed per inner-loop iteration
_SCALE = 1.0 / math.sqrt(5.0)


def _ceil_div(a, b):
    return -(-a // b)


def _round_up(a, b):
    return _ceil_div(a, b) * b


def _attn_kernel(p_ref, x_ref, m_ref, v_ref, o_ref):
    """One grid step == one block of batches laid out as (sublane, lane).

    p_ref : (31,)            SMEM  flat params: s*W^T W (25), s*W^T b (5), s*b.b (1)
    x_ref : (7, 5, S, L)     VMEM  bf16; rows 0:3 -> q inputs, rows 3:7 -> k inputs
    m_ref : (3, 4, S, L)     VMEM  bf16 additive masks
    v_ref : (4, 6, S, L)     VMEM  bf16 value
    o_ref : (3, 6, S, L)     VMEM  f32 output
    """
    f32 = jnp.float32

    # Hoist every SMEM scalar into a Python local once per grid step.
    ms = [[p_ref[i * 5 + c] for c in range(5)] for i in range(5)]
    us = [p_ref[25 + i] for i in range(5)]
    cs = p_ref[30]

    num_chunks = x_ref.shape[2] // _TS

    @pl.loop(0, num_chunks)
    def _(t):
        base = pl.multiple_of(t * _TS, _TS)
        sl = pl.ds(base, _TS)

        def load_x(r, i):
            return x_ref[r, i, sl, :].astype(f32)

        # ---- key side: per key row j compute y_j = Ms @ x_k and su_k[j] ----
        y = []
        su_k = []
        for j in range(4):
            xk = [load_x(3 + j, i) for i in range(5)]
            su = xk[0] * us[0] + cs                 # fold the s*b.b constant here
            for i in range(1, 5):
                su = su + xk[i] * us[i]
            su_k.append(su)
            yj = []
            for i in range(5):
                acc = xk[0] * ms[i][0]
                for c in range(1, 5):
                    acc = acc + xk[c] * ms[i][c]
                yj.append(acc)
            y.append(yj)

        # ---- query side: logits -> numerically stable softmax, all 3 rows ----
        w = []                                       # w[a][j] softmax weights
        for a in range(3):
            xa = [load_x(a, i) for i in range(5)]
            su_q = xa[0] * us[0]
            for i in range(1, 5):
                su_q = su_q + xa[i] * us[i]

            logits = []
            for j in range(4):
                acc = xa[0] * y[j][0]
                for i in range(1, 5):
                    acc = acc + xa[i] * y[j][i]
                acc = acc + (su_q + su_k[j])
                logits.append(acc + m_ref[a, j, sl, :].astype(f32))

            mx = jnp.maximum(jnp.maximum(logits[0], logits[1]),
                             jnp.maximum(logits[2], logits[3]))
            e = [jnp.exp(l - mx) for l in logits]
            denom = (e[0] + e[1]) + (e[2] + e[3])
            inv = pl.reciprocal(denom, approx=True)
            w.append([ei * inv for ei in e])

        # TODO(synk): the reference's `attention_weights.unsqueeze(1) * qk_matrix[2]`
        # is shape-inconsistent ((B,1,3,4) vs (B,5,5)); that term is dropped and
        # Dropout(p=1) is treated as eval-mode identity.

        # ---- output: out[a,d] = sum_j w[a][j] * value[j,d]; value converted once ----
        for d in range(6):
            acc = [None, None, None]
            for j in range(4):
                vjd = v_ref[j, d, sl, :].astype(f32)
                for a in range(3):
                    term = w[a][j] * vjd
                    acc[a] = term if acc[a] is None else acc[a] + term
            for a in range(3):
                o_ref[a, d, sl, :] = acc[a]


def attention_model(query, weight, bias, masks, value, *, s_blk_target=256):
    """query (B,12,5), weight (5,5) [torch Linear (out,in)], bias (5,)/(1,5),
    masks (B,3,4), value (B,4,6)  ->  (B,3,6) float32."""
    f32 = jnp.float32
    bf16 = jnp.bfloat16

    weight = weight.astype(f32)
    bias = jnp.reshape(bias, (5,)).astype(f32)
    B = query.shape[0]

    # Bilinear-form parameters with the 1/sqrt(5) scale folded in (host, once):
    #   logits = x_a (s W^T W) x_j^T + x_a.(s W^T b) + x_j.(s W^T b) + s b.b
    m_mat = _SCALE * (weight.T @ weight)            # (5, 5)
    u_vec = _SCALE * (weight.T @ bias)              # (5,)
    c_sc = _SCALE * jnp.dot(bias, bias)             # ()
    params = jnp.concatenate([m_mat.reshape(-1), u_vec, c_sc[None]]).astype(f32)  # (31,)

    # Batch maps to (sublane, lane): b -> (b // 128, b % 128).
    sp_min = max(1, _ceil_div(B, _LANES))
    g = max(1, _ceil_div(sp_min, s_blk_target))
    if g == 1 and sp_min >= 32:
        g = 2                                       # let v7x's two TCs each take a block
    s_blk = _round_up(_ceil_div(sp_min, g), 16)     # bf16 packing + (8,128) rule + _TS
    sp = g * s_blk
    bp = sp * _LANES
    pad = ((0, bp - B), (0, 0), (0, 0))

    # Only qkv rows 0:7 are used (q = 0:3, k = 3:7). Cast to bf16 *before* the
    # pad/transpose so the wrapper-side layout traffic is halved too.
    xq = jnp.transpose(jnp.pad(query[:, :7, :].astype(bf16), pad),
                       (1, 2, 0)).reshape(7, 5, sp, _LANES)
    mk = jnp.transpose(jnp.pad(masks.astype(bf16), pad),
                       (1, 2, 0)).reshape(3, 4, sp, _LANES)
    vv = jnp.transpose(jnp.pad(value.astype(bf16), pad),
                       (1, 2, 0)).reshape(4, 6, sp, _LANES)

    smem_spec = pl.BlockSpec(memory_space=pltpu.MemorySpace.SMEM)
    out_t = pl.pallas_call(
        _attn_kernel,
        out_shape=jax.ShapeDtypeStruct((3, 6, sp, _LANES), f32),
        grid_spec=pltpu.PrefetchScalarGridSpec(
            num_scalar_prefetch=0,
            grid=(g,),
            in_specs=[
                smem_spec,                                                    # params
                pl.BlockSpec((7, 5, s_blk, _LANES), lambda i: (0, 0, i, 0)),  # query rows 0:7
                pl.BlockSpec((3, 4, s_blk, _LANES), lambda i: (0, 0, i, 0)),  # masks
                pl.BlockSpec((4, 6, s_blk, _LANES), lambda i: (0, 0, i, 0)),  # value
            ],
            out_specs=pl.BlockSpec((3, 6, s_blk, _LANES), lambda i: (0, 0, i, 0)),
        ),
        compiler_params=pltpu.CompilerParams(
            dimension_semantics=("parallel",),
            vmem_limit_bytes=32 * 1024 * 1024,
        ),
    )(params, xq, mk, vv)

    out = out_t.reshape(3, 6, bp)[:, :, :B]
    return jnp.transpose(out, (2, 0, 1))            # (B, 3, 6)


def _reference(query, weight, bias, masks, value):
    """Pure-JAX reference (same interpretation of the torch module)."""
    qkv = jnp.einsum("bri,ci->brc", query, weight) + bias[None, None, :]
    q, k = qkv[:, 0:3, :], qkv[:, 3:7, :]
    logits = jnp.einsum("bqc,bkc->bqk", q, k) / jnp.sqrt(5.0) + masks
    w = jax.nn.softmax(logits, axis=-1)
    return jnp.einsum("bqk,bkd->bqd", w, value)


def _check(B, key):
    k_q, k_v, k_w, k_b = jax.random.split(key, 4)
    query = jax.random.normal(k_q, (B, 12, 5), dtype=jnp.float32)
    value = jax.random.normal(k_v, (B, 4, 6), dtype=jnp.float32)

    # masks follow the 0/1 pattern of the torch globals (batch 0 all zeros,
    # batch 1 last row ones), shaped (B, 3, 4) so `logits + masks` is well-formed.
    masks = jnp.zeros((B, 3, 4), dtype=jnp.float32)
    masks = masks.at[1, 2, :].set(1.0)

    weight = jax.random.normal(k_w, (5, 5), dtype=jnp.float32) * 0.1
    bias = jax.random.normal(k_b, (5,), dtype=jnp.float32) * 0.1

    out = attention_model(query, weight, bias, masks, value)
    out = jax.block_until_ready(out)
    assert out.shape == (B, 3, 6)
    assert out.dtype == jnp.float32

    # Compare against the reference evaluated on the same bf16-rounded inputs
    # (the kernel stages inputs in bf16), so the check is tight on kernel math.
    qb = query.astype(jnp.bfloat16).astype(jnp.float32)
    mb = masks.astype(jnp.bfloat16).astype(jnp.float32)
    vb = value.astype(jnp.bfloat16).astype(jnp.float32)
    ref = _reference(qb, weight, bias, mb, vb)
    err = float(jnp.max(jnp.abs(out - ref)))
    assert jnp.allclose(out, ref, atol=2e-2, rtol=2e-2), err


if __name__ == "__main__":
    key = jax.random.PRNGKey(0)
    k1, k2 = jax.random.split(key)
    _check(2, k1)      # module-sized batch
    _check(300, k2)    # exercise multi-lane / multi-sublane batch mapping
    print("KERNEL_OK")
</pallas_src>

<mosaic_0001>
module attributes {stable_mosaic.version = 11 : i64} {
  func.func @_attn_kernel(%arg0: i32, %arg1: memref<31xf32, #tpu.memory_space<smem>>, %arg2: memref<7x5x16x128xbf16, #tpu.memory_space<vmem>>, %arg3: memref<3x4x16x128xbf16, #tpu.memory_space<vmem>>, %arg4: memref<4x6x16x128xbf16, #tpu.memory_space<vmem>>, %arg5: memref<3x6x16x128xf32, #tpu.memory_space<vmem>>) attributes {dimension_semantics = [#tpu.dimension_semantics<parallel>], iteration_bounds = array<i64: 1>, scalar_prefetch = 0 : i64, scratch_operands = 0 : i64, tpu.core_type = #tpu.core_type<tc>, window_params = [{transform_indices = @transform_0, window_bounds = array<i64: 31>}, {transform_indices = @transform_1, window_bounds = array<i64: 7, 5, 16, 128>}, {transform_indices = @transform_2, window_bounds = array<i64: 3, 4, 16, 128>}, {transform_indices = @transform_3, window_bounds = array<i64: 4, 6, 16, 128>}, {transform_indices = @transform_4, window_bounds = array<i64: 3, 6, 16, 128>}]} {
    %c0 = arith.constant 0 : index
    %0 = memref.load %arg1[%c0] : memref<31xf32, #tpu.memory_space<smem>>
    %c1 = arith.constant 1 : index
    %1 = memref.load %arg1[%c1] : memref<31xf32, #tpu.memory_space<smem>>
    %c2 = arith.constant 2 : index
    %2 = memref.load %arg1[%c2] : memref<31xf32, #tpu.memory_space<smem>>
    %c3 = arith.constant 3 : index
    %3 = memref.load %arg1[%c3] : memref<31xf32, #tpu.memory_space<smem>>
    %c4 = arith.constant 4 : index
    %4 = memref.load %arg1[%c4] : memref<31xf32, #tpu.memory_space<smem>>
    %c5 = arith.constant 5 : index
    %5 = memref.load %arg1[%c5] : memref<31xf32, #tpu.memory_space<smem>>
    %c6 = arith.constant 6 : index
    %6 = memref.load %arg1[%c6] : memref<31xf32, #tpu.memory_space<smem>>
    %c7 = arith.constant 7 : index
    %7 = memref.load %arg1[%c7] : memref<31xf32, #tpu.memory_space<smem>>
    %c8 = arith.constant 8 : index
    %8 = memref.load %arg1[%c8] : memref<31xf32, #tpu.memory_space<smem>>
    %c9 = arith.constant 9 : index
    %9 = memref.load %arg1[%c9] : memref<31xf32, #tpu.memory_space<smem>>
    %c10 = arith.constant 10 : index
    %10 = memref.load %arg1[%c10] : memref<31xf32, #tpu.memory_space<smem>>
    %c11 = arith.constant 11 : index
    %11 = memref.load %arg1[%c11] : memref<31xf32, #tpu.memory_space<smem>>
    %c12 = arith.constant 12 : index
    %12 = memref.load %arg1[%c12] : memref<31xf32, #tpu.memory_space<smem>>
    %c13 = arith.constant 13 : index
    %13 = memref.load %arg1[%c13] : memref<31xf32, #tpu.memory_space<smem>>
    %c14 = arith.constant 14 : index
    %14 = memref.load %arg1[%c14] : memref<31xf32, #tpu.memory_space<smem>>
    %c15 = arith.constant 15 : index
    %15 = memref.load %arg1[%c15] : memref<31xf32, #tpu.memory_space<smem>>
    %c16 = arith.constant 16 : index
    %16 = memref.load %arg1[%c16] : memref<31xf32, #tpu.memory_space<smem>>
    %c17 = arith.constant 17 : index
    %17 = memref.load %arg1[%c17] : memref<31xf32, #tpu.memory_space<smem>>
    %c18 = arith.constant 18 : index
    %18 = memref.load %arg1[%c18] : memref<31xf32, #tpu.memory_space<smem>>
    %c19 = arith.constant 19 : index
    %19 = memref.load %arg1[%c19] : memref<31xf32, #tpu.memory_space<smem>>
    %c20 = arith.constant 20 : index
    %20 = memref.load %arg1[%c20] : memref<31xf32, #tpu.memory_space<smem>>
    %c21 = arith.constant 21 : index
    %21 = memref.load %arg1[%c21] : memref<31xf32, #tpu.memory_space<smem>>
    %c22 = arith.constant 22 : index
    %22 = memref.load %arg1[%c22] : memref<31xf32, #tpu.memory_space<smem>>
    %c23 = arith.constant 23 : index
    %23 = memref.load %arg1[%c23] : memref<31xf32, #tpu.memory_space<smem>>
    %c24 = arith.constant 24 : index
    %24 = memref.load %arg1[%c24] : memref<31xf32, #tpu.memory_space<smem>>
    %c25 = arith.constant 25 : index
    %25 = memref.load %arg1[%c25] : memref<31xf32, #tpu.memory_space<smem>>
    %c26 = arith.constant 26 : index
    %26 = memref.load %arg1[%c26] : memref<31xf32, #tpu.memory_space<smem>>
    %c27 = arith.constant 27 : index
    %27 = memref.load %arg1[%c27] : memref<31xf32, #tpu.memory_space<smem>>
    %c28 = arith.constant 28 : index
    %28 = memref.load %arg1[%c28] : memref<31xf32, #tpu.memory_space<smem>>
    %c29 = arith.constant 29 : index
    %29 = memref.load %arg1[%c29] : memref<31xf32, #tpu.memory_space<smem>>
    %c30 = arith.constant 30 : index
    %30 = memref.load %arg1[%c30] : memref<31xf32, #tpu.memory_space<smem>>
    %c0_i32 = arith.constant 0 : i32
    %c2_i32 = arith.constant 2 : i32
    %31 = arith.addi %c0_i32, %c2_i32 : i32
    %c1_i32 = arith.constant 1 : i32
    scf.for %arg6 = %c0_i32 to %31 step %c1_i32  : i32 {
      %c1_i32_1 = arith.constant 1 : i32
      %32 = arith.muli %arg6, %c1_i32_1 : i32
      %c0_i32_2 = arith.constant 0 : i32
      %33 = arith.addi %c0_i32_2, %32 : i32
      %c8_i32 = arith.constant 8 : i32
      %34 = arith.muli %33, %c8_i32 : i32
      %35 = tpu.assume_multiple %34, 8 : i32
      %c3_3 = arith.constant 3 : index
      %c0_4 = arith.constant 0 : index
      %36 = arith.index_cast %35 : i32 to index
      %c0_5 = arith.constant 0 : index
      %37 = vector.load %arg2[%c3_3, %c0_4, %36, %c0_5] : memref<7x5x16x128xbf16, #tpu.memory_space<vmem>>, vector<1x1x8x128xbf16>
      %38 = vector.shape_cast %37 : vector<1x1x8x128xbf16> to vector<8x128xbf16>
      %39 = arith.extf %38 : vector<8x128xbf16> to vector<8x128xf32>
      %c3_6 = arith.constant 3 : index
      %c1_7 = arith.constant 1 : index
      %40 = arith.index_cast %35 : i32 to index
      %c0_8 = arith.constant 0 : index
      %41 = vector.load %arg2[%c3_6, %c1_7, %40, %c0_8] : memref<7x5x16x128xbf16, #tpu.memory_space<vmem>>, vector<1x1x8x128xbf16>
      %42 = vector.shape_cast %41 : vector<1x1x8x128xbf16> to vector<8x128xbf16>
      %43 = arith.extf %42 : vector<8x128xbf16> to vector<8x128xf32>
      %c3_9 = arith.constant 3 : index
      %c2_10 = arith.constant 2 : index
      %44 = arith.index_cast %35 : i32 to index
      %c0_11 = arith.constant 0 : index
      %45 = vector.load %arg2[%c3_9, %c2_10, %44, %c0_11] : memref<7x5x16x128xbf16, #tpu.memory_space<vmem>>, vector<1x1x8x128xbf16>
      %46 = vector.shape_cast %45 : vector<1x1x8x128xbf16> to vector<8x128xbf16>
      %47 = arith.extf %46 : vector<8x128xbf16> to vector<8x128xf32>
      %c3_12 = arith.constant 3 : index
      %c3_13 = arith.constant 3 : index
      %48 = arith.index_cast %35 : i32 to index
      %c0_14 = arith.constant 0 : index
      %49 = vector.load %arg2[%c3_12, %c3_13, %48, %c0_14] : memref<7x5x16x128xbf16, #tpu.memory_space<vmem>>, vector<1x1x8x128xbf16>
      %50 = vector.shape_cast %49 : vector<1x1x8x128xbf16> to vector<8x128xbf16>
      %51 = arith.extf %50 : vector<8x128xbf16> to vector<8x128xf32>
      %c3_15 = arith.constant 3 : index
      %c4_16 = arith.constant 4 : index
      %52 = arith.index_cast %35 : i32 to index
      %c0_17 = arith.constant 0 : index
      %53 = vector.load %arg2[%c3_15, %c4_16, %52, %c0_17] : memref<7x5x16x128xbf16, #tpu.memory_space<vmem>>, vector<1x1x8x128xbf16>
      %54 = vector.shape_cast %53 : vector<1x1x8x128xbf16> to vector<8x128xbf16>
      %55 = arith.extf %54 : vector<8x128xbf16> to vector<8x128xf32>
      %56 = vector.broadcast %25 : f32 to vector<8x128xf32>
      %57 = arith.mulf %39, %56 : vector<8x128xf32>
      %58 = vector.broadcast %30 : f32 to vector<8x128xf32>
      %59 = arith.addf %57, %58 : vector<8x128xf32>
      %60 = vector.broadcast %26 : f32 to vector<8x128xf32>
      %61 = arith.mulf %43, %60 : vector<8x128xf32>
      %62 = arith.addf %59, %61 : vector<8x128xf32>
      %63 = vector.broadcast %27 : f32 to vector<8x128xf32>
      %64 = arith.mulf %47, %63 : vector<8x128xf32>
      %65 = arith.addf %62, %64 : vector<8x128xf32>
      %66 = vector.broadcast %28 : f32 to vector<8x128xf32>
      %67 = arith.mulf %51, %66 : vector<8x128xf32>
      %68 = arith.addf %65, %67 : vector<8x128xf32>
      %69 = vector.broadcast %29 : f32 to vector<8x128xf32>
      %70 = arith.mulf %55, %69 : vector<8x128xf32>
      %71 = arith.addf %68, %70 : vector<8x128xf32>
      %72 = vector.broadcast %0 : f32 to vector<8x128xf32>
      %73 = arith.mulf %39, %72 : vector<8x128xf32>
      %74 = vector.broadcast %1 : f32 to vector<8x128xf32>
      %75 = arith.mulf %43, %74 : vector<8x128xf32>
      %76 = arith.addf %73, %75 : vector<8x128xf32>
      %77 = vector.broadcast %2 : f32 to vector<8x128xf32>
      %78 = arith.mulf %47, %77 : vector<8x128xf32>
      %79 = arith.addf %76, %78 : vector<8x128xf32>
      %80 = vector.broadcast %3 : f32 to vector<8x128xf32>
      %81 = arith.mulf %51, %80 : vector<8x128xf32>
      %82 = arith.addf %79, %81 : vector<8x128xf32>
      %83 = vector.broadcast %4 : f32 to vector<8x128xf32>
      %84 = arith.mulf %55, %83 : vector<8x128xf32>
      %85 = arith.addf %82, %84 : vector<8x128xf32>
      %86 = vector.broadcast %5 : f32 to vector<8x128xf32>
      %87 = arith.mulf %39, %86 : vector<8x128xf32>
      %88 = vector.broadcast %6 : f32 to vector<8x128xf32>
      %89 = arith.mulf %43, %88 : vector<8x128xf32>
      %90 = arith.addf %87, %89 : vector<8x128xf32>
      %91 = vector.broadcast %7 : f32 to vector<8x128xf32>
      %92 = arith.mulf %47, %91 : vector<8x128xf32>
      %93 = arith.addf %90, %92 : vector<8x128xf32>
      %94 = vector.broadcast %8 : f32 to vector<8x128xf32>
      %95 = arith.mulf %51, %94 : vector<8x128xf32>
      %96 = arith.addf %93, %95 : vector<8x128xf32>
      %97 = vector.broadcast %9 : f32 to vector<8x128xf32>
      %98 = arith.mulf %55, %97 : vector<8x128xf32>
      %99 = arith.addf %96, %98 : vector<8x128xf32>
      %100 = vector.broadcast %10 : f32 to vector<8x128xf32>
      %101 = arith.mulf %39, %100 : vector<8x128xf32>
      %102 = vector.broadcast %11 : f32 to vector<8x128xf32>
      %103 = arith.mulf %43, %102 : vector<8x128xf32>
      %104 = arith.addf %101, %103 : vector<8x128xf32>
      %105 = vector.broadcast %12 : f32 to vector<8x128xf32>
      %106 = arith.mulf %47, %105 : vector<8x128xf32>
      %107 = arith.addf %104, %106 : vector<8x128xf32>
      %108 = vector.broadcast %13 : f32 to vector<8x128xf32>
      %109 = arith.mulf %51, %108 : vector<8x128xf32>
      %110 = arith.addf %107, %109 : vector<8x128xf32>
      %111 = vector.broadcast %14 : f32 to vector<8x128xf32>
      %112 = arith.mulf %55, %111 : vector<8x128xf32>
      %113 = arith.addf %110, %112 : vector<8x128xf32>
      %114 = vector.broadcast %15 : f32 to vector<8x128xf32>
      %115 = arith.mulf %39, %114 : vector<8x128xf32>
      %116 = vector.broadcast %16 : f32 to vector<8x128xf32>
      %117 = arith.mulf %43, %116 : vector<8x128xf32>
      %118 = arith.addf %115, %117 : vector<8x128xf32>
      %119 = vector.broadcast %17 : f32 to vector<8x128xf32>
      %120 = arith.mulf %47, %119 : vector<8x128xf32>
      %121 = arith.addf %118, %120 : vector<8x128xf32>
      %122 = vector.broadcast %18 : f32 to vector<8x128xf32>
      %123 = arith.mulf %51, %122 : vector<8x128xf32>
      %124 = arith.addf %121, %123 : vector<8x128xf32>
      %125 = vector.broadcast %19 : f32 to vector<8x128xf32>
      %126 = arith.mulf %55, %125 : vector<8x128xf32>
      %127 = arith.addf %124, %126 : vector<8x128xf32>
      %128 = vector.broadcast %20 : f32 to vector<8x128xf32>
      %129 = arith.mulf %39, %128 : vector<8x128xf32>
      %130 = vector.broadcast %21 : f32 to vector<8x128xf32>
      %131 = arith.mulf %43, %130 : vector<8x128xf32>
      %132 = arith.addf %129, %131 : vector<8x128xf32>
      %133 = vector.broadcast %22 : f32 to vector<8x128xf32>
      %134 = arith.mulf %47, %133 : vector<8x128xf32>
      %135 = arith.addf %132, %134 : vector<8x128xf32>
      %136 = vector.broadcast %23 : f32 to vector<8x128xf32>
      %137 = arith.mulf %51, %136 : vector<8x128xf32>
      %138 = arith.addf %135, %137 : vector<8x128xf32>
      %139 = vector.broadcast %24 : f32 to vector<8x128xf32>
      %140 = arith.mulf %55, %139 : vector<8x128xf32>
      %141 = arith.addf %138, %140 : vector<8x128xf32>
      %c4_18 = arith.constant 4 : index
      %c0_19 = arith.constant 0 : index
      %142 = arith.index_cast %35 : i32 to index
      %c0_20 = arith.constant 0 : index
      %143 = vector.load %arg2[%c4_18, %c0_19, %142, %c0_20] : memref<7x5x16x128xbf16, #tpu.memory_space<vmem>>, vector<1x1x8x128xbf16>
      %144 = vector.shape_cast %143 : vector<1x1x8x128xbf16> to vector<8x128xbf16>
      %145 = arith.extf %144 : vector<8x128xbf16> to vector<8x128xf32>
      %c4_21 = arith.constant 4 : index
      %c1_22 = arith.constant 1 : index
      %146 = arith.index_cast %35 : i32 to index
      %c0_23 = arith.constant 0 : index
      %147 = vector.load %arg2[%c4_21, %c1_22, %146, %c0_23] : memref<7x5x16x128xbf16, #tpu.memory_space<vmem>>, vector<1x1x8x128xbf16>
      %148 = vector.shape_cast %147 : vector<1x1x8x128xbf16> to vector<8x128xbf16>
      %149 = arith.extf %148 : vector<8x128xbf16> to vector<8x128xf32>
      %c4_24 = arith.constant 4 : index
      %c2_25 = arith.constant 2 : index
      %150 = arith.index_cast %35 : i32 to index
      %c0_26 = arith.constant 0 : index
      %151 = vector.load %arg2[%c4_24, %c2_25, %150, %c0_26] : memref<7x5x16x128xbf16, #tpu.memory_space<vmem>>, vector<1x1x8x128xbf16>
      %152 = vector.shape_cast %151 : vector<1x1x8x128xbf16> to vector<8x128xbf16>
      %153 = arith.extf %152 : vector<8x128xbf16> to vector<8x128xf32>
      %c4_27 = arith.constant 4 : index
      %c3_28 = arith.constant 3 : index
      %154 = arith.index_cast %35 : i32 to index
      %c0_29 = arith.constant 0 : index
      %155 = vector.load %arg2[%c4_27, %c3_28, %154, %c0_29] : memref<7x5x16x128xbf16, #tpu.memory_space<vmem>>, vector<1x1x8x128xbf16>
      %156 = vector.shape_cast %155 : vector<1x1x8x128xbf16> to vector<8x128xbf16>
      %157 = arith.extf %156 : vector<8x128xbf16> to vector<8x128xf32>
      %c4_30 = arith.constant 4 : index
      %c4_31 = arith.constant 4 : index
      %158 = arith.index_cast %35 : i32 to index
      %c0_32 = arith.constant 0 : index
      %159 = vector.load %arg2[%c4_30, %c4_31, %158, %c0_32] : memref<7x5x16x128xbf16, #tpu.memory_space<vmem>>, vector<1x1x8x128xbf16>
      %160 = vector.shape_cast %159 : vector<1x1x8x128xbf16> to vector<8x128xbf16>
      %161 = arith.extf %160 : vector<8x128xbf16> to vector<8x128xf32>
      %162 = vector.broadcast %25 : f32 to vector<8x128xf32>
      %163 = arith.mulf %145, %162 : vector<8x128xf32>
      %164 = vector.broadcast %30 : f32 to vector<8x128xf32>
      %165 = arith.addf %163, %164 : vector<8x128xf32>
      %166 = vector.broadcast %26 : f32 to vector<8x128xf32>
      %167 = arith.mulf %149, %166 : vector<8x128xf32>
      %168 = arith.addf %165, %167 : vector<8x128xf32>
      %169 = vector.broadcast %27 : f32 to vector<8x128xf32>
      %170 = arith.mulf %153, %169 : vector<8x128xf32>
      %171 = arith.addf %168, %170 : vector<8x128xf32>
      %172 = vector.broadcast %28 : f32 to vector<8x128xf32>
      %173 = arith.mulf %157, %172 : vector<8x128xf32>
      %174 = arith.addf %171, %173 : vector<8x128xf32>
      %175 = vector.broadcast %29 : f32 to vector<8x128xf32>
      %176 = arith.mulf %161, %175 : vector<8x128xf32>
      %177 = arith.addf %174, %176 : vector<8x128xf32>
      %178 = vector.broadcast %0 : f32 to vector<8x128xf32>
      %179 = arith.mulf %145, %178 : vector<8x128xf32>
      %180 = vector.broadcast %1 : f32 to vector<8x128xf32>
      %181 = arith.mulf %149, %180 : vector<8x128xf32>
      %182 = arith.addf %179, %181 : vector<8x128xf32>
      %183 = vector.broadcast %2 : f32 to vector<8x128xf32>
      %184 = arith.mulf %153, %183 : vector<8x128xf32>
      %185 = arith.addf %182, %184 : vector<8x128xf32>
      %186 = vector.broadcast %3 : f32 to vector<8x128xf32>
      %187 = arith.mulf %157, %186 : vector<8x128xf32>
      %188 = arith.addf %185, %187 : vector<8x128xf32>
      %189 = vector.broadcast %4 : f32 to vector<8x128xf32>
      %190 = arith.mulf %161, %189 : vector<8x128xf32>
      %191 = arith.addf %188, %190 : vector<8x128xf32>
      %192 = vector.broadcast %5 : f32 to vector<8x128xf32>
      %193 = arith.mulf %145, %192 : vector<8x128xf32>
      %194 = vector.broadcast %6 : f32 to vector<8x128xf32>
      %195 = arith.mulf %149, %194 : vector<8x128xf32>
      %196 = arith.addf %193, %195 : vector<8x128xf32>
      %197 = vector.broadcast %7 : f32 to vector<8x128xf32>
      %198 = arith.mulf %153, %197 : vector<8x128xf32>
      %199 = arith.addf %196, %198 : vector<8x128xf32>
      %200 = vector.broadcast %8 : f32 to vector<8x128xf32>
      %201 = arith.mulf %157, %200 : vector<8x128xf32>
      %202 = arith.addf %199, %201 : vector<8x128xf32>
      %203 = vector.broadcast %9 : f32 to vector<8x128xf32>
      %204 = arith.mulf %161, %203 : vector<8x128xf32>
      %205 = arith.addf %202, %204 : vector<8x128xf32>
      %206 = vector.broadcast %10 : f32 to vector<8x128xf32>
      %207 = arith.mulf %145, %206 : vector<8x128xf32>
      %208 = vector.broadcast %11 : f32 to vector<8x128xf32>
      %209 = arith.mulf %149, %208 : vector<8x128xf32>
      %210 = arith.addf %207, %209 : vector<8x128xf32>
      %211 = vector.broadcast %12 : f32 to vector<8x128xf32>
      %212 = arith.mulf %153, %211 : vector<8x128xf32>
      %213 = arith.addf %210, %212 : vector<8x128xf32>
      %214 = vector.broadcast %13 : f32 to vector<8x128xf32>
      %215 = arith.mulf %157, %214 : vector<8x128xf32>
      %216 = arith.addf %213, %215 : vector<8x128xf32>
      %217 = vector.broadcast %14 : f32 to vector<8x128xf32>
      %218 = arith.mulf %161, %217 : vector<8x128xf32>
      %219 = arith.addf %216, %218 : vector<8x128xf32>
      %220 = vector.broadcast %15 : f32 to vector<8x128xf32>
      %221 = arith.mulf %145, %220 : vector<8x128xf32>
      %222 = vector.broadcast %16 : f32 to vector<8x128xf32>
      %223 = arith.mulf %149, %222 : vector<8x128xf32>
      %224 = arith.addf %221, %223 : vector<8x128xf32>
      %225 = vector.broadcast %17 : f32 to vector<8x128xf32>
      %226 = arith.mulf %153, %225 : vector<8x128xf32>
      %227 = arith.addf %224, %226 : vector<8x128xf32>
      %228 = vector.broadcast %18 : f32 to vector<8x128xf32>
      %229 = arith.mulf %157, %228 : vector<8x128xf32>
      %230 = arith.addf %227, %229 : vector<8x128xf32>
      %231 = vector.broadcast %19 : f32 to vector<8x128xf32>
      %232 = arith.mulf %161, %231 : vector<8x128xf32>
      %233 = arith.addf %230, %232 : vector<8x128xf32>
      %234 = vector.broadcast %20 : f32 to vector<8x128xf32>
      %235 = arith.mulf %145, %234 : vector<8x128xf32>
      %236 = vector.broadcast %21 : f32 to vector<8x128xf32>
      %237 = arith.mulf %149, %236 : vector<8x128xf32>
      %238 = arith.addf %235, %237 : vector<8x128xf32>
      %239 = vector.broadcast %22 : f32 to vector<8x128xf32>
      %240 = arith.mulf %153, %239 : vector<8x128xf32>
      %241 = arith.addf %238, %240 : vector<8x128xf32>
      %242 = vector.broadcast %23 : f32 to vector<8x128xf32>
      %243 = arith.mulf %157, %242 : vector<8x128xf32>
      %244 = arith.addf %241, %243 : vector<8x128xf32>
      %245 = vector.broadcast %24 : f32 to vector<8x128xf32>
      %246 = arith.mulf %161, %245 : vector<8x128xf32>
      %247 = arith.addf %244, %246 : vector<8x128xf32>
      %c5_33 = arith.constant 5 : index
      %c0_34 = arith.constant 0 : index
      %248 = arith.index_cast %35 : i32 to index
      %c0_35 = arith.constant 0 : index
      %249 = vector.load %arg2[%c5_33, %c0_34, %248, %c0_35] : memref<7x5x16x128xbf16, #tpu.memory_space<vmem>>, vector<1x1x8x128xbf16>
      %250 = vector.shape_cast %249 : vector<1x1x8x128xbf16> to vector<8x128xbf16>
      %251 = arith.extf %250 : vector<8x128xbf16> to vector<8x128xf32>
      %c5_36 = arith.constant 5 : index
      %c1_37 = arith.constant 1 : index
      %252 = arith.index_cast %35 : i32 to index
      %c0_38 = arith.constant 0 : index
      %253 = vector.load %arg2[%c5_36, %c1_37, %252, %c0_38] : memref<7x5x16x128xbf16, #tpu.memory_space<vmem>>, vector<1x1x8x128xbf16>
      %254 = vector.shape_cast %253 : vector<1x1x8x128xbf16> to vector<8x128xbf16>
      %255 = arith.extf %254 : vector<8x128xbf16> to vector<8x128xf32>
      %c5_39 = arith.constant 5 : index
      %c2_40 = arith.constant 2 : index
      %256 = arith.index_cast %35 : i32 to index
      %c0_41 = arith.constant 0 : index
      %257 = vector.load %arg2[%c5_39, %c2_40, %256, %c0_41] : memref<7x5x16x128xbf16, #tpu.memory_space<vmem>>, vector<1x1x8x128xbf16>
      %258 = vector.shape_cast %257 : vector<1x1x8x128xbf16> to vector<8x128xbf16>
      %259 = arith.extf %258 : vector<8x128xbf16> to vector<8x128xf32>
      %c5_42 = arith.constant 5 : index
      %c3_43 = arith.constant 3 : index
      %260 = arith.index_cast %35 : i32 to index
      %c0_44 = arith.constant 0 : index
      %261 = vector.load %arg2[%c5_42, %c3_43, %260, %c0_44] : memref<7x5x16x128xbf16, #tpu.memory_space<vmem>>, vector<1x1x8x128xbf16>
      %262 = vector.shape_cast %261 : vector<1x1x8x128xbf16> to vector<8x128xbf16>
      %263 = arith.extf %262 : vector<8x128xbf16> to vector<8x128xf32>
      %c5_45 = arith.constant 5 : index
      %c4_46 = arith.constant 4 : index
      %264 = arith.index_cast %35 : i32 to index
      %c0_47 = arith.constant 0 : index
      %265 = vector.load %arg2[%c5_45, %c4_46, %264, %c0_47] : memref<7x5x16x128xbf16, #tpu.memory_space<vmem>>, vector<1x1x8x128xbf16>
      %266 = vector.shape_cast %265 : vector<1x1x8x128xbf16> to vector<8x128xbf16>
      %267 = arith.extf %266 : vector<8x128xbf16> to vector<8x128xf32>
      %268 = vector.broadcast %25 : f32 to vector<8x128xf32>
      %269 = arith.mulf %251, %268 : vector<8x128xf32>
      %270 = vector.broadcast %30 : f32 to vector<8x128xf32>
      %271 = arith.addf %269, %270 : vector<8x128xf32>
      %272 = vector.broadcast %26 : f32 to vector<8x128xf32>
      %273 = arith.mulf %255, %272 : vector<8x128xf32>
      %274 = arith.addf %271, %273 : vector<8x128xf32>
      %275 = vector.broadcast %27 : f32 to vector<8x128xf32>
      %276 = arith.mulf %259, %275 : vector<8x128xf32>
      %277 = arith.addf %274, %276 : vector<8x128xf32>
      %278 = vector.broadcast %28 : f32 to vector<8x128xf32>
      %279 = arith.mulf %263, %278 : vector<8x128xf32>
      %280 = arith.addf %277, %279 : vector<8x128xf32>
      %281 = vector.broadcast %29 : f32 to vector<8x128xf32>
      %282 = arith.mulf %267, %281 : vector<8x128xf32>
      %283 = arith.addf %280, %282 : vector<8x128xf32>
      %284 = vector.broadcast %0 : f32 to vector<8x128xf32>
      %285 = arith.mulf %251, %284 : vector<8x128xf32>
      %286 = vector.broadcast %1 : f32 to vector<8x128xf32>
      %287 = arith.mulf %255, %286 : vector<8x128xf32>
      %288 = arith.addf %285, %287 : vector<8x128xf32>
      %289 = vector.broadcast %2 : f32 to vector<8x128xf32>
      %290 = arith.mulf %259, %289 : vector<8x128xf32>
      %291 = arith.addf %288, %290 : vector<8x128xf32>
      %292 = vector.broadcast %3 : f32 to vector<8x128xf32>
      %293 = arith.mulf %263, %292 : vector<8x128xf32>
      %294 = arith.addf %291, %293 : vector<8x128xf32>
      %295 = vector.broadcast %4 : f32 to vector<8x128xf32>
      %296 = arith.mulf %267, %295 : vector<8x128xf32>
      %297 = arith.addf %294, %296 : vector<8x128xf32>
      %298 = vector.broadcast %5 : f32 to vector<8x128xf32>
      %299 = arith.mulf %251, %298 : vector<8x128xf32>
      %300 = vector.broadcast %6 : f32 to vector<8x128xf32>
      %301 = arith.mulf %255, %300 : vector<8x128xf32>
      %302 = arith.addf %299, %301 : vector<8x128xf32>
      %303 = vector.broadcast %7 : f32 to vector<8x128xf32>
      %304 = arith.mulf %259, %303 : vector<8x128xf32>
      %305 = arith.addf %302, %304 : vector<8x128xf32>
      %306 = vector.broadcast %8 : f32 to vector<8x128xf32>
      %307 = arith.mulf %263, %306 : vector<8x128xf32>
      %308 = arith.addf %305, %307 : vector<8x128xf32>
      %309 = vector.broadcast %9 : f32 to vector<8x128xf32>
      %310 = arith.mulf %267, %309 : vector<8x128xf32>
      %311 = arith.addf %308, %310 : vector<8x128xf32>
      %312 = vector.broadcast %10 : f32 to vector<8x128xf32>
      %313 = arith.mulf %251, %312 : vector<8x128xf32>
      %314 = vector.broadcast %11 : f32 to vector<8x128xf32>
      %315 = arith.mulf %255, %314 : vector<8x128xf32>
      %316 = arith.addf %313, %315 : vector<8x128xf32>
      %317 = vector.broadcast %12 : f32 to vector<8x128xf32>
      %318 = arith.mulf %259, %317 : vector<8x128xf32>
      %319 = arith.addf %316, %318 : vector<8x128xf32>
      %320 = vector.broadcast %13 : f32 to vector<8x128xf32>
      %321 = arith.mulf %263, %320 : vector<8x128xf32>
      %322 = arith.addf %319, %321 : vector<8x128xf32>
      %323 = vector.broadcast %14 : f32 to vector<8x128xf32>
      %324 = arith.mulf %267, %323 : vector<8x128xf32>
      %325 = arith.addf %322, %324 : vector<8x128xf32>
      %326 = vector.broadcast %15 : f32 to vector<8x128xf32>
      %327 = arith.mulf %251, %326 : vector<8x128xf32>
      %328 = vector.broadcast %16 : f32 to vector<8x128xf32>
      %329 = arith.mulf %255, %328 : vector<8x128xf32>
      %330 = arith.addf %327, %329 : vector<8x128xf32>
      %331 = vector.broadcast %17 : f32 to vector<8x128xf32>
      %332 = arith.mulf %259, %331 : vector<8x128xf32>
      %333 = arith.addf %330, %332 : vector<8x128xf32>
      %334 = vector.broadcast %18 : f32 to vector<8x128xf32>
      %335 = arith.mulf %263, %334 : vector<8x128xf32>
      %336 = arith.addf %333, %335 : vector<8x128xf32>
      %337 = vector.broadcast %19 : f32 to vector<8x128xf32>
      %338 = arith.mulf %267, %337 : vector<8x128xf32>
      %339 = arith.addf %336, %338 : vector<8x128xf32>
      %340 = vector.broadcast %20 : f32 to vector<8x128xf32>
      %341 = arith.mulf %251, %340 : vector<8x128xf32>
      %342 = vector.broadcast %21 : f32 to vector<8x128xf32>
      %343 = arith.mulf %255, %342 : vector<8x128xf32>
      %344 = arith.addf %341, %343 : vector<8x128xf32>
      %345 = vector.broadcast %22 : f32 to vector<8x128xf32>
      %346 = arith.mulf %259, %345 : vector<8x128xf32>
      %347 = arith.addf %344, %346 : vector<8x128xf32>
      %348 = vector.broadcast %23 : f32 to vector<8x128xf32>
      %349 = arith.mulf %263, %348 : vector<8x128xf32>
      %350 = arith.addf %347, %349 : vector<8x128xf32>
      %351 = vector.broadcast %24 : f32 to vector<8x128xf32>
      %352 = arith.mulf %267, %351 : vector<8x128xf32>
      %353 = arith.addf %350, %352 : vector<8x128xf32>
      %c6_48 = arith.constant 6 : index
      %c0_49 = arith.constant 0 : index
      %354 = arith.index_cast %35 : i32 to index
      %c0_50 = arith.constant 0 : index
      %355 = vector.load %arg2[%c6_48, %c0_49, %354, %c0_50] : memref<7x5x16x128xbf16, #tpu.memory_space<vmem>>, vector<1x1x8x128xbf16>
      %356 = vector.shape_cast %355 : vector<1x1x8x128xbf16> to vector<8x128xbf16>
      %357 = arith.extf %356 : vector<8x128xbf16> to vector<8x128xf32>
      %c6_51 = arith.constant 6 : index
      %c1_52 = arith.constant 1 : index
      %358 = arith.index_cast %35 : i32 to index
      %c0_53 = arith.constant 0 : index
      %359 = vector.load %arg2[%c6_51, %c1_52, %358, %c0_53] : memref<7x5x16x128xbf16, #tpu.memory_space<vmem>>, vector<1x1x8x128xbf16>
      %360 = vector.shape_cast %359 : vector<1x1x8x128xbf16> to vector<8x128xbf16>
      %361 = arith.extf %360 : vector<8x128xbf16> to vector<8x128xf32>
      %c6_54 = arith.constant 6 : index
      %c2_55 = arith.constant 2 : index
      %362 = arith.index_cast %35 : i32 to index
      %c0_56 = arith.constant 0 : index
      %363 = vector.load %arg2[%c6_54, %c2_55, %362, %c0_56] : memref<7x5x16x128xbf16, #tpu.memory_space<vmem>>, vector<1x1x8x128xbf16>
      %364 = vector.shape_cast %363 : vector<1x1x8x128xbf16> to vector<8x128xbf16>
      %365 = arith.extf %364 : vector<8x128xbf16> to vector<8x128xf32>
      %c6_57 = arith.constant 6 : index
      %c3_58 = arith.constant 3 : index
      %366 = arith.index_cast %35 : i32 to index
      %c0_59 = arith.constant 0 : index
      %367 = vector.load %arg2[%c6_57, %c3_58, %366, %c0_59] : memref<7x5x16x128xbf16, #tpu.memory_space<vmem>>, vector<1x1x8x128xbf16>
      %368 = vector.shape_cast %367 : vector<1x1x8x128xbf16> to vector<8x128xbf16>
      %369 = arith.extf %368 : vector<8x128xbf16> to vector<8x128xf32>
      %c6_60 = arith.constant 6 : index
      %c4_61 = arith.constant 4 : index
      %370 = arith.index_cast %35 : i32 to index
      %c0_62 = arith.constant 0 : index
      %371 = vector.load %arg2[%c6_60, %c4_61, %370, %c0_62] : memref<7x5x16x128xbf16, #tpu.memory_space<vmem>>, vector<1x1x8x128xbf16>
      %372 = vector.shape_cast %371 : vector<1x1x8x128xbf16> to vector<8x128xbf16>
      %373 = arith.extf %372 : vector<8x128xbf16> to vector<8x128xf32>
      %374 = vector.broadcast %25 : f32 to vector<8x128xf32>
      %375 = arith.mulf %357, %374 : vector<8x128xf32>
      %376 = vector.broadcast %30 : f32 to vector<8x128xf32>
      %377 = arith.addf %375, %376 : vector<8x128xf32>
      %378 = vector.broadcast %26 : f32 to vector<8x128xf32>
      %379 = arith.mulf %361, %378 : vector<8x128xf32>
      %380 = arith.addf %377, %379 : vector<8x128xf32>
      %381 = vector.broadcast %27 : f32 to vector<8x128xf32>
      %382 = arith.mulf %365, %381 : vector<8x128xf32>
      %383 = arith.addf %380, %382 : vector<8x128xf32>
      %384 = vector.broadcast %28 : f32 to vector<8x128xf32>
      %385 = arith.mulf %369, %384 : vector<8x128xf32>
      %386 = arith.addf %383, %385 : vector<8x128xf32>
      %387 = vector.broadcast %29 : f32 to vector<8x128xf32>
      %388 = arith.mulf %373, %387 : vector<8x128xf32>
      %389 = arith.addf %386, %388 : vector<8x128xf32>
      %390 = vector.broadcast %0 : f32 to vector<8x128xf32>
      %391 = arith.mulf %357, %390 : vector<8x128xf32>
      %392 = vector.broadcast %1 : f32 to vector<8x128xf32>
      %393 = arith.mulf %361, %392 : vector<8x128xf32>
      %394 = arith.addf %391, %393 : vector<8x128xf32>
      %395 = vector.broadcast %2 : f32 to vector<8x128xf32>
      %396 = arith.mulf %365, %395 : vector<8x128xf32>
      %397 = arith.addf %394, %396 : vector<8x128xf32>
      %398 = vector.broadcast %3 : f32 to vector<8x128xf32>
      %399 = arith.mulf %369, %398 : vector<8x128xf32>
      %400 = arith.addf %397, %399 : vector<8x128xf32>
      %401 = vector.broadcast %4 : f32 to vector<8x128xf32>
      %402 = arith.mulf %373, %401 : vector<8x128xf32>
      %403 = arith.addf %400, %402 : vector<8x128xf32>
      %404 = vector.broadcast %5 : f32 to vector<8x128xf32>
      %405 = arith.mulf %357, %404 : vector<8x128xf32>
      %406 = vector.broadcast %6 : f32 to vector<8x128xf32>
      %407 = arith.mulf %361, %406 : vector<8x128xf32>
      %408 = arith.addf %405, %407 : vector<8x128xf32>
      %409 = vector.broadcast %7 : f32 to vector<8x128xf32>
      %410 = arith.mulf %365, %409 : vector<8x128xf32>
      %411 = arith.addf %408, %410 : vector<8x128xf32>
      %412 = vector.broadcast %8 : f32 to vector<8x128xf32>
      %413 = arith.mulf %369, %412 : vector<8x128xf32>
      %414 = arith.addf %411, %413 : vector<8x128xf32>
      %415 = vector.broadcast %9 : f32 to vector<8x128xf32>
      %416 = arith.mulf %373, %415 : vector<8x128xf32>
      %417 = arith.addf %414, %416 : vector<8x128xf32>
      %418 = vector.broadcast %10 : f32 to vector<8x128xf32>
      %419 = arith.mulf %357, %418 : vector<8x128xf32>
      %420 = vector.broadcast %11 : f32 to vector<8x128xf32>
      %421 = arith.mulf %361, %420 : vector<8x128xf32>
      %422 = arith.addf %419, %421 : vector<8x128xf32>
      %423 = vector.broadcast %12 : f32 to vector<8x128xf32>
      %424 = arith.mulf %365, %423 : vector<8x128xf32>
      %425 = arith.addf %422, %424 : vector<8x128xf32>
      %426 = vector.broadcast %13 : f32 to vector<8x128xf32>
      %427 = arith.mulf %369, %426 : vector<8x128xf32>
      %428 = arith.addf %425, %427 : vector<8x128xf32>
      %429 = vector.broadcast %14 : f32 to vector<8x128xf32>
      %430 = arith.mulf %373, %429 : vector<8x128xf32>
      %431 = arith.addf %428, %430 : vector<8x128xf32>
      %432 = vector.broadcast %15 : f32 to vector<8x128xf32>
      %433 = arith.mulf %357, %432 : vector<8x128xf32>
      %434 = vector.broadcast %16 : f32 to vector<8x128xf32>
      %435 = arith.mulf %361, %434 : vector<8x128xf32>
      %436 = arith.addf %433, %435 : vector<8x128xf32>
      %437 = vector.broadcast %17 : f32 to vector<8x128xf32>
      %438 = arith.mulf %365, %437 : vector<8x128xf32>
      %439 = arith.addf %436, %438 : vector<8x128xf32>
      %440 = vector.broadcast %18 : f32 to vector<8x128xf32>
      %441 = arith.mulf %369, %440 : vector<8x128xf32>
      %442 = arith.addf %439, %441 : vector<8x128xf32>
      %443 = vector.broadcast %19 : f32 to vector<8x128xf32>
      %444 = arith.mulf %373, %443 : vector<8x128xf32>
      %445 = arith.addf %442, %444 : vector<8x128xf32>
      %446 = vector.broadcast %20 : f32 to vector<8x128xf32>
      %447 = arith.mulf %357, %446 : vector<8x128xf32>
      %448 = vector.broadcast %21 : f32 to vector<8x128xf32>
      %449 = arith.mulf %361, %448 : vector<8x128xf32>
      %450 = arith.addf %447, %449 : vector<8x128xf32>
      %451 = vector.broadcast %22 : f32 to vector<8x128xf32>
      %452 = arith.mulf %365, %451 : vector<8x128xf32>
      %453 = arith.addf %450, %452 : vector<8x128xf32>
      %454 = vector.broadcast %23 : f32 to vector<8x128xf32>
      %455 = arith.mulf %369, %454 : vector<8x128xf32>
      %456 = arith.addf %453, %455 : vector<8x128xf32>
      %457 = vector.broadcast %24 : f32 to vector<8x128xf32>
      %458 = arith.mulf %373, %457 : vector<8x128xf32>
      %459 = arith.addf %456, %458 : vector<8x128xf32>
      %c0_63 = arith.constant 0 : index
      %c0_64 = arith.constant 0 : index
      %460 = arith.index_cast %35 : i32 to index
      %c0_65 = arith.constant 0 : index
      %461 = vector.load %arg2[%c0_63, %c0_64, %460, %c0_65] : memref<7x5x16x128xbf16, #tpu.memory_space<vmem>>, vector<1x1x8x128xbf16>
      %462 = vector.shape_cast %461 : vector<1x1x8x128xbf16> to vector<8x128xbf16>
      %463 = arith.extf %462 : vector<8x128xbf16> to vector<8x128xf32>
      %c0_66 = arith.constant 0 : index
      %c1_67 = arith.constant 1 : index
      %464 = arith.index_cast %35 : i32 to index
      %c0_68 = arith.constant 0 : index
      %465 = vector.load %arg2[%c0_66, %c1_67, %464, %c0_68] : memref<7x5x16x128xbf16, #tpu.memory_space<vmem>>, vector<1x1x8x128xbf16>
      %466 = vector.shape_cast %465 : vector<1x1x8x128xbf16> to vector<8x128xbf16>
      %467 = arith.extf %466 : vector<8x128xbf16> to vector<8x128xf32>
      %c0_69 = arith.constant 0 : index
      %c2_70 = arith.constant 2 : index
      %468 = arith.index_cast %35 : i32 to index
      %c0_71 = arith.constant 0 : index
      %469 = vector.load %arg2[%c0_69, %c2_70, %468, %c0_71] : memref<7x5x16x128xbf16, #tpu.memory_space<vmem>>, vector<1x1x8x128xbf16>
      %470 = vector.shape_cast %469 : vector<1x1x8x128xbf16> to vector<8x128xbf16>
      %471 = arith.extf %470 : vector<8x128xbf16> to vector<8x128xf32>
      %c0_72 = arith.constant 0 : index
      %c3_73 = arith.constant 3 : index
      %472 = arith.index_cast %35 : i32 to index
      %c0_74 = arith.constant 0 : index
      %473 = vector.load %arg2[%c0_72, %c3_73, %472, %c0_74] : memref<7x5x16x128xbf16, #tpu.memory_space<vmem>>, vector<1x1x8x128xbf16>
      %474 = vector.shape_cast %473 : vector<1x1x8x128xbf16> to vector<8x128xbf16>
      %475 = arith.extf %474 : vector<8x128xbf16> to vector<8x128xf32>
      %c0_75 = arith.constant 0 : index
      %c4_76 = arith.constant 4 : index
      %476 = arith.index_cast %35 : i32 to index
      %c0_77 = arith.constant 0 : index
      %477 = vector.load %arg2[%c0_75, %c4_76, %476, %c0_77] : memref<7x5x16x128xbf16, #tpu.memory_space<vmem>>, vector<1x1x8x128xbf16>
      %478 = vector.shape_cast %477 : vector<1x1x8x128xbf16> to vector<8x128xbf16>
      %479 = arith.extf %478 : vector<8x128xbf16> to vector<8x128xf32>
      %480 = vector.broadcast %25 : f32 to vector<8x128xf32>
      %481 = arith.mulf %463, %480 : vector<8x128xf32>
      %482 = vector.broadcast %26 : f32 to vector<8x128xf32>
      %483 = arith.mulf %467, %482 : vector<8x128xf32>
      %484 = arith.addf %481, %483 : vector<8x128xf32>
      %485 = vector.broadcast %27 : f32 to vector<8x128xf32>
      %486 = arith.mulf %471, %485 : vector<8x128xf32>
      %487 = arith.addf %484, %486 : vector<8x128xf32>
      %488 = vector.broadcast %28 : f32 to vector<8x128xf32>
      %489 = arith.mulf %475, %488 : vector<8x128xf32>
      %490 = arith.addf %487, %489 : vector<8x128xf32>
      %491 = vector.broadcast %29 : f32 to vector<8x128xf32>
      %492 = arith.mulf %479, %491 : vector<8x128xf32>
      %493 = arith.addf %490, %492 : vector<8x128xf32>
      %494 = arith.mulf %463, %85 : vector<8x128xf32>
      %495 = arith.mulf %467, %99 : vector<8x128xf32>
      %496 = arith.addf %494, %495 : vector<8x128xf32>
      %497 = arith.mulf %471, %113 : vector<8x128xf32>
      %498 = arith.addf %496, %497 : vector<8x128xf32>
      %499 = arith.mulf %475, %127 : vector<8x128xf32>
      %500 = arith.addf %498, %499 : vector<8x128xf32>
      %501 = arith.mulf %479, %141 : vector<8x128xf32>
      %502 = arith.addf %500, %501 : vector<8x128xf32>
      %503 = arith.addf %493, %71 : vector<8x128xf32>
      %504 = arith.addf %502, %503 : vector<8x128xf32>
      %c0_78 = arith.constant 0 : index
      %c0_79 = arith.constant 0 : index
      %505 = arith.index_cast %35 : i32 to index
      %c0_80 = arith.constant 0 : index
      %506 = vector.load %arg3[%c0_78, %c0_79, %505, %c0_80] : memref<3x4x16x128xbf16, #tpu.memory_space<vmem>>, vector<1x1x8x128xbf16>
      %507 = vector.shape_cast %506 : vector<1x1x8x128xbf16> to vector<8x128xbf16>
      %508 = arith.extf %507 : vector<8x128xbf16> to vector<8x128xf32>
      %509 = arith.addf %504, %508 : vector<8x128xf32>
      %510 = arith.mulf %463, %191 : vector<8x128xf32>
      %511 = arith.mulf %467, %205 : vector<8x128xf32>
      %512 = arith.addf %510, %511 : vector<8x128xf32>
      %513 = arith.mulf %471, %219 : vector<8x128xf32>
      %514 = arith.addf %512, %513 : vector<8x128xf32>
      %515 = arith.mulf %475, %233 : vector<8x128xf32>
      %516 = arith.addf %514, %515 : vector<8x128xf32>
      %517 = arith.mulf %479, %247 : vector<8x128xf32>
      %518 = arith.addf %516, %517 : vector<8x128xf32>
      %519 = arith.addf %493, %177 : vector<8x128xf32>
      %520 = arith.addf %518, %519 : vector<8x128xf32>
      %c0_81 = arith.constant 0 : index
      %c1_82 = arith.constant 1 : index
      %521 = arith.index_cast %35 : i32 to index
      %c0_83 = arith.constant 0 : index
      %522 = vector.load %arg3[%c0_81, %c1_82, %521, %c0_83] : memref<3x4x16x128xbf16, #tpu.memory_space<vmem>>, vector<1x1x8x128xbf16>
      %523 = vector.shape_cast %522 : vector<1x1x8x128xbf16> to vector<8x128xbf16>
      %524 = arith.extf %523 : vector<8x128xbf16> to vector<8x128xf32>
      %525 = arith.addf %520, %524 : vector<8x128xf32>
      %526 = arith.mulf %463, %297 : vector<8x128xf32>
      %527 = arith.mulf %467, %311 : vector<8x128xf32>
      %528 = arith.addf %526, %527 : vector<8x128xf32>
      %529 = arith.mulf %471, %325 : vector<8x128xf32>
      %530 = arith.addf %528, %529 : vector<8x128xf32>
      %531 = arith.mulf %475, %339 : vector<8x128xf32>
      %532 = arith.addf %530, %531 : vector<8x128xf32>
      %533 = arith.mulf %479, %353 : vector<8x128xf32>
      %534 = arith.addf %532, %533 : vector<8x128xf32>
      %535 = arith.addf %493, %283 : vector<8x128xf32>
      %536 = arith.addf %534, %535 : vector<8x128xf32>
      %c0_84 = arith.constant 0 : index
      %c2_85 = arith.constant 2 : index
      %537 = arith.index_cast %35 : i32 to index
      %c0_86 = arith.constant 0 : index
      %538 = vector.load %arg3[%c0_84, %c2_85, %537, %c0_86] : memref<3x4x16x128xbf16, #tpu.memory_space<vmem>>, vector<1x1x8x128xbf16>
      %539 = vector.shape_cast %538 : vector<1x1x8x128xbf16> to vector<8x128xbf16>
      %540 = arith.extf %539 : vector<8x128xbf16> to vector<8x128xf32>
      %541 = arith.addf %536, %540 : vector<8x128xf32>
      %542 = arith.mulf %463, %403 : vector<8x128xf32>
      %543 = arith.mulf %467, %417 : vector<8x128xf32>
      %544 = arith.addf %542, %543 : vector<8x128xf32>
      %545 = arith.mulf %471, %431 : vector<8x128xf32>
      %546 = arith.addf %544, %545 : vector<8x128xf32>
      %547 = arith.mulf %475, %445 : vector<8x128xf32>
      %548 = arith.addf %546, %547 : vector<8x128xf32>
      %549 = arith.mulf %479, %459 : vector<8x128xf32>
      %550 = arith.addf %548, %549 : vector<8x128xf32>
      %551 = arith.addf %493, %389 : vector<8x128xf32>
      %552 = arith.addf %550, %551 : vector<8x128xf32>
      %c0_87 = arith.constant 0 : index
      %c3_88 = arith.constant 3 : index
      %553 = arith.index_cast %35 : i32 to index
      %c0_89 = arith.constant 0 : index
      %554 = vector.load %arg3[%c0_87, %c3_88, %553, %c0_89] : memref<3x4x16x128xbf16, #tpu.memory_space<vmem>>, vector<1x1x8x128xbf16>
      %555 = vector.shape_cast %554 : vector<1x1x8x128xbf16> to vector<8x128xbf16>
      %556 = arith.extf %555 : vector<8x128xbf16> to vector<8x128xf32>
      %557 = arith.addf %552, %556 : vector<8x128xf32>
      %558 = arith.maximumf %509, %525 : vector<8x128xf32>
      %559 = arith.maximumf %541, %557 : vector<8x128xf32>
      %560 = arith.maximumf %558, %559 : vector<8x128xf32>
      %561 = arith.subf %509, %560 : vector<8x128xf32>
      %562 = math.exp %561 : vector<8x128xf32>
      %563 = arith.subf %525, %560 : vector<8x128xf32>
      %564 = math.exp %563 : vector<8x128xf32>
      %565 = arith.subf %541, %560 : vector<8x128xf32>
      %566 = math.exp %565 : vector<8x128xf32>
      %567 = arith.subf %557, %560 : vector<8x128xf32>
      %568 = math.exp %567 : vector<8x128xf32>
      %569 = arith.addf %562, %564 : vector<8x128xf32>
      %570 = arith.addf %566, %568 : vector<8x128xf32>
      %571 = arith.addf %569, %570 : vector<8x128xf32>
      %572 = tpu.reciprocal %571 {approx = true} : vector<8x128xf32> -> vector<8x128xf32>
      %573 = arith.mulf %562, %572 : vector<8x128xf32>
      %574 = arith.mulf %564, %572 : vector<8x128xf32>
      %575 = arith.mulf %566, %572 : vector<8x128xf32>
      %576 = arith.mulf %568, %572 : vector<8x128xf32>
      %c1_90 = arith.constant 1 : index
      %c0_91 = arith.constant 0 : index
      %577 = arith.index_cast %35 : i32 to index
      %c0_92 = arith.constant 0 : index
      %578 = vector.load %arg2[%c1_90, %c0_91, %577, %c0_92] : memref<7x5x16x128xbf16, #tpu.memory_space<vmem>>, vector<1x1x8x128xbf16>
      %579 = vector.shape_cast %578 : vector<1x1x8x128xbf16> to vector<8x128xbf16>
      %580 = arith.extf %579 : vector<8x128xbf16> to vector<8x128xf32>
      %c1_93 = arith.constant 1 : index
      %c1_94 = arith.constant 1 : index
      %581 = arith.index_cast %35 : i32 to index
      %c0_95 = arith.constant 0 : index
      %582 = vector.load %arg2[%c1_93, %c1_94, %581, %c0_95] : memref<7x5x16x128xbf16, #tpu.memory_space<vmem>>, vector<1x1x8x128xbf16>
      %583 = vector.shape_cast %582 : vector<1x1x8x128xbf16> to vector<8x128xbf16>
      %584 = arith.extf %583 : vector<8x128xbf16> to vector<8x128xf32>
      %c1_96 = arith.constant 1 : index
      %c2_97 = arith.constant 2 : index
      %585 = arith.index_cast %35 : i32 to index
      %c0_98 = arith.constant 0 : index
      %586 = vector.load %arg2[%c1_96, %c2_97, %585, %c0_98] : memref<7x5x16x128xbf16, #tpu.memory_space<vmem>>, vector<1x1x8x128xbf16>
      %587 = vector.shape_cast %586 : vector<1x1x8x128xbf16> to vector<8x128xbf16>
      %588 = arith.extf %587 : vector<8x128xbf16> to vector<8x128xf32>
      %c1_99 = arith.constant 1 : index
      %c3_100 = arith.constant 3 : index
      %589 = arith.index_cast %35 : i32 to index
      %c0_101 = arith.constant 0 : index
      %590 = vector.load %arg2[%c1_99, %c3_100, %589, %c0_101] : memref<7x5x16x128xbf16, #tpu.memory_space<vmem>>, vector<1x1x8x128xbf16>
      %591 = vector.shape_cast %590 : vector<1x1x8x128xbf16> to vector<8x128xbf16>
      %592 = arith.extf %591 : vector<8x128xbf16> to vector<8x128xf32>
      %c1_102 = arith.constant 1 : index
      %c4_103 = arith.constant 4 : index
      %593 = arith.index_cast %35 : i32 to index
      %c0_104 = arith.constant 0 : index
      %594 = vector.load %arg2[%c1_102, %c4_103, %593, %c0_104] : memref<7x5x16x128xbf16, #tpu.memory_space<vmem>>, vector<1x1x8x128xbf16>
      %595 = vector.shape_cast %594 : vector<1x1x8x128xbf16> to vector<8x128xbf16>
      %596 = arith.extf %595 : vector<8x128xbf16> to vector<8x128xf32>
      %597 = vector.broadcast %25 : f32 to vector<8x128xf32>
      %598 = arith.mulf %580, %597 : vector<8x128xf32>
      %599 = vector.broadcast %26 : f32 to vector<8x128xf32>
      %600 = arith.mulf %584, %599 : vector<8x128xf32>
      %601 = arith.addf %598, %600 : vector<8x128xf32>
      %602 = vector.broadcast %27 : f32 to vector<8x128xf32>
      %603 = arith.mulf %588, %602 : vector<8x128xf32>
      %604 = arith.addf %601, %603 : vector<8x128xf32>
      %605 = vector.broadcast %28 : f32 to vector<8x128xf32>
      %606 = arith.mulf %592, %605 : vector<8x128xf32>
      %607 = arith.addf %604, %606 : vector<8x128xf32>
      %608 = vector.broadcast %29 : f32 to vector<8x128xf32>
      %609 = arith.mulf %596, %608 : vector<8x128xf32>
      %610 = arith.addf %607, %609 : vector<8x128xf32>
      %611 = arith.mulf %580, %85 : vector<8x128xf32>
      %612 = arith.mulf %584, %99 : vector<8x128xf32>
      %613 = arith.addf %611, %612 : vector<8x128xf32>
      %614 = arith.mulf %588, %113 : vector<8x128xf32>
      %615 = arith.addf %613, %614 : vector<8x128xf32>
      %616 = arith.mulf %592, %127 : vector<8x128xf32>
      %617 = arith.addf %615, %616 : vector<8x128xf32>
      %618 = arith.mulf %596, %141 : vector<8x128xf32>
      %619 = arith.addf %617, %618 : vector<8x128xf32>
      %620 = arith.addf %610, %71 : vector<8x128xf32>
      %621 = arith.addf %619, %620 : vector<8x128xf32>
      %c1_105 = arith.constant 1 : index
      %c0_106 = arith.constant 0 : index
      %622 = arith.index_cast %35 : i32 to index
      %c0_107 = arith.constant 0 : index
      %623 = vector.load %arg3[%c1_105, %c0_106, %622, %c0_107] : memref<3x4x16x128xbf16, #tpu.memory_space<vmem>>, vector<1x1x8x128xbf16>
      %624 = vector.shape_cast %623 : vector<1x1x8x128xbf16> to vector<8x128xbf16>
      %625 = arith.extf %624 : vector<8x128xbf16> to vector<8x128xf32>
      %626 = arith.addf %621, %625 : vector<8x128xf32>
      %627 = arith.mulf %580, %191 : vector<8x128xf32>
      %628 = arith.mulf %584, %205 : vector<8x128xf32>
      %629 = arith.addf %627, %628 : vector<8x128xf32>
      %630 = arith.mulf %588, %219 : vector<8x128xf32>
      %631 = arith.addf %629, %630 : vector<8x128xf32>
      %632 = arith.mulf %592, %233 : vector<8x128xf32>
      %633 = arith.addf %631, %632 : vector<8x128xf32>
      %634 = arith.mulf %596, %247 : vector<8x128xf32>
      %635 = arith.addf %633, %634 : vector<8x128xf32>
      %636 = arith.addf %610, %177 : vector<8x128xf32>
      %637 = arith.addf %635, %636 : vector<8x128xf32>
      %c1_108 = arith.constant 1 : index
      %c1_109 = arith.constant 1 : index
      %638 = arith.index_cast %35 : i32 to index
      %c0_110 = arith.constant 0 : index
      %639 = vector.load %arg3[%c1_108, %c1_109, %638, %c0_110] : memref<3x4x16x128xbf16, #tpu.memory_space<vmem>>, vector<1x1x8x128xbf16>
      %640 = vector.shape_cast %639 : vector<1x1x8x128xbf16> to vector<8x128xbf16>
      %641 = arith.extf %640 : vector<8x128xbf16> to vector<8x128xf32>
      %642 = arith.addf %637, %641 : vector<8x128xf32>
      %643 = arith.mulf %580, %297 : vector<8x128xf32>
      %644 = arith.mulf %584, %311 : vector<8x128xf32>
      %645 = arith.addf %643, %644 : vector<8x128xf32>
      %646 = arith.mulf %588, %325 : vector<8x128xf32>
      %647 = arith.addf %645, %646 : vector<8x128xf32>
      %648 = arith.mulf %592, %339 : vector<8x128xf32>
      %649 = arith.addf %647, %648 : vector<8x128xf32>
      %650 = arith.mulf %596, %353 : vector<8x128xf32>
      %651 = arith.addf %649, %650 : vector<8x128xf32>
      %652 = arith.addf %610, %283 : vector<8x128xf32>
      %653 = arith.addf %651, %652 : vector<8x128xf32>
      %c1_111 = arith.constant 1 : index
      %c2_112 = arith.constant 2 : index
      %654 = arith.index_cast %35 : i32 to index
      %c0_113 = arith.constant 0 : index
      %655 = vector.load %arg3[%c1_111, %c2_112, %654, %c0_113] : memref<3x4x16x128xbf16, #tpu.memory_space<vmem>>, vector<1x1x8x128xbf16>
      %656 = vector.shape_cast %655 : vector<1x1x8x128xbf16> to vector<8x128xbf16>
      %657 = arith.extf %656 : vector<8x128xbf16> to vector<8x128xf32>
      %658 = arith.addf %653, %657 : vector<8x128xf32>
      %659 = arith.mulf %580, %403 : vector<8x128xf32>
      %660 = arith.mulf %584, %417 : vector<8x128xf32>
      %661 = arith.addf %659, %660 : vector<8x128xf32>
      %662 = arith.mulf %588, %431 : vector<8x128xf32>
      %663 = arith.addf %661, %662 : vector<8x128xf32>
      %664 = arith.mulf %592, %445 : vector<8x128xf32>
      %665 = arith.addf %663, %664 : vector<8x128xf32>
      %666 = arith.mulf %596, %459 : vector<8x128xf32>
      %667 = arith.addf %665, %666 : vector<8x128xf32>
      %668 = arith.addf %610, %389 : vector<8x128xf32>
      %669 = arith.addf %667, %668 : vector<8x128xf32>
      %c1_114 = arith.constant 1 : index
      %c3_115 = arith.constant 3 : index
      %670 = arith.index_cast %35 : i32 to index
      %c0_116 = arith.constant 0 : index
      %671 = vector.load %arg3[%c1_114, %c3_115, %670, %c0_116] : memref<3x4x16x128xbf16, #tpu.memory_space<vmem>>, vector<1x1x8x128xbf16>
      %672 = vector.shape_cast %671 : vector<1x1x8x128xbf16> to vector<8x128xbf16>
      %673 = arith.extf %672 : vector<8x128xbf16> to vector<8x128xf32>
      %674 = arith.addf %669, %673 : vector<8x128xf32>
      %675 = arith.maximumf %626, %642 : vector<8x128xf32>
      %676 = arith.maximumf %658, %674 : vector<8x128xf32>
      %677 = arith.maximumf %675, %676 : vector<8x128xf32>
      %678 = arith.subf %626, %677 : vector<8x128xf32>
      %679 = math.exp %678 : vector<8x128xf32>
      %680 = arith.subf %642, %677 : vector<8x128xf32>
      %681 = math.exp %680 : vector<8x128xf32>
      %682 = arith.subf %658, %677 : vector<8x128xf32>
      %683 = math.exp %682 : vector<8x128xf32>
      %684 = arith.subf %674, %677 : vector<8x128xf32>
      %685 = math.exp %684 : vector<8x128xf32>
      %686 = arith.addf %679, %681 : vector<8x128xf32>
      %687 = arith.addf %683, %685 : vector<8x128xf32>
      %688 = arith.addf %686, %687 : vector<8x128xf32>
      %689 = tpu.reciprocal %688 {approx = true} : vector<8x128xf32> -> vector<8x128xf32>
      %690 = arith.mulf %679, %689 : vector<8x128xf32>
      %691 = arith.mulf %681, %689 : vector<8x128xf32>
      %692 = arith.mulf %683, %689 : vector<8x128xf32>
      %693 = arith.mulf %685, %689 : vector<8x128xf32>
      %c2_117 = arith.constant 2 : index
      %c0_118 = arith.constant 0 : index
      %694 = arith.index_cast %35 : i32 to index
      %c0_119 = arith.constant 0 : index
      %695 = vector.load %arg2[%c2_117, %c0_118, %694, %c0_119] : memref<7x5x16x128xbf16, #tpu.memory_space<vmem>>, vector<1x1x8x128xbf16>
      %696 = vector.shape_cast %695 : vector<1x1x8x128xbf16> to vector<8x128xbf16>
      %697 = arith.extf %696 : vector<8x128xbf16> to vector<8x128xf32>
      %c2_120 = arith.constant 2 : index
      %c1_121 = arith.constant 1 : index
      %698 = arith.index_cast %35 : i32 to index
      %c0_122 = arith.constant 0 : index
      %699 = vector.load %arg2[%c2_120, %c1_121, %698, %c0_122] : memref<7x5x16x128xbf16, #tpu.memory_space<vmem>>, vector<1x1x8x128xbf16>
      %700 = vector.shape_cast %699 : vector<1x1x8x128xbf16> to vector<8x128xbf16>
      %701 = arith.extf %700 : vector<8x128xbf16> to vector<8x128xf32>
      %c2_123 = arith.constant 2 : index
      %c2_124 = arith.constant 2 : index
      %702 = arith.index_cast %35 : i32 to index
      %c0_125 = arith.constant 0 : index
      %703 = vector.load %arg2[%c2_123, %c2_124, %702, %c0_125] : memref<7x5x16x128xbf16, #tpu.memory_space<vmem>>, vector<1x1x8x128xbf16>
      %704 = vector.shape_cast %703 : vector<1x1x8x128xbf16> to vector<8x128xbf16>
      %705 = arith.extf %704 : vector<8x128xbf16> to vector<8x128xf32>
      %c2_126 = arith.constant 2 : index
      %c3_127 = arith.constant 3 : index
      %706 = arith.index_cast %35 : i32 to index
      %c0_128 = arith.constant 0 : index
      %707 = vector.load %arg2[%c2_126, %c3_127, %706, %c0_128] : memref<7x5x16x128xbf16, #tpu.memory_space<vmem>>, vector<1x1x8x128xbf16>
      %708 = vector.shape_cast %707 : vector<1x1x8x128xbf16> to vector<8x128xbf16>
      %709 = arith.extf %708 : vector<8x128xbf16> to vector<8x128xf32>
      %c2_129 = arith.constant 2 : index
      %c4_130 = arith.constant 4 : index
      %710 = arith.index_cast %35 : i32 to index
      %c0_131 = arith.constant 0 : index
      %711 = vector.load %arg2[%c2_129, %c4_130, %710, %c0_131] : memref<7x5x16x128xbf16, #tpu.memory_space<vmem>>, vector<1x1x8x128xbf16>
      %712 = vector.shape_cast %711 : vector<1x1x8x128xbf16> to vector<8x128xbf16>
      %713 = arith.extf %712 : vector<8x128xbf16> to vector<8x128xf32>
      %714 = vector.broadcast %25 : f32 to vector<8x128xf32>
      %715 = arith.mulf %697, %714 : vector<8x128xf32>
      %716 = vector.broadcast %26 : f32 to vector<8x128xf32>
      %717 = arith.mulf %701, %716 : vector<8x128xf32>
      %718 = arith.addf %715, %717 : vector<8x128xf32>
      %719 = vector.broadcast %27 : f32 to vector<8x128xf32>
      %720 = arith.mulf %705, %719 : vector<8x128xf32>
      %721 = arith.addf %718, %720 : vector<8x128xf32>
      %722 = vector.broadcast %28 : f32 to vector<8x128xf32>
      %723 = arith.mulf %709, %722 : vector<8x128xf32>
      %724 = arith.addf %721, %723 : vector<8x128xf32>
      %725 = vector.broadcast %29 : f32 to vector<8x128xf32>
      %726 = arith.mulf %713, %725 : vector<8x128xf32>
      %727 = arith.addf %724, %726 : vector<8x128xf32>
      %728 = arith.mulf %697, %85 : vector<8x128xf32>
      %729 = arith.mulf %701, %99 : vector<8x128xf32>
      %730 = arith.addf %728, %729 : vector<8x128xf32>
      %731 = arith.mulf %705, %113 : vector<8x128xf32>
      %732 = arith.addf %730, %731 : vector<8x128xf32>
      %733 = arith.mulf %709, %127 : vector<8x128xf32>
      %734 = arith.addf %732, %733 : vector<8x128xf32>
      %735 = arith.mulf %713, %141 : vector<8x128xf32>
      %736 = arith.addf %734, %735 : vector<8x128xf32>
      %737 = arith.addf %727, %71 : vector<8x128xf32>
      %738 = arith.addf %736, %737 : vector<8x128xf32>
      %c2_132 = arith.constant 2 : index
      %c0_133 = arith.constant 0 : index
      %739 = arith.index_cast %35 : i32 to index
      %c0_134 = arith.constant 0 : index
      %740 = vector.load %arg3[%c2_132, %c0_133, %739, %c0_134] : memref<3x4x16x128xbf16, #tpu.memory_space<vmem>>, vector<1x1x8x128xbf16>
      %741 = vector.shape_cast %740 : vector<1x1x8x128xbf16> to vector<8x128xbf16>
      %742 = arith.extf %741 : vector<8x128xbf16> to vector<8x128xf32>
      %743 = arith.addf %738, %742 : vector<8x128xf32>
      %744 = arith.mulf %697, %191 : vector<8x128xf32>
      %745 = arith.mulf %701, %205 : vector<8x128xf32>
      %746 = arith.addf %744, %745 : vector<8x128xf32>
      %747 = arith.mulf %705, %219 : vector<8x128xf32>
      %748 = arith.addf %746, %747 : vector<8x128xf32>
      %749 = arith.mulf %709, %233 : vector<8x128xf32>
      %750 = arith.addf %748, %749 : vector<8x128xf32>
      %751 = arith.mulf %713, %247 : vector<8x128xf32>
      %752 = arith.addf %750, %751 : vector<8x128xf32>
      %753 = arith.addf %727, %177 : vector<8x128xf32>
      %754 = arith.addf %752, %753 : vector<8x128xf32>
      %c2_135 = arith.constant 2 : index
      %c1_136 = arith.constant 1 : index
      %755 = arith.index_cast %35 : i32 to index
      %c0_137 = arith.constant 0 : index
      %756 = vector.load %arg3[%c2_135, %c1_136, %755, %c0_137] : memref<3x4x16x128xbf16, #tpu.memory_space<vmem>>, vector<1x1x8x128xbf16>
      %757 = vector.shape_cast %756 : vector<1x1x8x128xbf16> to vector<8x128xbf16>
      %758 = arith.extf %757 : vector<8x128xbf16> to vector<8x128xf32>
      %759 = arith.addf %754, %758 : vector<8x128xf32>
      %760 = arith.mulf %697, %297 : vector<8x128xf32>
      %761 = arith.mulf %701, %311 : vector<8x128xf32>
      %762 = arith.addf %760, %761 : vector<8x128xf32>
      %763 = arith.mulf %705, %325 : vector<8x128xf32>
      %764 = arith.addf %762, %763 : vector<8x128xf32>
      %765 = arith.mulf %709, %339 : vector<8x128xf32>
      %766 = arith.addf %764, %765 : vector<8x128xf32>
      %767 = arith.mulf %713, %353 : vector<8x128xf32>
      %768 = arith.addf %766, %767 : vector<8x128xf32>
      %769 = arith.addf %727, %283 : vector<8x128xf32>
      %770 = arith.addf %768, %769 : vector<8x128xf32>
      %c2_138 = arith.constant 2 : index
      %c2_139 = arith.constant 2 : index
      %771 = arith.index_cast %35 : i32 to index
      %c0_140 = arith.constant 0 : index
      %772 = vector.load %arg3[%c2_138, %c2_139, %771, %c0_140] : memref<3x4x16x128xbf16, #tpu.memory_space<vmem>>, vector<1x1x8x128xbf16>
      %773 = vector.shape_cast %772 : vector<1x1x8x128xbf16> to vector<8x128xbf16>
      %774 = arith.extf %773 : vector<8x128xbf16> to vector<8x128xf32>
      %775 = arith.addf %770, %774 : vector<8x128xf32>
      %776 = arith.mulf %697, %403 : vector<8x128xf32>
      %777 = arith.mulf %701, %417 : vector<8x128xf32>
      %778 = arith.addf %776, %777 : vector<8x128xf32>
      %779 = arith.mulf %705, %431 : vector<8x128xf32>
      %780 = arith.addf %778, %779 : vector<8x128xf32>
      %781 = arith.mulf %709, %445 : vector<8x128xf32>
      %782 = arith.addf %780, %781 : vector<8x128xf32>
      %783 = arith.mulf %713, %459 : vector<8x128xf32>
      %784 = arith.addf %782, %783 : vector<8x128xf32>
      %785 = arith.addf %727, %389 : vector<8x128xf32>
      %786 = arith.addf %784, %785 : vector<8x128xf32>
      %c2_141 = arith.constant 2 : index
      %c3_142 = arith.constant 3 : index
      %787 = arith.index_cast %35 : i32 to index
      %c0_143 = arith.constant 0 : index
      %788 = vector.load %arg3[%c2_141, %c3_142, %787, %c0_143] : memref<3x4x16x128xbf16, #tpu.memory_space<vmem>>, vector<1x1x8x128xbf16>
      %789 = vector.shape_cast %788 : vector<1x1x8x128xbf16> to vector<8x128xbf16>
      %790 = arith.extf %789 : vector<8x128xbf16> to vector<8x128xf32>
      %791 = arith.addf %786, %790 : vector<8x128xf32>
      %792 = arith.maximumf %743, %759 : vector<8x128xf32>
      %793 = arith.maximumf %775, %791 : vector<8x128xf32>
      %794 = arith.maximumf %792, %793 : vector<8x128xf32>
      %795 = arith.subf %743, %794 : vector<8x128xf32>
      %796 = math.exp %795 : vector<8x128xf32>
      %797 = arith.subf %759, %794 : vector<8x128xf32>
      %798 = math.exp %797 : vector<8x128xf32>
      %799 = arith.subf %775, %794 : vector<8x128xf32>
      %800 = math.exp %799 : vector<8x128xf32>
      %801 = arith.subf %791, %794 : vector<8x128xf32>
      %802 = math.exp %801 : vector<8x128xf32>
      %803 = arith.addf %796, %798 : vector<8x128xf32>
      %804 = arith.addf %800, %802 : vector<8x128xf32>
      %805 = arith.addf %803, %804 : vector<8x128xf32>
      %806 = tpu.reciprocal %805 {approx = true} : vector<8x128xf32> -> vector<8x128xf32>
      %807 = arith.mulf %796, %806 : vector<8x128xf32>
      %808 = arith.mulf %798, %806 : vector<8x128xf32>
      %809 = arith.mulf %800, %806 : vector<8x128xf32>
      %810 = arith.mulf %802, %806 : vector<8x128xf32>
      %c0_144 = arith.constant 0 : index
      %c0_145 = arith.constant 0 : index
      %811 = arith.index_cast %35 : i32 to index
      %c0_146 = arith.constant 0 : index
      %812 = vector.load %arg4[%c0_144, %c0_145, %811, %c0_146] : memref<4x6x16x128xbf16, #tpu.memory_space<vmem>>, vector<1x1x8x128xbf16>
      %813 = vector.shape_cast %812 : vector<1x1x8x128xbf16> to vector<8x128xbf16>
      %814 = arith.extf %813 : vector<8x128xbf16> to vector<8x128xf32>
      %815 = arith.mulf %573, %814 : vector<8x128xf32>
      %816 = arith.mulf %690, %814 : vector<8x128xf32>
      %817 = arith.mulf %807, %814 : vector<8x128xf32>
      %c1_147 = arith.constant 1 : index
      %c0_148 = arith.constant 0 : index
      %818 = arith.index_cast %35 : i32 to index
      %c0_149 = arith.constant 0 : index
      %819 = vector.load %arg4[%c1_147, %c0_148, %818, %c0_149] : memref<4x6x16x128xbf16, #tpu.memory_space<vmem>>, vector<1x1x8x128xbf16>
      %820 = vector.shape_cast %819 : vector<1x1x8x128xbf16> to vector<8x128xbf16>
      %821 = arith.extf %820 : vector<8x128xbf16> to vector<8x128xf32>
      %822 = arith.mulf %574, %821 : vector<8x128xf32>
      %823 = arith.addf %815, %822 : vector<8x128xf32>
      %824 = arith.mulf %691, %821 : vector<8x128xf32>
      %825 = arith.addf %816, %824 : vector<8x128xf32>
      %826 = arith.mulf %808, %821 : vector<8x128xf32>
      %827 = arith.addf %817, %826 : vector<8x128xf32>
      %c2_150 = arith.constant 2 : index
      %c0_151 = arith.constant 0 : index
      %828 = arith.index_cast %35 : i32 to index
      %c0_152 = arith.constant 0 : index
      %829 = vector.load %arg4[%c2_150, %c0_151, %828, %c0_152] : memref<4x6x16x128xbf16, #tpu.memory_space<vmem>>, vector<1x1x8x128xbf16>
      %830 = vector.shape_cast %829 : vector<1x1x8x128xbf16> to vector<8x128xbf16>
      %831 = arith.extf %830 : vector<8x128xbf16> to vector<8x128xf32>
      %832 = arith.mulf %575, %831 : vector<8x128xf32>
      %833 = arith.addf %823, %832 : vector<8x128xf32>
      %834 = arith.mulf %692, %831 : vector<8x128xf32>
      %835 = arith.addf %825, %834 : vector<8x128xf32>
      %836 = arith.mulf %809, %831 : vector<8x128xf32>
      %837 = arith.addf %827, %836 : vector<8x128xf32>
      %c3_153 = arith.constant 3 : index
      %c0_154 = arith.constant 0 : index
      %838 = arith.index_cast %35 : i32 to index
      %c0_155 = arith.constant 0 : index
      %839 = vector.load %arg4[%c3_153, %c0_154, %838, %c0_155] : memref<4x6x16x128xbf16, #tpu.memory_space<vmem>>, vector<1x1x8x128xbf16>
      %840 = vector.shape_cast %839 : vector<1x1x8x128xbf16> to vector<8x128xbf16>
      %841 = arith.extf %840 : vector<8x128xbf16> to vector<8x128xf32>
      %842 = arith.mulf %576, %841 : vector<8x128xf32>
      %843 = arith.addf %833, %842 : vector<8x128xf32>
      %844 = arith.mulf %693, %841 : vector<8x128xf32>
      %845 = arith.addf %835, %844 : vector<8x128xf32>
      %846 = arith.mulf %810, %841 : vector<8x128xf32>
      %847 = arith.addf %837, %846 : vector<8x128xf32>
      %c0_156 = arith.constant 0 : index
      %c0_157 = arith.constant 0 : index
      %848 = arith.index_cast %35 : i32 to index
      %c0_158 = arith.constant 0 : index
      %849 = vector.load %arg5[%c0_156, %c0_157, %848, %c0_158] : memref<3x6x16x128xf32, #tpu.memory_space<vmem>>, vector<1x1x8x128xf32>
      %850 = vector.shape_cast %849 : vector<1x1x8x128xf32> to vector<8x128xf32>
      %851 = vector.shape_cast %843 : vector<8x128xf32> to vector<1x1x8x128xf32>
      tpu.vector_store %arg5[%c0_156, %c0_157, %848, %c0_158], %851 {strides = array<i32>} : memref<3x6x16x128xf32, #tpu.memory_space<vmem>>, vector<1x1x8x128xf32>,
      %c1_159 = arith.constant 1 : index
      %c0_160 = arith.constant 0 : index
      %852 = arith.index_cast %35 : i32 to index
      %c0_161 = arith.constant 0 : index
      %853 = vector.load %arg5[%c1_159, %c0_160, %852, %c0_161] : memref<3x6x16x128xf32, #tpu.memory_space<vmem>>, vector<1x1x8x128xf32>
      %854 = vector.shape_cast %853 : vector<1x1x8x128xf32> to vector<8x128xf32>
      %855 = vector.shape_cast %845 : vector<8x128xf32> to vector<1x1x8x128xf32>
      tpu.vector_store %arg5[%c1_159, %c0_160, %852, %c0_161], %855 {strides = array<i32>} : memref<3x6x16x128xf32, #tpu.memory_space<vmem>>, vector<1x1x8x128xf32>,
      %c2_162 = arith.constant 2 : index
      %c0_163 = arith.constant 0 : index
      %856 = arith.index_cast %35 : i32 to index
      %c0_164 = arith.constant 0 : index
      %857 = vector.load %arg5[%c2_162, %c0_163, %856, %c0_164] : memref<3x6x16x128xf32, #tpu.memory_space<vmem>>, vector<1x1x8x128xf32>
      %858 = vector.shape_cast %857 : vector<1x1x8x128xf32> to vector<8x128xf32>
      %859 = vector.shape_cast %847 : vector<8x128xf32> to vector<1x1x8x128xf32>
      tpu.vector_store %arg5[%c2_162, %c0_163, %856, %c0_164], %859 {strides = array<i32>} : memref<3x6x16x128xf32, #tpu.memory_space<vmem>>, vector<1x1x8x128xf32>,
      %c0_165 = arith.constant 0 : index
      %c1_166 = arith.constant 1 : index
      %860 = arith.index_cast %35 : i32 to index
      %c0_167 = arith.constant 0 : index
      %861 = vector.load %arg4[%c0_165, %c1_166, %860, %c0_167] : memref<4x6x16x128xbf16, #tpu.memory_space<vmem>>, vector<1x1x8x128xbf16>
      %862 = vector.shape_cast %861 : vector<1x1x8x128xbf16> to vector<8x128xbf16>
      %863 = arith.extf %862 : vector<8x128xbf16> to vector<8x128xf32>
      %864 = arith.mulf %573, %863 : vector<8x128xf32>
      %865 = arith.mulf %690, %863 : vector<8x128xf32>
      %866 = arith.mulf %807, %863 : vector<8x128xf32>
      %c1_168 = arith.constant 1 : index
      %c1_169 = arith.constant 1 : index
      %867 = arith.index_cast %35 : i32 to index
      %c0_170 = arith.constant 0 : index
      %868 = vector.load %arg4[%c1_168, %c1_169, %867, %c0_170] : memref<4x6x16x128xbf16, #tpu.memory_space<vmem>>, vector<1x1x8x128xbf16>
      %869 = vector.shape_cast %868 : vector<1x1x8x128xbf16> to vector<8x128xbf16>
      %870 = arith.extf %869 : vector<8x128xbf16> to vector<8x128xf32>
      %871 = arith.mulf %574, %870 : vector<8x128xf32>
      %872 = arith.addf %864, %871 : vector<8x128xf32>
      %873 = arith.mulf %691, %870 : vector<8x128xf32>
      %874 = arith.addf %865, %873 : vector<8x128xf32>
      %875 = arith.mulf %808, %870 : vector<8x128xf32>
      %876 = arith.addf %866, %875 : vector<8x128xf32>
      %c2_171 = arith.constant 2 : index
      %c1_172 = arith.constant 1 : index
      %877 = arith.index_cast %35 : i32 to index
      %c0_173 = arith.constant 0 : index
      %878 = vector.load %arg4[%c2_171, %c1_172, %877, %c0_173] : memref<4x6x16x128xbf16, #tpu.memory_space<vmem>>, vector<1x1x8x128xbf16>
      %879 = vector.shape_cast %878 : vector<1x1x8x128xbf16> to vector<8x128xbf16>
      %880 = arith.extf %879 : vector<8x128xbf16> to vector<8x128xf32>
      %881 = arith.mulf %575, %880 : vector<8x128xf32>
      %882 = arith.addf %872, %881 : vector<8x128xf32>
      %883 = arith.mulf %692, %880 : vector<8x128xf32>
      %884 = arith.addf %874, %883 : vector<8x128xf32>
      %885 = arith.mulf %809, %880 : vector<8x128xf32>
      %886 = arith.addf %876, %885 : vector<8x128xf32>
      %c3_174 = arith.constant 3 : index
      %c1_175 = arith.constant 1 : index
      %887 = arith.index_cast %35 : i32 to index
      %c0_176 = arith.constant 0 : index
      %888 = vector.load %arg4[%c3_174, %c1_175, %887, %c0_176] : memref<4x6x16x128xbf16, #tpu.memory_space<vmem>>, vector<1x1x8x128xbf16>
      %889 = vector.shape_cast %888 : vector<1x1x8x128xbf16> to vector<8x128xbf16>
      %890 = arith.extf %889 : vector<8x128xbf16> to vector<8x128xf32>
      %891 = arith.mulf %576, %890 : vector<8x128xf32>
      %892 = arith.addf %882, %891 : vector<8x128xf32>
      %893 = arith.mulf %693, %890 : vector<8x128xf32>
      %894 = arith.addf %884, %893 : vector<8x128xf32>
      %895 = arith.mulf %810, %890 : vector<8x128xf32>
      %896 = arith.addf %886, %895 : vector<8x128xf32>
      %c0_177 = arith.constant 0 : index
      %c1_178 = arith.constant 1 : index
      %897 = arith.index_cast %35 : i32 to index
      %c0_179 = arith.constant 0 : index
      %898 = vector.load %arg5[%c0_177, %c1_178, %897, %c0_179] : memref<3x6x16x128xf32, #tpu.memory_space<vmem>>, vector<1x1x8x128xf32>
      %899 = vector.shape_cast %898 : vector<1x1x8x128xf32> to vector<8x128xf32>
      %900 = vector.shape_cast %892 : vector<8x128xf32> to vector<1x1x8x128xf32>
      tpu.vector_store %arg5[%c0_177, %c1_178, %897, %c0_179], %900 {strides = array<i32>} : memref<3x6x16x128xf32, #tpu.memory_space<vmem>>, vector<1x1x8x128xf32>,
      %c1_180 = arith.constant 1 : index
      %c1_181 = arith.constant 1 : index
      %901 = arith.index_cast %35 : i32 to index
      %c0_182 = arith.constant 0 : index
      %902 = vector.load %arg5[%c1_180, %c1_181, %901, %c0_182] : memref<3x6x16x128xf32, #tpu.memory_space<vmem>>, vector<1x1x8x128xf32>
      %903 = vector.shape_cast %902 : vector<1x1x8x128xf32> to vector<8x128xf32>
      %904 = vector.shape_cast %894 : vector<8x128xf32> to vector<1x1x8x128xf32>
      tpu.vector_store %arg5[%c1_180, %c1_181, %901, %c0_182], %904 {strides = array<i32>} : memref<3x6x16x128xf32, #tpu.memory_space<vmem>>, vector<1x1x8x128xf32>,
      %c2_183 = arith.constant 2 : index
      %c1_184 = arith.constant 1 : index
      %905 = arith.index_cast %35 : i32 to index
      %c0_185 = arith.constant 0 : index
      %906 = vector.load %arg5[%c2_183, %c1_184, %905, %c0_185] : memref<3x6x16x128xf32, #tpu.memory_space<vmem>>, vector<1x1x8x128xf32>
      %907 = vector.shape_cast %906 : vector<1x1x8x128xf32> to vector<8x128xf32>
      %908 = vector.shape_cast %896 : vector<8x128xf32> to vector<1x1x8x128xf32>
      tpu.vector_store %arg5[%c2_183, %c1_184, %905, %c0_185], %908 {strides = array<i32>} : memref<3x6x16x128xf32, #tpu.memory_space<vmem>>, vector<1x1x8x128xf32>,
      %c0_186 = arith.constant 0 : index
      %c2_187 = arith.constant 2 : index
      %909 = arith.index_cast %35 : i32 to index
      %c0_188 = arith.constant 0 : index
      %910 = vector.load %arg4[%c0_186, %c2_187, %909, %c0_188] : memref<4x6x16x128xbf16, #tpu.memory_space<vmem>>, vector<1x1x8x128xbf16>
      %911 = vector.shape_cast %910 : vector<1x1x8x128xbf16> to vector<8x128xbf16>
      %912 = arith.extf %911 : vector<8x128xbf16> to vector<8x128xf32>
      %913 = arith.mulf %573, %912 : vector<8x128xf32>
      %914 = arith.mulf %690, %912 : vector<8x128xf32>
      %915 = arith.mulf %807, %912 : vector<8x128xf32>
      %c1_189 = arith.constant 1 : index
      %c2_190 = arith.constant 2 : index
      %916 = arith.index_cast %35 : i32 to index
      %c0_191 = arith.constant 0 : index
      %917 = vector.load %arg4[%c1_189, %c2_190, %916, %c0_191] : memref<4x6x16x128xbf16, #tpu.memory_space<vmem>>, vector<1x1x8x128xbf16>
      %918 = vector.shape_cast %917 : vector<1x1x8x128xbf16> to vector<8x128xbf16>
      %919 = arith.extf %918 : vector<8x128xbf16> to vector<8x128xf32>
      %920 = arith.mulf %574, %919 : vector<8x128xf32>
      %921 = arith.addf %913, %920 : vector<8x128xf32>
      %922 = arith.mulf %691, %919 : vector<8x128xf32>
      %923 = arith.addf %914, %922 : vector<8x128xf32>
      %924 = arith.mulf %808, %919 : vector<8x128xf32>
      %925 = arith.addf %915, %924 : vector<8x128xf32>
      %c2_192 = arith.constant 2 : index
      %c2_193 = arith.constant 2 : index
      %926 = arith.index_cast %35 : i32 to index
      %c0_194 = arith.constant 0 : index
      %927 = vector.load %arg4[%c2_192, %c2_193, %926, %c0_194] : memref<4x6x16x128xbf16, #tpu.memory_space<vmem>>, vector<1x1x8x128xbf16>
      %928 = vector.shape_cast %927 : vector<1x1x8x128xbf16> to vector<8x128xbf16>
      %929 = arith.extf %928 : vector<8x128xbf16> to vector<8x128xf32>
      %930 = arith.mulf %575, %929 : vector<8x128xf32>
      %931 = arith.addf %921, %930 : vector<8x128xf32>
      %932 = arith.mulf %692, %929 : vector<8x128xf32>
      %933 = arith.addf %923, %932 : vector<8x128xf32>
      %934 = arith.mulf %809, %929 : vector<8x128xf32>
      %935 = arith.addf %925, %934 : vector<8x128xf32>
      %c3_195 = arith.constant 3 : index
      %c2_196 = arith.constant 2 : index
      %936 = arith.index_cast %35 : i32 to index
      %c0_197 = arith.constant 0 : index
      %937 = vector.load %arg4[%c3_195, %c2_196, %936, %c0_197] : memref<4x6x16x128xbf16, #tpu.memory_space<vmem>>, vector<1x1x8x128xbf16>
      %938 = vector.shape_cast %937 : vector<1x1x8x128xbf16> to vector<8x128xbf16>
      %939 = arith.extf %938 : vector<8x128xbf16> to vector<8x128xf32>
      %940 = arith.mulf %576, %939 : vector<8x128xf32>
      %941 = arith.addf %931, %940 : vector<8x128xf32>
      %942 = arith.mulf %693, %939 : vector<8x128xf32>
      %943 = arith.addf %933, %942 : vector<8x128xf32>
      %944 = arith.mulf %810, %939 : vector<8x128xf32>
      %945 = arith.addf %935, %944 : vector<8x128xf32>
      %c0_198 = arith.constant 0 : index
      %c2_199 = arith.constant 2 : index
      %946 = arith.index_cast %35 : i32 to index
      %c0_200 = arith.constant 0 : index
      %947 = vector.load %arg5[%c0_198, %c2_199, %946, %c0_200] : memref<3x6x16x128xf32, #tpu.memory_space<vmem>>, vector<1x1x8x128xf32>
      %948 = vector.shape_cast %947 : vector<1x1x8x128xf32> to vector<8x128xf32>
      %949 = vector.shape_cast %941 : vector<8x128xf32> to vector<1x1x8x128xf32>
      tpu.vector_store %arg5[%c0_198, %c2_199, %946, %c0_200], %949 {strides = array<i32>} : memref<3x6x16x128xf32, #tpu.memory_space<vmem>>, vector<1x1x8x128xf32>,
      %c1_201 = arith.constant 1 : index
      %c2_202 = arith.constant 2 : index
      %950 = arith.index_cast %35 : i32 to index
      %c0_203 = arith.constant 0 : index
      %951 = vector.load %arg5[%c1_201, %c2_202, %950, %c0_203] : memref<3x6x16x128xf32, #tpu.memory_space<vmem>>, vector<1x1x8x128xf32>
      %952 = vector.shape_cast %951 : vector<1x1x8x128xf32> to vector<8x128xf32>
      %953 = vector.shape_cast %943 : vector<8x128xf32> to vector<1x1x8x128xf32>
      tpu.vector_store %arg5[%c1_201, %c2_202, %950, %c0_203], %953 {strides = array<i32>} : memref<3x6x16x128xf32, #tpu.memory_space<vmem>>, vector<1x1x8x128xf32>,
      %c2_204 = arith.constant 2 : index
      %c2_205 = arith.constant 2 : index
      %954 = arith.index_cast %35 : i32 to index
      %c0_206 = arith.constant 0 : index
      %955 = vector.load %arg5[%c2_204, %c2_205, %954, %c0_206] : memref<3x6x16x128xf32, #tpu.memory_space<vmem>>, vector<1x1x8x128xf32>
      %956 = vector.shape_cast %955 : vector<1x1x8x128xf32> to vector<8x128xf32>
      %957 = vector.shape_cast %945 : vector<8x128xf32> to vector<1x1x8x128xf32>
      tpu.vector_store %arg5[%c2_204, %c2_205, %954, %c0_206], %957 {strides = array<i32>} : memref<3x6x16x128xf32, #tpu.memory_space<vmem>>, vector<1x1x8x128xf32>,
      %c0_207 = arith.constant 0 : index
      %c3_208 = arith.constant 3 : index
      %958 = arith.index_cast %35 : i32 to index
      %c0_209 = arith.constant 0 : index
      %959 = vector.load %arg4[%c0_207, %c3_208, %958, %c0_209] : memref<4x6x16x128xbf16, #tpu.memory_space<vmem>>, vector<1x1x8x128xbf16>
      %960 = vector.shape_cast %959 : vector<1x1x8x128xbf16> to vector<8x128xbf16>
      %961 = arith.extf %960 : vector<8x128xbf16> to vector<8x128xf32>
      %962 = arith.mulf %573, %961 : vector<8x128xf32>
      %963 = arith.mulf %690, %961 : vector<8x128xf32>
      %964 = arith.mulf %807, %961 : vector<8x128xf32>
      %c1_210 = arith.constant 1 : index
      %c3_211 = arith.constant 3 : index
      %965 = arith.index_cast %35 : i32 to index
      %c0_212 = arith.constant 0 : index
      %966 = vector.load %arg4[%c1_210, %c3_211, %965, %c0_212] : memref<4x6x16x128xbf16, #tpu.memory_space<vmem>>, vector<1x1x8x128xbf16>
      %967 = vector.shape_cast %966 : vector<1x1x8x128xbf16> to vector<8x128xbf16>
      %968 = arith.extf %967 : vector<8x128xbf16> to vector<8x128xf32>
      %969 = arith.mulf %574, %968 : vector<8x128xf32>
      %970 = arith.addf %962, %969 : vector<8x128xf32>
      %971 = arith.mulf %691, %968 : vector<8x128xf32>
      %972 = arith.addf %963, %971 : vector<8x128xf32>
      %973 = arith.mulf %808, %968 : vector<8x128xf32>
      %974 = arith.addf %964, %973 : vector<8x128xf32>
      %c2_213 = arith.constant 2 : index
      %c3_214 = arith.constant 3 : index
      %975 = arith.index_cast %35 : i32 to index
      %c0_215 = arith.constant 0 : index
      %976 = vector.load %arg4[%c2_213, %c3_214, %975, %c0_215] : memref<4x6x16x128xbf16, #tpu.memory_space<vmem>>, vector<1x1x8x128xbf16>
      %977 = vector.shape_cast %976 : vector<1x1x8x128xbf16> to vector<8x128xbf16>
      %978 = arith.extf %977 : vector<8x128xbf16> to vector<8x128xf32>
      %979 = arith.mulf %575, %978 : vector<8x128xf32>
      %980 = arith.addf %970, %979 : vector<8x128xf32>
      %981 = arith.mulf %692, %978 : vector<8x128xf32>
      %982 = arith.addf %972, %981 : vector<8x128xf32>
      %983 = arith.mulf %809, %978 : vector<8x128xf32>
      %984 = arith.addf %974, %983 : vector<8x128xf32>
      %c3_216 = arith.constant 3 : index
      %c3_217 = arith.constant 3 : index
      %985 = arith.index_cast %35 : i32 to index
      %c0_218 = arith.constant 0 : index
      %986 = vector.load %arg4[%c3_216, %c3_217, %985, %c0_218] : memref<4x6x16x128xbf16, #tpu.memory_space<vmem>>, vector<1x1x8x128xbf16>
      %987 = vector.shape_cast %986 : vector<1x1x8x128xbf16> to vector<8x128xbf16>
      %988 = arith.extf %987 : vector<8x128xbf16> to vector<8x128xf32>
      %989 = arith.mulf %576, %988 : vector<8x128xf32>
      %990 = arith.addf %980, %989 : vector<8x128xf32>
      %991 = arith.mulf %693, %988 : vector<8x128xf32>
      %992 = arith.addf %982, %991 : vector<8x128xf32>
      %993 = arith.mulf %810, %988 : vector<8x128xf32>
      %994 = arith.addf %984, %993 : vector<8x128xf32>
      %c0_219 = arith.constant 0 : index
      %c3_220 = arith.constant 3 : index
      %995 = arith.index_cast %35 : i32 to index
      %c0_221 = arith.constant 0 : index
      %996 = vector.load %arg5[%c0_219, %c3_220, %995, %c0_221] : memref<3x6x16x128xf32, #tpu.memory_space<vmem>>, vector<1x1x8x128xf32>
      %997 = vector.shape_cast %996 : vector<1x1x8x128xf32> to vector<8x128xf32>
      %998 = vector.shape_cast %990 : vector<8x128xf32> to vector<1x1x8x128xf32>
      tpu.vector_store %arg5[%c0_219, %c3_220, %995, %c0_221], %998 {strides = array<i32>} : memref<3x6x16x128xf32, #tpu.memory_space<vmem>>, vector<1x1x8x128xf32>,
      %c1_222 = arith.constant 1 : index
      %c3_223 = arith.constant 3 : index
      %999 = arith.index_cast %35 : i32 to index
      %c0_224 = arith.constant 0 : index
      %1000 = vector.load %arg5[%c1_222, %c3_223, %999, %c0_224] : memref<3x6x16x128xf32, #tpu.memory_space<vmem>>, vector<1x1x8x128xf32>
      %1001 = vector.shape_cast %1000 : vector<1x1x8x128xf32> to vector<8x128xf32>
      %1002 = vector.shape_cast %992 : vector<8x128xf32> to vector<1x1x8x128xf32>
      tpu.vector_store %arg5[%c1_222, %c3_223, %999, %c0_224], %1002 {strides = array<i32>} : memref<3x6x16x128xf32, #tpu.memory_space<vmem>>, vector<1x1x8x128xf32>,
      %c2_225 = arith.constant 2 : index
      %c3_226 = arith.constant 3 : index
      %1003 = arith.index_cast %35 : i32 to index
      %c0_227 = arith.constant 0 : index
      %1004 = vector.load %arg5[%c2_225, %c3_226, %1003, %c0_227] : memref<3x6x16x128xf32, #tpu.memory_space<vmem>>, vector<1x1x8x128xf32>
      %1005 = vector.shape_cast %1004 : vector<1x1x8x128xf32> to vector<8x128xf32>
      %1006 = vector.shape_cast %994 : vector<8x128xf32> to vector<1x1x8x128xf32>
      tpu.vector_store %arg5[%c2_225, %c3_226, %1003, %c0_227], %1006 {strides = array<i32>} : memref<3x6x16x128xf32, #tpu.memory_space<vmem>>, vector<1x1x8x128xf32>,
      %c0_228 = arith.constant 0 : index
      %c4_229 = arith.constant 4 : index
      %1007 = arith.index_cast %35 : i32 to index
      %c0_230 = arith.constant 0 : index
      %1008 = vector.load %arg4[%c0_228, %c4_229, %1007, %c0_230] : memref<4x6x16x128xbf16, #tpu.memory_space<vmem>>, vector<1x1x8x128xbf16>
      %1009 = vector.shape_cast %1008 : vector<1x1x8x128xbf16> to vector<8x128xbf16>
      %1010 = arith.extf %1009 : vector<8x128xbf16> to vector<8x128xf32>
      %1011 = arith.mulf %573, %1010 : vector<8x128xf32>
      %1012 = arith.mulf %690, %1010 : vector<8x128xf32>
      %1013 = arith.mulf %807, %1010 : vector<8x128xf32>
      %c1_231 = arith.constant 1 : index
      %c4_232 = arith.constant 4 : index
      %1014 = arith.index_cast %35 : i32 to index
      %c0_233 = arith.constant 0 : index
      %1015 = vector.load %arg4[%c1_231, %c4_232, %1014, %c0_233] : memref<4x6x16x128xbf16, #tpu.memory_space<vmem>>, vector<1x1x8x128xbf16>
      %1016 = vector.shape_cast %1015 : vector<1x1x8x128xbf16> to vector<8x128xbf16>
      %1017 = arith.extf %1016 : vector<8x128xbf16> to vector<8x128xf32>
      %1018 = arith.mulf %574, %1017 : vector<8x128xf32>
      %1019 = arith.addf %1011, %1018 : vector<8x128xf32>
      %1020 = arith.mulf %691, %1017 : vector<8x128xf32>
      %1021 = arith.addf %1012, %1020 : vector<8x128xf32>
      %1022 = arith.mulf %808, %1017 : vector<8x128xf32>
      %1023 = arith.addf %1013, %1022 : vector<8x128xf32>
      %c2_234 = arith.constant 2 : index
      %c4_235 = arith.constant 4 : index
      %1024 = arith.index_cast %35 : i32 to index
      %c0_236 = arith.constant 0 : index
      %1025 = vector.load %arg4[%c2_234, %c4_235, %1024, %c0_236] : memref<4x6x16x128xbf16, #tpu.memory_space<vmem>>, vector<1x1x8x128xbf16>
      %1026 = vector.shape_cast %1025 : vector<1x1x8x128xbf16> to vector<8x128xbf16>
      %1027 = arith.extf %1026 : vector<8x128xbf16> to vector<8x128xf32>
      %1028 = arith.mulf %575, %1027 : vector<8x128xf32>
      %1029 = arith.addf %1019, %1028 : vector<8x128xf32>
      %1030 = arith.mulf %692, %1027 : vector<8x128xf32>
      %1031 = arith.addf %1021, %1030 : vector<8x128xf32>
      %1032 = arith.mulf %809, %1027 : vector<8x128xf32>
      %1033 = arith.addf %1023, %1032 : vector<8x128xf32>
      %c3_237 = arith.constant 3 : index
      %c4_238 = arith.constant 4 : index
      %1034 = arith.index_cast %35 : i32 to index
      %c0_239 = arith.constant 0 : index
      %1035 = vector.load %arg4[%c3_237, %c4_238, %1034, %c0_239] : memref<4x6x16x128xbf16, #tpu.memory_space<vmem>>, vector<1x1x8x128xbf16>
      %1036 = vector.shape_cast %1035 : vector<1x1x8x128xbf16> to vector<8x128xbf16>
      %1037 = arith.extf %1036 : vector<8x128xbf16> to vector<8x128xf32>
      %1038 = arith.mulf %576, %1037 : vector<8x128xf32>
      %1039 = arith.addf %1029, %1038 : vector<8x128xf32>
      %1040 = arith.mulf %693, %1037 : vector<8x128xf32>
      %1041 = arith.addf %1031, %1040 : vector<8x128xf32>
      %1042 = arith.mulf %810, %1037 : vector<8x128xf32>
      %1043 = arith.addf %1033, %1042 : vector<8x128xf32>
      %c0_240 = arith.constant 0 : index
      %c4_241 = arith.constant 4 : index
      %1044 = arith.index_cast %35 : i32 to index
      %c0_242 = arith.constant 0 : index
      %1045 = vector.load %arg5[%c0_240, %c4_241, %1044, %c0_242] : memref<3x6x16x128xf32, #tpu.memory_space<vmem>>, vector<1x1x8x128xf32>
      %1046 = vector.shape_cast %1045 : vector<1x1x8x128xf32> to vector<8x128xf32>
      %1047 = vector.shape_cast %1039 : vector<8x128xf32> to vector<1x1x8x128xf32>
      tpu.vector_store %arg5[%c0_240, %c4_241, %1044, %c0_242], %1047 {strides = array<i32>} : memref<3x6x16x128xf32, #tpu.memory_space<vmem>>, vector<1x1x8x128xf32>,
      %c1_243 = arith.constant 1 : index
      %c4_244 = arith.constant 4 : index
      %1048 = arith.index_cast %35 : i32 to index
      %c0_245 = arith.constant 0 : index
      %1049 = vector.load %arg5[%c1_243, %c4_244, %1048, %c0_245] : memref<3x6x16x128xf32, #tpu.memory_space<vmem>>, vector<1x1x8x128xf32>
      %1050 = vector.shape_cast %1049 : vector<1x1x8x128xf32> to vector<8x128xf32>
      %1051 = vector.shape_cast %1041 : vector<8x128xf32> to vector<1x1x8x128xf32>
      tpu.vector_store %arg5[%c1_243, %c4_244, %1048, %c0_245], %1051 {strides = array<i32>} : memref<3x6x16x128xf32, #tpu.memory_space<vmem>>, vector<1x1x8x128xf32>,
      %c2_246 = arith.constant 2 : index
      %c4_247 = arith.constant 4 : index
      %1052 = arith.index_cast %35 : i32 to index
      %c0_248 = arith.constant 0 : index
      %1053 = vector.load %arg5[%c2_246, %c4_247, %1052, %c0_248] : memref<3x6x16x128xf32, #tpu.memory_space<vmem>>, vector<1x1x8x128xf32>
      %1054 = vector.shape_cast %1053 : vector<1x1x8x128xf32> to vector<8x128xf32>
      %1055 = vector.shape_cast %1043 : vector<8x128xf32> to vector<1x1x8x128xf32>
      tpu.vector_store %arg5[%c2_246, %c4_247, %1052, %c0_248], %1055 {strides = array<i32>} : memref<3x6x16x128xf32, #tpu.memory_space<vmem>>, vector<1x1x8x128xf32>,
      %c0_249 = arith.constant 0 : index
      %c5_250 = arith.constant 5 : index
      %1056 = arith.index_cast %35 : i32 to index
      %c0_251 = arith.constant 0 : index
      %1057 = vector.load %arg4[%c0_249, %c5_250, %1056, %c0_251] : memref<4x6x16x128xbf16, #tpu.memory_space<vmem>>, vector<1x1x8x128xbf16>
      %1058 = vector.shape_cast %1057 : vector<1x1x8x128xbf16> to vector<8x128xbf16>
      %1059 = arith.extf %1058 : vector<8x128xbf16> to vector<8x128xf32>
      %1060 = arith.mulf %573, %1059 : vector<8x128xf32>
      %1061 = arith.mulf %690, %1059 : vector<8x128xf32>
      %1062 = arith.mulf %807, %1059 : vector<8x128xf32>
      %c1_252 = arith.constant 1 : index
      %c5_253 = arith.constant 5 : index
      %1063 = arith.index_cast %35 : i32 to index
      %c0_254 = arith.constant 0 : index
      %1064 = vector.load %arg4[%c1_252, %c5_253, %1063, %c0_254] : memref<4x6x16x128xbf16, #tpu.memory_space<vmem>>, vector<1x1x8x128xbf16>
      %1065 = vector.shape_cast %1064 : vector<1x1x8x128xbf16> to vector<8x128xbf16>
      %1066 = arith.extf %1065 : vector<8x128xbf16> to vector<8x128xf32>
      %1067 = arith.mulf %574, %1066 : vector<8x128xf32>
      %1068 = arith.addf %1060, %1067 : vector<8x128xf32>
      %1069 = arith.mulf %691, %1066 : vector<8x128xf32>
      %1070 = arith.addf %1061, %1069 : vector<8x128xf32>
      %1071 = arith.mulf %808, %1066 : vector<8x128xf32>
      %1072 = arith.addf %1062, %1071 : vector<8x128xf32>
      %c2_255 = arith.constant 2 : index
      %c5_256 = arith.constant 5 : index
      %1073 = arith.index_cast %35 : i32 to index
      %c0_257 = arith.constant 0 : index
      %1074 = vector.load %arg4[%c2_255, %c5_256, %1073, %c0_257] : memref<4x6x16x128xbf16, #tpu.memory_space<vmem>>, vector<1x1x8x128xbf16>
      %1075 = vector.shape_cast %1074 : vector<1x1x8x128xbf16> to vector<8x128xbf16>
      %1076 = arith.extf %1075 : vector<8x128xbf16> to vector<8x128xf32>
      %1077 = arith.mulf %575, %1076 : vector<8x128xf32>
      %1078 = arith.addf %1068, %1077 : vector<8x128xf32>
      %1079 = arith.mulf %692, %1076 : vector<8x128xf32>
      %1080 = arith.addf %1070, %1079 : vector<8x128xf32>
      %1081 = arith.mulf %809, %1076 : vector<8x128xf32>
      %1082 = arith.addf %1072, %1081 : vector<8x128xf32>
      %c3_258 = arith.constant 3 : index
      %c5_259 = arith.constant 5 : index
      %1083 = arith.index_cast %35 : i32 to index
      %c0_260 = arith.constant 0 : index
      %1084 = vector.load %arg4[%c3_258, %c5_259, %1083, %c0_260] : memref<4x6x16x128xbf16, #tpu.memory_space<vmem>>, vector<1x1x8x128xbf16>
      %1085 = vector.shape_cast %1084 : vector<1x1x8x128xbf16> to vector<8x128xbf16>
      %1086 = arith.extf %1085 : vector<8x128xbf16> to vector<8x128xf32>
      %1087 = arith.mulf %576, %1086 : vector<8x128xf32>
      %1088 = arith.addf %1078, %1087 : vector<8x128xf32>
      %1089 = arith.mulf %693, %1086 : vector<8x128xf32>
      %1090 = arith.addf %1080, %1089 : vector<8x128xf32>
      %1091 = arith.mulf %810, %1086 : vector<8x128xf32>
      %1092 = arith.addf %1082, %1091 : vector<8x128xf32>
      %c0_261 = arith.constant 0 : index
      %c5_262 = arith.constant 5 : index
      %1093 = arith.index_cast %35 : i32 to index
      %c0_263 = arith.constant 0 : index
      %1094 = vector.load %arg5[%c0_261, %c5_262, %1093, %c0_263] : memref<3x6x16x128xf32, #tpu.memory_space<vmem>>, vector<1x1x8x128xf32>
      %1095 = vector.shape_cast %1094 : vector<1x1x8x128xf32> to vector<8x128xf32>
      %1096 = vector.shape_cast %1088 : vector<8x128xf32> to vector<1x1x8x128xf32>
      tpu.vector_store %arg5[%c0_261, %c5_262, %1093, %c0_263], %1096 {strides = array<i32>} : memref<3x6x16x128xf32, #tpu.memory_space<vmem>>, vector<1x1x8x128xf32>,
      %c1_264 = arith.constant 1 : index
      %c5_265 = arith.constant 5 : index
      %1097 = arith.index_cast %35 : i32 to index
      %c0_266 = arith.constant 0 : index
      %1098 = vector.load %arg5[%c1_264, %c5_265, %1097, %c0_266] : memref<3x6x16x128xf32, #tpu.memory_space<vmem>>, vector<1x1x8x128xf32>
      %1099 = vector.shape_cast %1098 : vector<1x1x8x128xf32> to vector<8x128xf32>
      %1100 = vector.shape_cast %1090 : vector<8x128xf32> to vector<1x1x8x128xf32>
      tpu.vector_store %arg5[%c1_264, %c5_265, %1097, %c0_266], %1100 {strides = array<i32>} : memref<3x6x16x128xf32, #tpu.memory_space<vmem>>, vector<1x1x8x128xf32>,
      %c2_267 = arith.constant 2 : index
      %c5_268 = arith.constant 5 : index
      %1101 = arith.index_cast %35 : i32 to index
      %c0_269 = arith.constant 0 : index
      %1102 = vector.load %arg5[%c2_267, %c5_268, %1101, %c0_269] : memref<3x6x16x128xf32, #tpu.memory_space<vmem>>, vector<1x1x8x128xf32>
      %1103 = vector.shape_cast %1102 : vector<1x1x8x128xf32> to vector<8x128xf32>
      %1104 = vector.shape_cast %1092 : vector<8x128xf32> to vector<1x1x8x128xf32>
      tpu.vector_store %arg5[%c2_267, %c5_268, %1101, %c0_269], %1104 {strides = array<i32>} : memref<3x6x16x128xf32, #tpu.memory_space<vmem>>, vector<1x1x8x128xf32>,
    }
    %c2_i32_0 = arith.constant 2 : i32
    return
  }
  func.func @transform_0(%arg0: i32) -> i32 {
    %c0_i32 = arith.constant 0 : i32
    %c0_i32_0 = arith.constant 0 : i32
    return %c0_i32 : i32
  }
  func.func @transform_1(%arg0: i32) -> (i32, i32, i32, i32) {
    %c0_i32 = arith.constant 0 : i32
    %c0_i32_0 = arith.constant 0 : i32
    %c0_i32_1 = arith.constant 0 : i32
    %c0_i32_2 = arith.constant 0 : i32
    return %c0_i32, %c0_i32_0, %arg0, %c0_i32_1 : i32, i32, i32, i32
  }
  func.func @transform_2(%arg0: i32) -> (i32, i32, i32, i32) {
    %c0_i32 = arith.constant 0 : i32
    %c0_i32_0 = arith.constant 0 : i32
    %c0_i32_1 = arith.constant 0 : i32
    %c0_i32_2 = arith.constant 0 : i32
    return %c0_i32, %c0_i32_0, %arg0, %c0_i32_1 : i32, i32, i32, i32
  }
  func.func @transform_3(%arg0: i32) -> (i32, i32, i32, i32) {
    %c0_i32 = arith.constant 0 : i32
    %c0_i32_0 = arith.constant 0 : i32
    %c0_i32_1 = arith.constant 0 : i32
    %c0_i32_2 = arith.constant 0 : i32
    return %c0_i32, %c0_i32_0, %arg0, %c0_i32_1 : i32, i32, i32, i32
  }
  func.func @transform_4(%arg0: i32) -> (i32, i32, i32, i32) {
    %c0_i32 = arith.constant 0 : i32
    %c0_i32_0 = arith.constant 0 : i32
    %c0_i32_1 = arith.constant 0 : i32
    %c0_i32_2 = arith.constant 0 : i32
    return %c0_i32, %c0_i32_0, %arg0, %c0_i32_1 : i32, i32, i32, i32
  }
}

</mosaic_0001>

<bundles_post_ra>
// kernel: tpu_custom_call.1
= control target key start
LH: loop header
LB: loop body
LE: loop exit
PB: predicated region body
PF: predicated region fallthrough
CT: control target
= control target key end

     0   :  { %s2681_s0 = inlined_call_operand.hbm [shape: f32[31], index: 0, kind: input, shape index: {}]   ;;  %s2682_s1 = inlined_call_operand.hbm [shape: bf16[7,5,16,128], index: 1, kind: input, shape index: {}]   ;;  %s2683_s2 = inlined_call_operand.hbm [shape: bf16[3,4,16,128], index: 2, kind: input, shape index: {}]   ;;  %s2684_s3 = inlined_call_operand.hbm [shape: bf16[4,6,16,128], index: 3, kind: input, shape index: {}]   ;;  %s2685_s4 = inlined_call_operand.hbm [shape: f32[3,6,16,128], index: 4, kind: output, shape index: {}]  }
   0x1   :  { %2708 = sst [smem:[#allocation35_spill]] %s2685_s4 }
   0x2   :  { %9 = vsyncpa [#allocation5], 0 }
   0x3   :  { %10 = vsyncpa [#allocation3], 0 }
   0x4   :  { %11 = vsyncpa [#allocation8], 0 }
   0x5   :  { %12 = vsyncpa [#allocation4], 0  ;;  %s1775_s15 = smov [#allocation7]   ;;  %s1776_s17 = smov [#allocation6]  }
   0x6   :  { %s38_s16 = sshll.u32 %s1775_s15, 4  ;;  %s26_s18 = sshll.u32 %s1776_s17, 4  ;;  %s39_s16 = int_to_ptr.vmem [resolvable:$true] %s38_s16  ;;  %s27_s18 = int_to_ptr.vmem [resolvable:$true] %s26_s18 }
   0x7   :  { %s1661_s21 = scalar_lea.hbm %s2683_s2, 1536 }
   0x8   :  { %p1662_p0 = scmp.ne.s32.totalorder %s2683_s2, %s1661_s21  ;;  %p1665_p1 = scmp.lt.u32.totalorder %s1661_s21, %s2683_s2 }
   0xa   :  { %p1667_p2 = pnand %p1665_p1, %p1662_p0 }
   0xc   :  { %1670 = shalt.err (!%p1667_p2)
}
   0xd   :  { %s1671_s26 = scalar_lea.vmem %s39_s16, 1536  ;;  %p1676_p4 = scmp.lt.s32.totalorder %s39_s16, %s39_s16 }
   0xe   :  { %p1672_p3 = scmp.ne.s32.totalorder %s39_s16, %s1671_s26  ;;  %p1677_p5 = scmp.lt.s32.totalorder %s1671_s26, %s1671_s26 }
  0x10   :  { %p1678_p6 = por %p1677_p5, %p1676_p4 }
  0x12   :  { %p1679_p7 = pnand %p1678_p6, %p1672_p3 }
  0x14   :  { %1682 = shalt.err (!%p1679_p7)
}
  0x15   :  { %s1777_s27 = smov 64   ;;  %s1778_s28 = smov 4  }
  0x16   :  { %44 = dma.hbm_to_vmem [thread:$0]  %s2683_s2, 1536, %s39_s16, [#allocation8], %s1777_s27, %s1777_s27, %s1778_s28  }
  0x17   :  { %s1683_s7 = scalar_lea.hbm %s2681_s0, 16 }
  0x18   :  { %p1684_p8 = scmp.ne.s32.totalorder %s2681_s0, %s1683_s7  ;;  %p1687_p9 = scmp.lt.u32.totalorder %s1683_s7, %s2681_s0 }
  0x1a   :  { %p1689_p10 = pnand %p1687_p9, %p1684_p8 }
  0x1c   :  { %1692 = shalt.err (!%p1689_p10)
}
  0x1d   :  { %s1779_s12 = smov [#allocation2]   ;;  %s1693_s16 = scalar_lea.hbm %s2682_s1, 4480 }
  0x1e   :  { %20 = dma.hbm_to_smem %s2681_s0, 16, %s1779_s12, [#allocation5]  }
  0x1f   :  { %p1694_p11 = scmp.ne.s32.totalorder %s2682_s1, %s1693_s16  ;;  %p1697_p12 = scmp.lt.u32.totalorder %s1693_s16, %s2682_s1 }
  0x21   :  { %p1699_p13 = pnand %p1697_p12, %p1694_p11 }
  0x23   :  { %1702 = shalt.err (!%p1699_p13)
}
  0x24   :  { %s1703_s22 = scalar_lea.vmem %s27_s18, 4480  ;;  %p1708_p1 = scmp.lt.s32.totalorder %s27_s18, %s27_s18 }
  0x25   :  { %p1704_p0 = scmp.ne.s32.totalorder %s27_s18, %s1703_s22  ;;  %p1709_p2 = scmp.lt.s32.totalorder %s1703_s22, %s1703_s22 }
  0x27   :  { %p1710_p3 = por %p1709_p2, %p1708_p1 }
  0x29   :  { %p1711_p4 = pnand %p1710_p3, %p1704_p0 }
  0x2b   :  { %1714 = shalt.err (!%p1711_p4)
}
  0x2c   :  { %32 = dma.hbm_to_vmem [thread:$0]  %s2682_s1, 4480, %s27_s18, [#allocation3], %s1777_s27, %s1777_s27, %s1778_s28  }
  0x2d   :  { %s1780_s24 = smov [#allocation9]   ;;  %s1715_s30 = scalar_lea.hbm %s2684_s3, 3072 }
  0x2e   :  { %s50_s25 = sshll.u32 %s1780_s24, 4  ;;  %p1716_p5 = scmp.ne.s32.totalorder %s2684_s3, %s1715_s30  ;;  %s51_s25 = int_to_ptr.vmem [resolvable:$true] %s50_s25 }
  0x2f   :  { %p1719_p6 = scmp.lt.u32.totalorder %s1715_s30, %s2684_s3 }
  0x31   :  { %p1721_p7 = pnand %p1719_p6, %p1716_p5 }
  0x33   :  { %1724 = shalt.err (!%p1721_p7)
}
  0x34   :  { %s1725_s9 = scalar_lea.vmem %s51_s25, 3072  ;;  %p1730_p9 = scmp.lt.s32.totalorder %s51_s25, %s51_s25 }
  0x35   :  { %p1726_p8 = scmp.ne.s32.totalorder %s51_s25, %s1725_s9  ;;  %p1731_p10 = scmp.lt.s32.totalorder %s1725_s9, %s1725_s9 }
  0x37   :  { %p1732_p11 = por %p1731_p10, %p1730_p9 }
  0x39   :  { %p1733_p12 = pnand %p1732_p11, %p1726_p8 }
  0x3b   :  { %1736 = shalt.err (!%p1733_p12)
}
  0x3c   :  { %56 = dma.hbm_to_vmem [thread:$0]  %s2684_s3, 3072, %s51_s25, [#allocation8], %s1777_s27, %s1777_s27, %s1778_s28  }
  0x3d   :  { %1763 = dma.done.wait [#allocation5], 16  }
  0x3e   :  { %1764 = vsyncadd [#allocation5], 4294967280 }
  0x3f   :  { %1765 = dma.done.wait [#allocation3], 4480  }
  0x40   :  { %1766 = vsyncadd [#allocation3], 4294962816 }
  0x41   :  { %1767 = dma.done.wait [#allocation8], 4608  }
  0x42   :  { %1768 = vsyncadd [#allocation8], 4294962688 }
  0x43   :  { %69 = sfence }
  0x44   :  { %s1866_s10 = sld [smem:[#allocation2]]  ;;  %s1868_s11 = sld [smem:[#allocation2 + $0x1]] }
  0x45   :  { %s1870_s12 = sld [smem:[#allocation2 + $0x2]]  ;;  %s1872_s13 = sld [smem:[#allocation2 + $0x3]] }
  0x46   :  { %s1874_s14 = sld [smem:[#allocation2 + $0x4]]  ;;  %s1876_s2 = sld [smem:[#allocation2 + $0x5]] }
  0x47   :  { %s1878_s3 = sld [smem:[#allocation2 + $0x6]]  ;;  %s1880_s27 = sld [smem:[#allocation2 + $0x7]] }
  0x48   :  { %s1882_s28 = sld [smem:[#allocation2 + $0x8]]  ;;  %s1884_s15 = sld [smem:[#allocation2 + $0x9]] }
  0x49   :  { %s1886_s16 = sld [smem:[#allocation2 + $0xa]]  ;;  %s1888_s17 = sld [smem:[#allocation2 + $0xb]] }
  0x4a   :  { %s1890_s19 = sld [smem:[#allocation2 + $0xc]]  ;;  %s1892_s20 = sld [smem:[#allocation2 + $0xd]] }
  0x4b   :  { %s1894_s21 = sld [smem:[#allocation2 + $0xe]]  ;;  %s1896_s22 = sld [smem:[#allocation2 + $0xf]] }
  0x4c   :  { %s1898_s0 = sld [smem:[#allocation2 + $0x10]]  ;;  %s1900_s23 = sld [smem:[#allocation2 + $0x11]] }
  0x4d   :  { %s1902_s24 = sld [smem:[#allocation2 + $0x12]]  ;;  %s1904_s25 = sld [smem:[#allocation2 + $0x13]] }
  0x4e   :  { %s1906_s26 = sld [smem:[#allocation2 + $0x14]]  ;;  %s1908_s29 = sld [smem:[#allocation2 + $0x15]] }
  0x4f   :  { %s1910_s30 = sld [smem:[#allocation2 + $0x16]]  ;;  %s1912_s5 = sld [smem:[#allocation2 + $0x17]] }
  0x50   :  { %s1914_s6 = sld [smem:[#allocation2 + $0x18]]  ;;  %s1916_s7 = sld [smem:[#allocation2 + $0x19]] }
  0x51   :  { %s1918_s8 = sld [smem:[#allocation2 + $0x1a]]  ;;  %s1920_s9 = sld [smem:[#allocation2 + $0x1b]] }
  0x52   :  { %2709 = sst [smem:[#allocation15_spill]] %s1898_s0  ;;  %s1922_s1 = sld [smem:[#allocation2 + $0x1c]] }
  0x53   :  { %s1924_s18 = sld [smem:[#allocation2 + $0x1d]]  ;;  %s1926_s4 = sld [smem:[#allocation2 + $0x1e]] }
  0x54   :  { %2710 = sst [smem:[#allocation16_spill]] %s1906_s26  ;;  %s1928_s26 = smov 0  }
  0x56   :  { %2711 = sst [smem:[#allocation17_spill]] %s1916_s7 }
  0x58   :  { %2712 = sst [smem:[#allocation18_spill]] %s1922_s1 }
  0x59   :  { %2713 = sst [smem:[#allocation19_spill]] %s1926_s4 }
  0x5a LB: > { %s2714_s7 = sld [smem:[#allocation17_spill]]  ;;  %s2715_s4 = sld [smem:[#allocation19_spill]]  ;;  %v1940_v2 = vstv %s1918_s8  ;;  %v1943_v3 = vstv %s1920_s9  ;;  %v1949_v5 = vstv %s1924_s18  ;;  %v1952_v6 = vstv %s1866_s10  ;;  %s1773_s26 = sphi %s1928_s26, %s106_s26  }
  0x5b   : > { %s2716_s1 = sld [smem:[#allocation18_spill]]  ;;  %v1956_v7 = vstv %s1868_s11  ;;  %v1959_v8 = vstv %s1870_s12  ;;  %s2717_s0 = sld [smem:[#allocation15_spill]]  ;;  %v1962_v9 = vstv %s1872_s13  ;;  %v1965_v10 = vstv %s1874_s14 }
  0x5c   : > { %v1970_v11 = vstv %s1876_s2  ;;  %v1973_v12 = vstv %s1878_s3  ;;  %v1976_v13 = vstv %s1880_s27  ;;  %v1979_v14 = vstv %s1882_s28 }
  0x5d   : > { %v1984_v15 = vstv %s1884_s15  ;;  %v1987_v16 = vstv %s1886_s16  ;;  %v1990_v17 = vstv %s1888_s17  ;;  %v1993_v18 = vstv %s1890_s19 }
  0x5e   : > { %v1996_v19 = vstv %s1892_s20  ;;  %v1999_v20 = vstv %s1894_s21  ;;  %v2002_v21 = vstv %s1896_s22  ;;  %v2013_v25 = vstv %s1900_s23 }
  0x5f   : > { %v2016_v26 = vstv %s1902_s24  ;;  %v2020_v33 = vstv %s1904_s25  ;;  %v2026_v35 = vstv %s1908_s29 }
  0x60   : > { %v1934_v0 = vstv %s2714_s7  ;;  %v1937_v1 = vstv %s2715_s4  ;;  %s2687_s7 = sshll.u32 %s1773_s26, 3 }
  0x61   : > { %v1946_v4 = vstv %s2716_s1  ;;  %s108_s1 = sshra.s32 %s2687_s7, 3  ;;  %s2718_s7 = sld [smem:[#allocation16_spill]]  ;;  %v2005_v22 = vstv %s2717_s0 }
  0x62   : > { %s1981_s4 = sshll.u32 %s108_s1, 2 }
  0x63   : > { %s2008_s1 = scalar_lea.vmem [#allocation6], %s1981_s4  ;;  %s2260_s0 = scalar_lea.vmem [#allocation9], %s1981_s4 }
  0x64   : > { %v1442_v23 = vld [vmem:[%s2008_s1 + $0x78] ss:$8 sps:$4 sm:$0xff]   ;;  %v1446_v24 = vld [vmem:[%s2008_s1 + $0x88] ss:$8 sps:$4 sm:$0xff]  }
  0x65   : > { %v114_v27 = vunpack.c.l.bf16 %v1442_v23  ;;  %v120_v28 = vunpack.c.h.bf16 %v1442_v23  ;;  %v126_v29 = vunpack.c.l.bf16 %v1446_v24  ;;  %v132_v30 = vunpack.c.h.bf16 %v1446_v24  ;;  %v1450_v31 = vld [vmem:[%s2008_s1 + $0x98] ss:$8 sps:$4 sm:$0xff]  }
  0x66   : > { %v138_v32 = vunpack.c.l.bf16 %v1450_v31 }
  0x67   : > { %v2023_v34 = vstv %s2718_s7  ;;  %v140_v36 = vmul.f32 %v1934_v0, %v114_v27  ;;  %v144_v37 = vmul.f32 %v1940_v2, %v120_v28  ;;  %v147_v38 = vmul.f32 %v1943_v3, %v126_v29  ;;  %s2223_s7 = scalar_lea.vmem [#allocation7], %s1981_s4  ;;  %s2757_s4 = sshll.u32 %s1773_s26, 3 }
  0x68   : > { %v150_v39 = vmul.f32 %v1946_v4, %v132_v30  ;;  %v153_v40 = vmul.f32 %v1949_v5, %v138_v32  ;;  %v156_v41 = vmul.f32 %v1952_v6, %v114_v27  ;;  %v158_v42 = vmul.f32 %v1956_v7, %v120_v28  ;;  %s106_s26 = sadd.s32 1, %s1773_s26  }
  0x69   : > { %v161_v43 = vmul.f32 %v1959_v8, %v126_v29  ;;  %v142_v44 = vadd.f32 %v1937_v1, %v140_v36  ;;  %v164_v45 = vmul.f32 %v1962_v9, %v132_v30  ;;  %v167_v46 = vmul.f32 %v1965_v10, %v138_v32  ;;  %p103_p13 = scmp.ge.s32.totalorder %s106_s26, 2  }
  0x6a   : > { %v170_v47 = vmul.f32 %v1970_v11, %v114_v27  ;;  %v159_v48 = vadd.f32 %v158_v42, %v156_v41  ;;  %v172_v49 = vmul.f32 %v1973_v12, %v120_v28  ;;  %v175_v50 = vmul.f32 %v1976_v13, %v126_v29 }
  0x6b   : > { %v178_v51 = vmul.f32 %v1979_v14, %v132_v30  ;;  %v145_v52 = vadd.f32 %v144_v37, %v142_v44  ;;  %v181_v53 = vmul.f32 %v1984_v15, %v138_v32  ;;  %v184_v54 = vmul.f32 %v1987_v16, %v114_v27 }
  0x6c   : > { %v186_v55 = vmul.f32 %v1990_v17, %v120_v28  ;;  %v162_v56 = vadd.f32 %v161_v43, %v159_v48  ;;  %v173_v57 = vadd.f32 %v172_v49, %v170_v47  ;;  %v189_v58 = vmul.f32 %v1993_v18, %v126_v29 }
  0x6d   : > { %v192_v59 = vmul.f32 %v1996_v19, %v132_v30  ;;  %v148_v60 = vadd.f32 %v147_v38, %v145_v52  ;;  %v195_v62 = vmul.f32 %v1999_v20, %v138_v32  ;;  %v198_v63 = vmul.f32 %v2002_v21, %v114_v27 }
  0x6e   : > { %v187_v61 = vadd.f32 %v186_v55, %v184_v54  ;;  %v165_v23 = vadd.f32 %v164_v45, %v162_v56  ;;  %v176_v24 = vadd.f32 %v175_v50, %v173_v57  ;;  %v200_v36 = vmul.f32 %v2005_v22, %v120_v28  ;;  %v1454_v54 = vld [vmem:[%s2008_s1 + $0xa8] ss:$8 sps:$4 sm:$0xff]  }
  0x6f   : > { %v203_v37 = vmul.f32 %v2013_v25, %v126_v29  ;;  %v151_v41 = vadd.f32 %v150_v39, %v148_v60  ;;  %v206_v43 = vmul.f32 %v2016_v26, %v132_v30  ;;  %v209_v38 = vmul.f32 %v2020_v33, %v138_v32 }
  0x70   : > { %v190_v42 = vadd.f32 %v189_v58, %v187_v61  ;;  %v2054_v44 = vadd.f32 %v167_v46, %v165_v23  ;;  %v179_v47 = vadd.f32 %v178_v51, %v176_v24  ;;  %v201_v48 = vadd.f32 %v200_v36, %v198_v63  ;;  %v1458_v51 = vld [vmem:[%s2008_s1 + $0xb8] ss:$8 sps:$4 sm:$0xff]  }
  0x71   : > { %v212_v45 = vmul.f32 %v2023_v34, %v114_v27  ;;  %v2057_v49 = vadd.f32 %v153_v40, %v151_v41  ;;  %v214_v52 = vmul.f32 %v2026_v35, %v120_v28  ;;  %v2061_v39 = vstv %s1910_s30 }
  0x72   : > { %2719 = vst [vmem:[#allocation20_spill] sm:$0xff] %v2054_v44  ;;  %v193_v50 = vadd.f32 %v192_v59, %v190_v42  ;;  %v2064_v55 = vadd.f32 %v181_v53, %v179_v47  ;;  %v204_v56 = vadd.f32 %v203_v37, %v201_v48  ;;  %v217_v57 = vmul.f32 %v2061_v39, %v126_v29  ;;  %v1474_v44 = vld [vmem:[%s2008_s1 + $0xf8] ss:$8 sps:$4 sm:$0xff]  }
  0x73   : > { %2720 = vst [vmem:[#allocation21_spill] sm:$0xff] %v2057_v49  ;;  %v2068_v46 = vstv %s1912_s5  ;;  %v215_v60 = vadd.f32 %v214_v52, %v212_v45  ;;  %v2075_v40 = vstv %s1914_s6  ;;  %v229_v61 = vunpack.c.h.bf16 %v1450_v31 }
  0x74   : > { %2721 = vst [vmem:[#allocation22_spill] sm:$0xff] %v2064_v55  ;;  %v2071_v58 = vadd.f32 %v195_v62, %v193_v50  ;;  %v220_v27 = vmul.f32 %v2068_v46, %v132_v30  ;;  %v207_v59 = vadd.f32 %v206_v43, %v204_v56  ;;  %v223_v28 = vmul.f32 %v2075_v40, %v138_v32  ;;  %v1462_v55 = vld [vmem:[%s2008_s1 + $0xc8] ss:$8 sps:$4 sm:$0xff]  }
  0x75   : > { %v234_v63 = vunpack.c.l.bf16 %v1454_v54  ;;  %v218_v53 = vadd.f32 %v217_v57, %v215_v60  ;;  %v239_v23 = vunpack.c.h.bf16 %v1454_v54  ;;  %v244_v24 = vunpack.c.l.bf16 %v1458_v51 }
  0x76   : > { %2722 = vst [vmem:[#allocation23_spill] sm:$0xff] %v2071_v58  ;;  %v249_v36 = vunpack.c.h.bf16 %v1458_v51  ;;  %v2078_v29 = vadd.f32 %v209_v38, %v207_v59  ;;  %v250_v37 = vmul.f32 %v229_v61, %v1934_v0  ;;  %v260_v41 = vmul.f32 %v229_v61, %v1952_v6 }
  0x77   : > { %v252_v62 = vmul.f32 %v234_v63, %v1940_v2  ;;  %v221_v30 = vadd.f32 %v220_v27, %v218_v53  ;;  %v254_v42 = vmul.f32 %v239_v23, %v1943_v3  ;;  %v256_v43 = vmul.f32 %v244_v24, %v1946_v4 }
  0x78   : > { %2723 = vst [vmem:[#allocation24_spill] sm:$0xff] %v2078_v29  ;;  %v258_v31 = vmul.f32 %v249_v36, %v1949_v5  ;;  %v251_v32 = vadd.f32 %v250_v37, %v1937_v1  ;;  %v261_v47 = vmul.f32 %v234_v63, %v1956_v7  ;;  %v263_v38 = vmul.f32 %v239_v23, %v1959_v8 }
  0x79   : > { %v265_v48 = vmul.f32 %v244_v24, %v1962_v9  ;;  %v2090_v45 = vadd.f32 %v223_v28, %v221_v30  ;;  %v267_v50 = vmul.f32 %v249_v36, %v1965_v10  ;;  %v269_v52 = vmul.f32 %v229_v61, %v1970_v11 }
  0x7a   : > { %v270_v54 = vmul.f32 %v234_v63, %v1973_v12  ;;  %v253_v56 = vadd.f32 %v252_v62, %v251_v32  ;;  %v262_v57 = vadd.f32 %v261_v47, %v260_v41  ;;  %v272_v51 = vmul.f32 %v239_v23, %v1976_v13 }
  0x7b   : > { %2724 = vst [vmem:[#allocation25_spill] sm:$0xff] %v2090_v45  ;;  %v274_v60 = vmul.f32 %v244_v24, %v1979_v14  ;;  %v276_v59 = vmul.f32 %v249_v36, %v1984_v15  ;;  %v278_v53 = vmul.f32 %v229_v61, %v1987_v16  ;;  %v279_v28 = vmul.f32 %v234_v63, %v1990_v17 }
  0x7c   : > { %v271_v27 = vadd.f32 %v270_v54, %v269_v52  ;;  %v255_v37 = vadd.f32 %v254_v42, %v253_v56  ;;  %v264_v30 = vadd.f32 %v263_v38, %v262_v57  ;;  %v281_v49 = vmul.f32 %v239_v23, %v1993_v18 }
  0x7d   : > { %v283_v45 = vmul.f32 %v244_v24, %v1996_v19  ;;  %v280_v41 = vadd.f32 %v279_v28, %v278_v53  ;;  %v285_v32 = vmul.f32 %v249_v36, %v1999_v20  ;;  %v287_v47 = vmul.f32 %v229_v61, %v2002_v21 }
  0x7e   : > { %v273_v62 = vadd.f32 %v272_v51, %v271_v27  ;;  %v257_v52 = vadd.f32 %v256_v43, %v255_v37  ;;  %v266_v54 = vadd.f32 %v265_v48, %v264_v30  ;;  %v288_v29 = vmul.f32 %v234_v63, %v2005_v22  ;;  %v1466_v48 = vld [vmem:[%s2008_s1 + $0xd8] ss:$8 sps:$4 sm:$0xff]  }
  0x7f   : > { %v290_v58 = vmul.f32 %v239_v23, %v2013_v25  ;;  %v282_v56 = vadd.f32 %v281_v49, %v280_v41  ;;  %v292_v38 = vmul.f32 %v244_v24, %v2016_v26  ;;  %v294_v57 = vmul.f32 %v249_v36, %v2020_v33 }
  0x80   : > { %v275_v42 = vadd.f32 %v274_v60, %v273_v62  ;;  %v2109_v51 = vadd.f32 %v258_v31, %v257_v52  ;;  %v2111_v27 = vadd.f32 %v267_v50, %v266_v54  ;;  %v289_v53 = vadd.f32 %v288_v29, %v287_v47 }
  0x81   : > { %v296_v43 = vmul.f32 %v229_v61, %v2023_v34  ;;  %v284_v37 = vadd.f32 %v283_v45, %v282_v56  ;;  %v297_v60 = vmul.f32 %v234_v63, %v2026_v35  ;;  %v299_v49 = vmul.f32 %v239_v23, %v2061_v39  ;;  %v1470_v61 = vld [vmem:[%s2008_s1 + $0xe8] ss:$8 sps:$4 sm:$0xff]  }
  0x82   : > { %2725 = vst [vmem:[#allocation26_spill] sm:$0xff] %v2109_v51  ;;  %2726 = vst [vmem:[#allocation27_spill] sm:$0xff] %v2111_v27  ;;  %v2115_v28 = vadd.f32 %v276_v59, %v275_v42  ;;  %v291_v30 = vadd.f32 %v290_v58, %v289_v53  ;;  %v301_v62 = vmul.f32 %v244_v24, %v2068_v46  ;;  %v309_v41 = vunpack.c.l.bf16 %v1462_v55 }
  0x83   : > { %v303_v31 = vmul.f32 %v249_v36, %v2075_v40  ;;  %v2121_v50 = vadd.f32 %v285_v32, %v284_v37  ;;  %v298_v52 = vadd.f32 %v297_v60, %v296_v43  ;;  %v314_v29 = vunpack.c.h.bf16 %v1462_v55 }
  0x84   : > { %2727 = vst [vmem:[#allocation28_spill] sm:$0xff] %v2115_v28  ;;  %v319_v47 = vunpack.c.l.bf16 %v1466_v48  ;;  %v293_v54 = vadd.f32 %v292_v38, %v291_v30  ;;  %v324_v59 = vunpack.c.h.bf16 %v1466_v48  ;;  %v329_v42 = vunpack.c.l.bf16 %v1470_v61 }
  0x85   : > { %2728 = vst [vmem:[#allocation29_spill] sm:$0xff] %v2121_v50  ;;  %v330_v45 = vmul.f32 %v309_v41, %v1934_v0  ;;  %v300_v63 = vadd.f32 %v299_v49, %v298_v52  ;;  %v332_v23 = vmul.f32 %v314_v29, %v1940_v2  ;;  %v340_v24 = vmul.f32 %v309_v41, %v1952_v6 }
  0x86   : > { %v334_v58 = vmul.f32 %v319_v47, %v1943_v3  ;;  %v2128_v36 = vadd.f32 %v294_v57, %v293_v54  ;;  %v336_v55 = vmul.f32 %v324_v59, %v1946_v4  ;;  %v338_v56 = vmul.f32 %v329_v42, %v1949_v5 }
  0x87   : > { %v331_v32 = vadd.f32 %v330_v45, %v1937_v1  ;;  %v302_v38 = vadd.f32 %v301_v62, %v300_v63  ;;  %v341_v53 = vmul.f32 %v314_v29, %v1956_v7  ;;  %v343_v43 = vmul.f32 %v319_v47, %v1959_v8 }
  0x88   : > { %2729 = vst [vmem:[#allocation30_spill] sm:$0xff] %v2128_v36  ;;  %v345_v48 = vmul.f32 %v324_v59, %v1962_v9  ;;  %v347_v60 = vmul.f32 %v329_v42, %v1965_v10  ;;  %v349_v49 = vmul.f32 %v309_v41, %v1970_v11  ;;  %v350_v57 = vmul.f32 %v314_v29, %v1973_v12 }
  0x89   : > { %v333_v37 = vadd.f32 %v332_v23, %v331_v32  ;;  %v2139_v30 = vadd.f32 %v303_v31, %v302_v38  ;;  %v342_v52 = vadd.f32 %v341_v53, %v340_v24  ;;  %v352_v54 = vmul.f32 %v319_v47, %v1976_v13 }
  0x8a   : > { %v354_v62 = vmul.f32 %v324_v59, %v1979_v14  ;;  %v351_v63 = vadd.f32 %v350_v57, %v349_v49  ;;  %v356_v51 = vmul.f32 %v329_v42, %v1984_v15  ;;  %v358_v36 = vmul.f32 %v309_v41, %v1987_v16 }
  0x8b   : > { %2730 = vst [vmem:[#allocation31_spill] sm:$0xff] %v2139_v30  ;;  %v335_v45 = vadd.f32 %v334_v58, %v333_v37  ;;  %v344_v23 = vadd.f32 %v343_v43, %v342_v52  ;;  %v359_v32 = vmul.f32 %v314_v29, %v1990_v17  ;;  %v361_v50 = vmul.f32 %v319_v47, %v1993_v18 }
  0x8c   : > { %v363_v28 = vmul.f32 %v324_v59, %v1996_v19  ;;  %v353_v24 = vadd.f32 %v352_v54, %v351_v63  ;;  %v365_v38 = vmul.f32 %v329_v42, %v1999_v20  ;;  %v367_v58 = vmul.f32 %v309_v41, %v2002_v21 }
  0x8d   : > { %v337_v31 = vadd.f32 %v336_v55, %v335_v45  ;;  %v346_v53 = vadd.f32 %v345_v48, %v344_v23  ;;  %v360_v37 = vadd.f32 %v359_v32, %v358_v36  ;;  %v368_v49 = vmul.f32 %v314_v29, %v2005_v22  ;;  %v1478_v48 = vld [vmem:[%s2008_s1 + $0x108] ss:$8 sps:$4 sm:$0xff]  }
  0x8e   : > { %v370_v43 = vmul.f32 %v319_v47, %v2013_v25  ;;  %v355_v52 = vadd.f32 %v354_v62, %v353_v24  ;;  %v372_v30 = vmul.f32 %v324_v59, %v2016_v26  ;;  %v374_v55 = vmul.f32 %v329_v42, %v2020_v33 }
  0x8f   : > { %v2152_v57 = vadd.f32 %v338_v56, %v337_v31  ;;  %v2156_v45 = vadd.f32 %v347_v60, %v346_v53  ;;  %v362_v54 = vadd.f32 %v361_v50, %v360_v37  ;;  %v369_v63 = vadd.f32 %v368_v49, %v367_v58 }
  0x90   : > { %v376_v27 = vmul.f32 %v309_v41, %v2023_v34  ;;  %v2161_v36 = vadd.f32 %v356_v51, %v355_v52  ;;  %v377_v23 = vmul.f32 %v314_v29, %v2026_v35  ;;  %v379_v56 = vmul.f32 %v319_v47, %v2061_v39 }
  0x91   : > { %v381_v62 = vmul.f32 %v324_v59, %v2068_v46  ;;  %v364_v32 = vadd.f32 %v363_v28, %v362_v54  ;;  %v371_v31 = vadd.f32 %v370_v43, %v369_v63  ;;  %v383_v24 = vmul.f32 %v329_v42, %v2075_v40 }
  0x92   : > { %2731 = vst [vmem:[#allocation32_spill] sm:$0xff] %v2161_v36  ;;  %v389_v60 = vunpack.c.h.bf16 %v1470_v61  ;;  %v378_v53 = vadd.f32 %v377_v23, %v376_v27  ;;  %v394_v50 = vunpack.c.l.bf16 %v1474_v44  ;;  %v399_v58 = vunpack.c.h.bf16 %v1474_v44 }
  0x93   : > { %v404_v37 = vunpack.c.l.bf16 %v1478_v48  ;;  %v2167_v41 = vadd.f32 %v365_v38, %v364_v32  ;;  %v373_v49 = vadd.f32 %v372_v30, %v371_v31  ;;  %v409_v51 = vunpack.c.h.bf16 %v1478_v48 }
  0x94   : > { %v410_v52 = vmul.f32 %v389_v60, %v1934_v0  ;;  %v380_v29 = vadd.f32 %v379_v56, %v378_v53  ;;  %v412_v47 = vmul.f32 %v394_v50, %v1940_v2  ;;  %v414_v59 = vmul.f32 %v399_v58, %v1943_v3 }
  0x95   : > { %2732 = vst [vmem:[#allocation33_spill] sm:$0xff] %v2167_v41  ;;  %v416_v28 = vmul.f32 %v404_v37, %v1946_v4  ;;  %v2173_v43 = vadd.f32 %v374_v55, %v373_v49  ;;  %v418_v44 = vmul.f32 %v409_v51, %v1949_v5  ;;  %v420_v61 = vmul.f32 %v389_v60, %v1952_v6 }
  0x96   : > { %v411_v27 = vadd.f32 %v410_v52, %v1937_v1  ;;  %v382_v42 = vadd.f32 %v381_v62, %v380_v29  ;;  %v421_v30 = vmul.f32 %v394_v50, %v1956_v7  ;;  %v423_v38 = vmul.f32 %v399_v58, %v1959_v8 }
  0x97   : > { %v425_v54 = vmul.f32 %v404_v37, %v1962_v9  ;;  %v427_v48 = vmul.f32 %v409_v51, %v1965_v10  ;;  %v429_v23 = vmul.f32 %v389_v60, %v1970_v11  ;;  %v430_v55 = vmul.f32 %v394_v50, %v1973_v12 }
  0x98   : > { %v413_v63 = vadd.f32 %v412_v47, %v411_v27  ;;  %v2184_v56 = vadd.f32 %v383_v24, %v382_v42  ;;  %v422_v1 = vadd.f32 %v421_v30, %v420_v61  ;;  %v432_v32 = vmul.f32 %v399_v58, %v1976_v13  ;;  %v467_v47 = vld [vmem:[%s2008_s1] ss:$8 sps:$4 sm:$0xff]   ;;  %v1485_v27 = vld [vmem:[%s2008_s1 + $0x10] ss:$8 sps:$4 sm:$0xff]  }
  0x99   : > { %v434_v6 = vmul.f32 %v404_v37, %v1979_v14  ;;  %v431_v7 = vadd.f32 %v430_v55, %v429_v23  ;;  %v436_v8 = vmul.f32 %v409_v51, %v1984_v15  ;;  %v438_v9 = vmul.f32 %v389_v60, %v1987_v16 }
  0x9a   : > { %v415_v62 = vadd.f32 %v414_v59, %v413_v63  ;;  %v424_v31 = vadd.f32 %v423_v38, %v422_v1  ;;  %v439_v10 = vmul.f32 %v394_v50, %v1990_v17  ;;  %v441_v11 = vmul.f32 %v399_v58, %v1993_v18  ;;  %v2734_v1 = vld [vmem:[#allocation20_spill] sm:$0xff] }
  0x9b   : > { %v443_v12 = vmul.f32 %v404_v37, %v1996_v19  ;;  %v433_v53 = vadd.f32 %v432_v32, %v431_v7  ;;  %v445_v13 = vmul.f32 %v409_v51, %v1999_v20  ;;  %v447_v14 = vmul.f32 %v389_v60, %v2002_v21 }
  0x9c   : > { %v417_v24 = vadd.f32 %v416_v28, %v415_v62  ;;  %v426_v49 = vadd.f32 %v425_v54, %v424_v31  ;;  %v440_v52 = vadd.f32 %v439_v10, %v438_v9  ;;  %v448_v15 = vmul.f32 %v394_v50, %v2005_v22  ;;  %v2736_v9 = vld [vmem:[#allocation23_spill] sm:$0xff]  ;;  %v2737_v10 = vld [vmem:[#allocation24_spill] sm:$0xff] }
  0x9d   : > { %v450_v16 = vmul.f32 %v399_v58, %v2013_v25  ;;  %v435_v17 = vadd.f32 %v434_v6, %v433_v53  ;;  %v452_v18 = vmul.f32 %v404_v37, %v2016_v26  ;;  %v454_v19 = vmul.f32 %v409_v51, %v2020_v33  ;;  %v2735_v6 = vld [vmem:[#allocation22_spill] sm:$0xff] }
  0x9e   : > { %v2197_v29 = vadd.f32 %v418_v44, %v417_v24  ;;  %v2202_v59 = vadd.f32 %v427_v48, %v426_v49  ;;  %v442_v28 = vadd.f32 %v441_v11, %v440_v52  ;;  %v449_v20 = vadd.f32 %v448_v15, %v447_v14  ;;  %v2738_v24 = vld [vmem:[#allocation25_spill] sm:$0xff]  ;;  %v2739_v14 = vld [vmem:[#allocation27_spill] sm:$0xff] }
  0x9f   : > { %v456_v21 = vmul.f32 %v389_v60, %v2023_v34  ;;  %v2206_v61 = vadd.f32 %v436_v8, %v435_v17  ;;  %v457_v22 = vmul.f32 %v394_v50, %v2026_v35  ;;  %v459_v25 = vmul.f32 %v399_v58, %v2061_v39  ;;  %v2213_v34 = vld [vmem:[%s2008_s1 + $0x20] ss:$8 sps:$4 sm:$0xff]  }
  0xa0   : > { %v461_v44 = vmul.f32 %v404_v37, %v2068_v46  ;;  %v444_v26 = vadd.f32 %v443_v12, %v442_v28  ;;  %v451_v42 = vadd.f32 %v450_v16, %v449_v20  ;;  %v463_v33 = vmul.f32 %v409_v51, %v2075_v40  ;;  %v2226_v37 = vld [vmem:[%s2223_s7] ss:$8 sps:$4 sm:$0xff]   ;;  %v2740_v16 = vld [vmem:[#allocation28_spill] sm:$0xff] }
  0xa1   : > { %v468_v30 = vunpack.c.l.bf16 %v467_v47  ;;  %v458_v38 = vadd.f32 %v457_v22, %v456_v21  ;;  %v472_v54 = vunpack.c.h.bf16 %v467_v47  ;;  %v476_v63 = vunpack.c.l.bf16 %v1485_v27  ;;  %v2742_v28 = vld [vmem:[#allocation30_spill] sm:$0xff]  ;;  %v2743_v21 = vld [vmem:[#allocation31_spill] sm:$0xff] }
  0xa2   : > { %v480_v48 = vunpack.c.h.bf16 %v1485_v27  ;;  %v2215_v60 = vadd.f32 %v445_v13, %v444_v26  ;;  %v453_v23 = vadd.f32 %v452_v18, %v451_v42  ;;  %v484_v35 = vunpack.c.l.bf16 %v2213_v34  ;;  %v2741_v18 = vld [vmem:[#allocation29_spill] sm:$0xff] }
  0xa3   : > { %v485_v39 = vmul.f32 %v468_v30, %v1934_v0  ;;  %v460_v46 = vadd.f32 %v459_v25, %v458_v38  ;;  %v486_v50 = vmul.f32 %v472_v54, %v1940_v2  ;;  %v488_v58 = vmul.f32 %v476_v63, %v1943_v3  ;;  %v2246_v25 = vld [vmem:[%s2223_s7 + $0x10] ss:$8 sps:$4 sm:$0xff]  }
  0xa4   : > { %v490_v40 = vmul.f32 %v480_v48, %v1946_v4  ;;  %v2228_v51 = vadd.f32 %v454_v19, %v453_v23  ;;  %v492_v55 = vmul.f32 %v484_v35, %v1949_v5  ;;  %v494_v32 = vmul.f32 %v468_v30, %v2734_v1 }
  0xa5   : > { %v495_v62 = vmul.f32 %v472_v54, %v2735_v6  ;;  %v462_v7 = vadd.f32 %v461_v44, %v460_v46  ;;  %v487_v8 = vadd.f32 %v486_v50, %v485_v39  ;;  %v497_v31 = vmul.f32 %v476_v63, %v2736_v9 }
  0xa6   : > { %2733 = vst [vmem:[#allocation34_spill] sm:$0xff] %v2228_v51  ;;  %v499_v11 = vmul.f32 %v480_v48, %v2737_v10  ;;  %v501_v53 = vmul.f32 %v484_v35, %v2738_v24  ;;  %v508_v13 = vunpack.c.l.bf16 %v2226_v37  ;;  %v510_v49 = vmul.f32 %v468_v30, %v2739_v14 }
  0xa7   : > { %v496_v12 = vadd.f32 %v495_v62, %v494_v32  ;;  %v2238_v52 = vadd.f32 %v463_v33, %v462_v7  ;;  %v489_v15 = vadd.f32 %v488_v58, %v487_v8  ;;  %v511_v17 = vmul.f32 %v472_v54, %v2740_v16 }
  0xa8   : > { %v513_v19 = vmul.f32 %v476_v63, %v2741_v18  ;;  %v515_v20 = vmul.f32 %v480_v48, %v2742_v28  ;;  %v517_v27 = vmul.f32 %v484_v35, %v2743_v21  ;;  %v524_v22 = vunpack.c.h.bf16 %v2226_v37 }
  0xa9   : > { %v498_v47 = vadd.f32 %v497_v31, %v496_v12  ;;  %v491_v44 = vadd.f32 %v490_v40, %v489_v15  ;;  %v512_v26 = vadd.f32 %v511_v17, %v510_v49  ;;  %v526_v42 = vmul.f32 %v468_v30, %v2156_v45  ;;  %v2744_v31 = vld [vmem:[#allocation21_spill] sm:$0xff]  ;;  %v2745_v49 = vld [vmem:[#allocation26_spill] sm:$0xff] }
  0xaa   : > { %v527_v33 = vmul.f32 %v472_v54, %v2161_v36  ;;  %v529_v23 = vmul.f32 %v476_v63, %v2167_v41  ;;  %v531_v39 = vmul.f32 %v480_v48, %v2173_v43  ;;  %v533_v46 = vmul.f32 %v484_v35, %v2184_v56 }
  0xab   : > { %v500_v38 = vadd.f32 %v499_v11, %v498_v47  ;;  %v493_v50 = vadd.f32 %v492_v55, %v491_v44  ;;  %v514_v58 = vadd.f32 %v513_v19, %v512_v26  ;;  %v540_v37 = vunpack.c.l.bf16 %v2246_v25  ;;  %v832_v55 = vld [vmem:[%s2260_s0] ss:$48 sps:$4 sm:$0xff]  }
  0xac   : > { %v528_v32 = vadd.f32 %v527_v33, %v526_v42  ;;  %v542_v40 = vmul.f32 %v468_v30, %v2202_v59  ;;  %v543_v7 = vmul.f32 %v472_v54, %v2206_v61  ;;  %v545_v8 = vmul.f32 %v476_v63, %v2215_v60  ;;  %v1537_v19 = vld [vmem:[%s2260_s0 + $0x60] ss:$48 sps:$4 sm:$0xff]  }
  0xad   : > { %v502_v62 = vadd.f32 %v501_v53, %v500_v38  ;;  %v503_v11 = vadd.f32 %v493_v50, %v2744_v31  ;;  %v516_v12 = vadd.f32 %v515_v20, %v514_v58  ;;  %v519_v15 = vadd.f32 %v493_v50, %v2745_v49  ;;  %v1500_v42 = vld [vmem:[%s2008_s1 + $0x30] ss:$8 sps:$4 sm:$0xff]  }
  0xae   : > { %v530_v17 = vadd.f32 %v529_v23, %v528_v32  ;;  %v535_v53 = vadd.f32 %v493_v50, %v2152_v57  ;;  %v544_v30 = vadd.f32 %v543_v7, %v542_v40  ;;  %v547_v54 = vmul.f32 %v480_v48, %v2228_v51  ;;  %v1504_v32 = vld [vmem:[%s2008_s1 + $0x40] ss:$8 sps:$4 sm:$0xff]  }
  0xaf   : > { %v549_v63 = vmul.f32 %v484_v35, %v2238_v52  ;;  %v504_v47 = vadd.f32 %v503_v11, %v502_v62  ;;  %v518_v44 = vadd.f32 %v517_v27, %v516_v12  ;;  %v551_v26 = vadd.f32 %v493_v50, %v2197_v29 }
  0xb0   : > { %v532_v20 = vadd.f32 %v531_v39, %v530_v17  ;;  %v546_v33 = vadd.f32 %v545_v8, %v544_v30  ;;  %v556_v38 = vunpack.c.h.bf16 %v2246_v25  ;;  %v2270_v23 = vunpack.c.l.bf16 %v832_v55 }
  0xb1   : > { %v2272_v58 = vunpack.c.h.bf16 %v832_v55  ;;  %v509_v40 = vadd.f32 %v508_v13, %v504_v47  ;;  %v520_v7 = vadd.f32 %v519_v15, %v518_v44  ;;  %v2275_v51 = vunpack.c.l.bf16 %v1537_v19 }
  0xb2   : > { %2746 = vst [vmem:[#allocation20_spill] sm:$0xff] %v2270_v23  ;;  %v534_v48 = vadd.f32 %v533_v46, %v532_v20  ;;  %v548_v35 = vadd.f32 %v547_v54, %v546_v33  ;;  %v2277_v27 = vunpack.c.h.bf16 %v1537_v19  ;;  %v2280_v39 = vunpack.c.h.bf16 %v2213_v34 }
  0xb3   : > { %2747 = vst [vmem:[#allocation22_spill] sm:$0xff] %v2272_v58  ;;  %2748 = vst [vmem:[#allocation23_spill] sm:$0xff] %v2275_v51  ;;  %v2282_v50 = vunpack.c.l.bf16 %v1500_v42  ;;  %v525_v25 = vadd.f32 %v524_v22, %v520_v7  ;;  %v2284_v8 = vunpack.c.h.bf16 %v1500_v42  ;;  %v2286_v11 = vunpack.c.l.bf16 %v1504_v32 }
  0xb4   : > { %2749 = vst [vmem:[#allocation24_spill] sm:$0xff] %v2277_v27  ;;  %v536_v62 = vadd.f32 %v535_v53, %v534_v48  ;;  %v550_v13 = vadd.f32 %v549_v63, %v548_v35  ;;  %v2288_v12 = vunpack.c.h.bf16 %v1504_v32  ;;  %v606_v46 = vmul.f32 %v2280_v39, %v1934_v0  ;;  %v2299_v53 = vld [vmem:[%s2223_s7 + $0x20] ss:$8 sps:$4 sm:$0xff]  }
  0xb5   : > { %v607_v15 = vmul.f32 %v2282_v50, %v1940_v2  ;;  %v558_v34 = vmax.f32 %v509_v40, %v525_v25  ;;  %v609_v55 = vmul.f32 %v2284_v8, %v1943_v3  ;;  %v611_v22 = vmul.f32 %v2286_v11, %v1946_v4 }
  0xb6   : > { %v541_v17 = vadd.f32 %v540_v37, %v536_v62  ;;  %v552_v30 = vadd.f32 %v551_v26, %v550_v13  ;;  %v613_v63 = vmul.f32 %v2288_v12, %v1949_v5  ;;  %v615_v19 = vmul.f32 %v2280_v39, %v2734_v1 }
  0xb7   : > { %v608_v54 = vadd.f32 %v607_v15, %v606_v46  ;;  %v616_v37 = vmul.f32 %v2282_v50, %v2735_v6  ;;  %v618_v47 = vmul.f32 %v2284_v8, %v2736_v9  ;;  %v620_v44 = vmul.f32 %v2286_v11, %v2737_v10 }
  0xb8   : > { %v622_v20 = vmul.f32 %v2288_v12, %v2738_v24  ;;  %v557_v26 = vadd.f32 %v556_v38, %v552_v30  ;;  %v629_v33 = vunpack.c.l.bf16 %v2299_v53  ;;  %v631_v32 = vmul.f32 %v2280_v39, %v2739_v14 }
  0xb9   : > { %v610_v42 = vadd.f32 %v609_v55, %v608_v54  ;;  %v617_v7 = vadd.f32 %v616_v37, %v615_v19  ;;  %v632_v48 = vmul.f32 %v2282_v50, %v2740_v16  ;;  %v634_v35 = vmul.f32 %v2284_v8, %v2741_v18 }
  0xba   : > { %v636_v62 = vmul.f32 %v2286_v11, %v2742_v28  ;;  %v559_v13 = vmax.f32 %v541_v17, %v557_v26  ;;  %v638_v38 = vmul.f32 %v2288_v12, %v2743_v21  ;;  %v646_v15 = vunpack.c.h.bf16 %v2299_v53 }
  0xbb   : > { %v612_v46 = vadd.f32 %v611_v22, %v610_v42  ;;  %v619_v55 = vadd.f32 %v618_v47, %v617_v7  ;;  %v633_v30 = vadd.f32 %v632_v48, %v631_v32  ;;  %v648_v54 = vmul.f32 %v2280_v39, %v2156_v45 }
  0xbc   : > { %v649_v19 = vmul.f32 %v2282_v50, %v2161_v36  ;;  %v560_v37 = vmax.f32 %v558_v34, %v559_v13  ;;  %v651_v51 = vmul.f32 %v2284_v8, %v2167_v41  ;;  %v653_v22 = vmul.f32 %v2286_v11, %v2173_v43 }
  0xbd   : > { %v614_v27 = vadd.f32 %v613_v63, %v612_v46  ;;  %v621_v42 = vadd.f32 %v620_v44, %v619_v55  ;;  %v635_v58 = vadd.f32 %v634_v35, %v633_v30  ;;  %v655_v47 = vmul.f32 %v2288_v12, %v2184_v56  ;;  %v2338_v46 = vld [vmem:[%s2223_s7 + $0x30] ss:$8 sps:$4 sm:$0xff]  }
  0xbe   : > { %v650_v53 = vadd.f32 %v649_v19, %v648_v54  ;;  %v561_v32 = vsub.f32 %v509_v40, %v560_v37  ;;  %v564_v7 = vsub.f32 %v525_v25, %v560_v37  ;;  %v567_v48 = vsub.f32 %v541_v17, %v560_v37 }
  0xbf   : > { %v570_v23 = vsub.f32 %v557_v26, %v560_v37  ;;  %v623_v36 = vadd.f32 %v622_v20, %v621_v42  ;;  %v624_v34 = vadd.f32 %v614_v27, %v2744_v31  ;;  %v637_v63 = vadd.f32 %v636_v62, %v635_v58  ;;  %v1520_v37 = vld [vmem:[%s2008_s1 + $0x60] ss:$8 sps:$4 sm:$0xff]   ;;  %v1524_v42 = vld [vmem:[%s2008_s1 + $0x70] sm:$0xf] }
  0xc0   : > { %v640_v13 = vadd.f32 %v614_v27, %v2745_v49  ;;  %v562_v41 = vmul.f32 1.442695, %v561_v32  ;;  %v565_v44 = vmul.f32 1.442695, %v564_v7  ;;  %v568_v35 = vmul.f32 1.442695, %v567_v48 }
  0xc1   : > { %v652_v55 = vadd.f32 %v651_v51, %v650_v53  ;;  %v571_v30 = vmul.f32 1.442695, %v570_v23  ;;  %v625_v54 = vadd.f32 %v624_v34, %v623_v36  ;;  %v639_v40 = vadd.f32 %v638_v38, %v637_v63  ;;  %v1516_v36 = vld [vmem:[%s2008_s1 + $0x50] ss:$8 sps:$4 sm:$0xff]   ;;  %v2750_v38 = vld [vmem:[#allocation34_spill] sm:$0xff]  ;;  %s2557_s1 = scalar_lea.vmem [#allocation10], %s2757_s4 }
  0xc2   : > { %v657_v25 = vadd.f32 %v614_v27, %v2152_v57  ;;  %1631 = vpow2.f32 %v562_v41  ;;  %v663_v20 = vunpack.c.l.bf16 %v2338_v46  ;;  %v665_v58 = vmul.f32 %v2280_v39, %v2202_v59 }
  0xc3   : > { %v654_v17 = vadd.f32 %v653_v22, %v652_v55  ;;  %1633 = vpow2.f32 %v565_v44  ;;  %v2344_v26 = vadd.f32 %v629_v33, %v625_v54  ;;  %v641_v62 = vadd.f32 %v640_v13, %v639_v40 }
  0xc4   : > { %v666_v51 = vmul.f32 %v2282_v50, %v2206_v61  ;;  %1635 = vpow2.f32 %v568_v35  ;;  %v668_v41 = vmul.f32 %v2284_v8, %v2215_v60  ;;  %v670_v19 = vmul.f32 %v2286_v11, %v2750_v38  ;;  %v2384_v35 = vld [vmem:[%s2223_s7 + $0x40] ss:$8 sps:$4 sm:$0xff]  }
  0xc5   : > { %v656_v23 = vadd.f32 %v655_v47, %v654_v17  ;;  %1637 = vpow2.f32 %v571_v30  ;;  %v2354_v22 = vadd.f32 %v646_v15, %v641_v62  ;;  %v672_v33 = vmul.f32 %v2288_v12, %v2238_v52 }
  0xc6   : > { %v667_v39 = vadd.f32 %v666_v51, %v665_v58  ;;  %v674_v50 = vadd.f32 %v614_v27, %v2197_v29  ;;  %v680_v47 = vunpack.c.h.bf16 %v2338_v46  ;;  %v2361_v32 = vunpack.c.l.bf16 %v1516_v36 }
  0xc7   : > { %v658_v53 = vadd.f32 %v657_v25, %v656_v23  ;;  %v682_v11 = vmax.f32 %v2344_v26, %v2354_v22  ;;  %v2365_v7 = vunpack.c.h.bf16 %v1516_v36  ;;  %v2367_v15 = vunpack.c.l.bf16 %v1520_v37 }
  0xc8   : > { %v669_v8 = vadd.f32 %v668_v41, %v667_v39  ;;  %v2371_v12 = vunpack.c.h.bf16 %v1520_v37  ;;  %v2373_v34 = vunpack.c.l.bf16 %v1524_v42  ;;  %v730_v27 = vmul.f32 %v2361_v32, %v1934_v0  ;;  %v2751_v42 = vld [vmem:[#allocation32_spill] sm:$0xff] }
  0xc9   : > { %v2369_v48 = vadd.f32 %v663_v20, %v658_v53  ;;  %v731_v13 = vmul.f32 %v2365_v7, %v1940_v2  ;;  %v733_v46 = vmul.f32 %v2367_v15, %v1943_v3  ;;  %v739_v44 = vmul.f32 %v2361_v32, %v2734_v1 }
  0xca   : > { %v671_v63 = vadd.f32 %v670_v19, %v669_v8  ;;  %v735_v55 = vmul.f32 %v2371_v12, %v1946_v4  ;;  %v737_v30 = vmul.f32 %v2373_v34, %v1949_v5  ;;  %v740_v0 = vmul.f32 %v2365_v7, %v2735_v6  ;;  %v2752_v8 = vld [vmem:[#allocation33_spill] sm:$0xff] }
  0xcb   : > { %v742_v2 = vmul.f32 %v2367_v15, %v2736_v9  ;;  %v732_v40 = vadd.f32 %v731_v13, %v730_v27  ;;  %v744_v3 = vmul.f32 %v2371_v12, %v2737_v10  ;;  %v746_v1 = vmul.f32 %v2373_v34, %v2738_v24 }
  0xcc   : > { %v673_v54 = vadd.f32 %v672_v33, %v671_v63  ;;  %v2398_v25 = vpop.eup %1631  ;;  %v741_v4 = vadd.f32 %v740_v0, %v739_v44  ;;  %v754_v17 = vunpack.c.l.bf16 %v2384_v35  ;;  %v756_v5 = vmul.f32 %v2361_v32, %v2739_v14 }
  0xcd   : > { %v757_v6 = vmul.f32 %v2365_v7, %v2740_v16  ;;  %v2405_v9 = vpop.eup %1633  ;;  %v734_v58 = vadd.f32 %v733_v46, %v732_v40  ;;  %v759_v10 = vmul.f32 %v2367_v15, %v2741_v18  ;;  %v761_v24 = vmul.f32 %v2371_v12, %v2742_v28 }
  0xce   : > { %v675_v20 = vadd.f32 %v674_v50, %v673_v54  ;;  %v2411_v62 = vpop.eup %1635  ;;  %v573_v51 = vadd.f32 %v2405_v9, %v2398_v25  ;;  %v743_v36 = vadd.f32 %v742_v2, %v741_v4  ;;  %v763_v16 = vmul.f32 %v2373_v34, %v2743_v21  ;;  %v2436_v2 = vld [vmem:[%s2223_s7 + $0x50] ss:$8 sps:$4 sm:$0xff]  }
  0xcf   : > { %v758_v14 = vadd.f32 %v757_v6, %v756_v5  ;;  %v2417_v23 = vpop.eup %1637  ;;  %v736_v19 = vadd.f32 %v735_v55, %v734_v58  ;;  %v771_v37 = vunpack.c.h.bf16 %v2384_v35  ;;  %v773_v18 = vmul.f32 %v2361_v32, %v2156_v45 }
  0xd0   : > { %v681_v41 = vadd.f32 %v680_v47, %v675_v20  ;;  %v574_v28 = vadd.f32 %v2417_v23, %v2411_v62  ;;  %v745_v39 = vadd.f32 %v744_v3, %v743_v36  ;;  %v774_v53 = vmul.f32 %v2365_v7, %v2751_v42  ;;  %v1545_v36 = vld [vmem:[%s2260_s0 + $0x8] ss:$48 sps:$4 sm:$0xff]  }
  0xd1   : > { %v760_v33 = vadd.f32 %v759_v10, %v758_v14  ;;  %v738_v50 = vadd.f32 %v737_v30, %v736_v19  ;;  %v776_v47 = vmul.f32 %v2367_v15, %v2752_v8  ;;  %v778_v27 = vmul.f32 %v2371_v12, %v2173_v43  ;;  %v1549_v14 = vld [vmem:[%s2260_s0 + $0x68] ss:$48 sps:$4 sm:$0xff]  }
  0xd2   : > { %v683_v21 = vmax.f32 %v2369_v48, %v681_v41  ;;  %v575_v63 = vadd.f32 %v574_v28, %v573_v51  ;;  %v747_v45 = vadd.f32 %v746_v1, %v745_v39  ;;  %v775_v46 = vadd.f32 %v774_v53, %v773_v18  ;;  %v1577_v18 = vld [vmem:[%s2260_s0 + $0x78] ss:$48 sps:$4 sm:$0xff]  }
  0xd3   : > { %v762_v13 = vadd.f32 %v761_v24, %v760_v33  ;;  %v748_v35 = vadd.f32 %v738_v50, %v2744_v31  ;;  %v765_v55 = vadd.f32 %v738_v50, %v2745_v49  ;;  %v780_v0 = vmul.f32 %v2373_v34, %v2184_v56 }
  0xd4   : > { %v684_v44 = vmax.f32 %v682_v11, %v683_v21  ;;  %1639 = vrcp.f32 %v575_v63  ;;  %v777_v54 = vadd.f32 %v776_v47, %v775_v46  ;;  %v782_v40 = vadd.f32 %v738_v50, %v2152_v57  ;;  %v2753_v46 = vld [vmem:[#allocation20_spill] sm:$0xff] }
  0xd5   : > { %v764_v30 = vadd.f32 %v763_v16, %v762_v13  ;;  %v749_v31 = vadd.f32 %v748_v35, %v747_v45  ;;  %v788_v56 = vunpack.c.l.bf16 %v2436_v2  ;;  %v790_v57 = vmul.f32 %v2361_v32, %v2202_v59  ;;  %v1559_v16 = vld [vmem:[%s2260_s0 + $0x10] ss:$48 sps:$4 sm:$0xff]  }
  0xd6   : > { %v685_v43 = vsub.f32 %v2344_v26, %v684_v44  ;;  %v688_v3 = vsub.f32 %v2354_v22, %v684_v44  ;;  %v691_v11 = vsub.f32 %v2369_v48, %v684_v44  ;;  %v694_v1 = vsub.f32 %v681_v41, %v684_v44  ;;  %v2754_v44 = vld [vmem:[#allocation22_spill] sm:$0xff]  ;;  %v2755_v35 = vld [vmem:[#allocation23_spill] sm:$0xff] }
  0xd7   : > { %v766_v49 = vadd.f32 %v765_v55, %v764_v30  ;;  %v779_v4 = vadd.f32 %v778_v27, %v777_v54  ;;  %v2445_v58 = vadd.f32 %v754_v17, %v749_v31  ;;  %v791_v10 = vmul.f32 %v2365_v7, %v2206_v61  ;;  %v1563_v7 = vld [vmem:[%s2260_s0 + $0x70] ss:$48 sps:$4 sm:$0xff]   ;;  %v2756_v55 = vld [vmem:[#allocation24_spill] sm:$0xff] }
  0xd8   : > { %v686_v5 = vmul.f32 1.442695, %v685_v43  ;;  %v689_v6 = vmul.f32 1.442695, %v688_v3  ;;  %v692_v20 = vmul.f32 1.442695, %v691_v11  ;;  %v793_v24 = vmul.f32 %v2367_v15, %v2215_v60 }
  0xd9   : > { %v695_v26 = vmul.f32 1.442695, %v694_v1  ;;  %v2447_v22 = vadd.f32 %v771_v37, %v766_v49  ;;  %v781_v48 = vadd.f32 %v780_v0, %v779_v4  ;;  %v795_v51 = vmul.f32 %v2371_v12, %v2750_v38  ;;  %v1573_v38 = vld [vmem:[%s2260_s0 + $0x18] ss:$48 sps:$4 sm:$0xff]  }
  0xda   : > { %1641 = vpow2.f32 %v686_v5  ;;  %v797_v32 = vmul.f32 %v2373_v34, %v2238_v52  ;;  %v799_v17 = vadd.f32 %v738_v50, %v2197_v29  ;;  %v792_v41 = vadd.f32 %v791_v10, %v790_v57  ;;  %v1587_v10 = vld [vmem:[%s2260_s0 + $0x20] ss:$48 sps:$4 sm:$0xff]  }
  0xdb   : > { %1643 = vpow2.f32 %v689_v6  ;;  %v783_v59 = vadd.f32 %v782_v40, %v781_v48  ;;  %v805_v61 = vunpack.c.h.bf16 %v2436_v2  ;;  %v807_v60 = vmax.f32 %v2445_v58, %v2447_v22 }
  0xdc   : > { %1645 = vpow2.f32 %v692_v20  ;;  %v2468_v12 = vunpack.c.l.bf16 %v1545_v36  ;;  %v2470_v52 = vunpack.c.h.bf16 %v1545_v36  ;;  %v794_v29 = vadd.f32 %v793_v24, %v792_v41 }
  0xdd   : > { %1647 = vpow2.f32 %v695_v26  ;;  %v2466_v15 = vadd.f32 %v788_v56, %v783_v59  ;;  %v2472_v34 = vunpack.c.l.bf16 %v1549_v14  ;;  %v2474_v19 = vunpack.c.h.bf16 %v1549_v14 }
  0xde   : > { %v2476_v37 = vunpack.c.l.bf16 %v1559_v16  ;;  %v1640_v28 = vpop.eup %1639  ;;  %v2479_v39 = vunpack.c.h.bf16 %v1559_v16  ;;  %v2481_v33 = vunpack.c.l.bf16 %v1563_v7  ;;  %v2483_v42 = vunpack.c.h.bf16 %v1563_v7 }
  0xdf   : > { %v2485_v53 = vunpack.c.l.bf16 %v1573_v38  ;;  %v2488_v21 = vmul.f32 %v1640_v28, %v2398_v25  ;;  %v2491_v50 = vmul.f32 %v1640_v28, %v2405_v9  ;;  %v2494_v8 = vmul.f32 %v1640_v28, %v2411_v62 }
  0xe0   : > { %v2497_v47 = vmul.f32 %v1640_v28, %v2417_v23  ;;  %v796_v27 = vadd.f32 %v795_v51, %v794_v29  ;;  %v2499_v63 = vunpack.c.h.bf16 %v1573_v38  ;;  %v2501_v45 = vunpack.c.l.bf16 %v1577_v18  ;;  %v1601_v28 = vld [vmem:[%s2260_s0 + $0x28] ss:$48 sps:$4 sm:$0xff]  }
  0xe1   : > { %v2503_v13 = vunpack.c.h.bf16 %v1577_v18  ;;  %v834_v25 = vmul.f32 %v2753_v46, %v2488_v21  ;;  %v842_v9 = vmul.f32 %v2754_v44, %v2491_v50  ;;  %v853_v62 = vmul.f32 %v2755_v35, %v2494_v8 }
  0xe2   : > { %v864_v23 = vmul.f32 %v2756_v55, %v2497_v47  ;;  %v798_v0 = vadd.f32 %v797_v32, %v796_v27  ;;  %v882_v2 = vmul.f32 %v2468_v12, %v2488_v21  ;;  %v890_v30 = vmul.f32 %v2470_v52, %v2491_v50 }
  0xe3   : > { %v901_v54 = vmul.f32 %v2472_v34, %v2494_v8  ;;  %v843_v43 = vadd.f32 %v842_v9, %v834_v25  ;;  %v912_v3 = vmul.f32 %v2474_v19, %v2497_v47  ;;  %v931_v11 = vmul.f32 %v2476_v37, %v2488_v21 }
  0xe4   : > { %v2519_v40 = vpop.eup %1641  ;;  %v939_v1 = vmul.f32 %v2479_v39, %v2491_v50  ;;  %v800_v49 = vadd.f32 %v799_v17, %v798_v0  ;;  %v891_v4 = vadd.f32 %v890_v30, %v882_v2  ;;  %v950_v56 = vmul.f32 %v2481_v33, %v2494_v8  ;;  %v1591_v17 = vld [vmem:[%s2260_s0 + $0x80] ss:$48 sps:$4 sm:$0xff]  }
  0xe5   : > { %v2527_v31 = vpop.eup %1643  ;;  %v961_v5 = vmul.f32 %v2483_v42, %v2497_v47  ;;  %v854_v20 = vadd.f32 %v853_v62, %v843_v43  ;;  %v980_v48 = vmul.f32 %v2485_v53, %v2488_v21  ;;  %v988_v59 = vmul.f32 %v2499_v63, %v2491_v50 }
  0xe6   : > { %v2533_v6 = vpop.eup %1645  ;;  %v697_v57 = vadd.f32 %v2527_v31, %v2519_v40  ;;  %v940_v26 = vadd.f32 %v939_v1, %v931_v11  ;;  %v806_v51 = vadd.f32 %v805_v61, %v800_v49  ;;  %v902_v36 = vadd.f32 %v901_v54, %v891_v4  ;;  %v1605_v4 = vld [vmem:[%s2260_s0 + $0x88] ss:$48 sps:$4 sm:$0xff]   ;;  %s1781_s0 = smov (%p103_p13), [#allocation10]  }
  0xe7   : > { %v2540_v24 = vpop.eup %1647  ;;  %v999_v32 = vmul.f32 %v2501_v45, %v2494_v8  ;;  %v865_v14 = vadd.f32 %v864_v23, %v854_v20  ;;  %v1010_v7 = vmul.f32 %v2503_v13, %v2497_v47  ;;  %v989_v61 = vadd.f32 %v988_v59, %v980_v48  ;;  %s1128_s7 = sshll.u32 (%p103_p13), %s1781_s0, 4  ;;  %s1129_s7 = int_to_ptr.vmem [resolvable:$true] %s1128_s7 }
  0xe8   : > { %v698_v16 = vadd.f32 %v2540_v24, %v2533_v6  ;;  %v951_v41 = vadd.f32 %v950_v56, %v940_v26  ;;  %v808_v38 = vmax.f32 %v2466_v15, %v806_v51  ;;  %v913_v29 = vadd.f32 %v912_v3, %v902_v36  ;;  %s1737_s4 = scalar_lea.vmem (%p103_p13), %s1129_s7, 4608  ;;  %p1742_p1 = scmp.lt.s32.totalorder (%p103_p13), %s1129_s7, %s1129_s7 }
  0xe9   : > { %v2552_v18 = vunpack.c.l.bf16 %v1587_v10  ;;  %871 = vst [vmem:[%s2557_s1] sm:$0xff] %v865_v14  ;;  %v2560_v9 = vunpack.c.h.bf16 %v1587_v10  ;;  %v2562_v62 = vunpack.c.l.bf16 %v1591_v17  ;;  %v1000_v0 = vadd.f32 %v999_v32, %v989_v61  ;;  %p1738_p0 = scmp.ne.s32.totalorder (%p103_p13), %s1129_s7, %s1737_s4  ;;  %p1743_p2 = scmp.lt.s32.totalorder (%p103_p13), %s1737_s4, %s1737_s4 }
  0xea   : > { %v699_v27 = vadd.f32 %v698_v16, %v697_v57  ;;  %v962_v25 = vadd.f32 %v961_v5, %v951_v41  ;;  %v809_v23 = vmax.f32 %v807_v60, %v808_v38  ;;  %1553 = vst [vmem:[%s2557_s1 + $0x10] sm:$0xff] %v913_v29  ;;  %v2570_v30 = vunpack.c.h.bf16 %v1591_v17 }
  0xeb   : > { %v1029_v2 = vmul.f32 %v2552_v18, %v2488_v21  ;;  %v1037_v54 = vmul.f32 %v2560_v9, %v2491_v50  ;;  %v1048_v43 = vmul.f32 %v2562_v62, %v2494_v8  ;;  %v2577_v3 = vunpack.c.l.bf16 %v1601_v28  ;;  %p1744_p3 = por (%p103_p13), %p1743_p2, %p1742_p1 }
  0xec   : > { %1649 = vrcp.f32 %v699_v27  ;;  %1567 = vst [vmem:[%s2557_s1 + $0x20] sm:$0xff] %v962_v25  ;;  %v810_v60 = vsub.f32 %v2445_v58, %v809_v23  ;;  %v813_v11 = vsub.f32 %v2447_v22, %v809_v23  ;;  %v816_v1 = vsub.f32 %v2466_v15, %v809_v23 }
  0xed   : > { %v819_v49 = vsub.f32 %v806_v51, %v809_v23  ;;  %v1011_v56 = vadd.f32 %v1010_v7, %v1000_v0  ;;  %v1038_v5 = vadd.f32 %v1037_v54, %v1029_v2  ;;  %v1059_v20 = vmul.f32 %v2570_v30, %v2497_v47  ;;  %p1745_p4 = pnand (%p103_p13), %p1744_p3, %p1738_p0 }
  0xee   : > { %v1078_v57 = vmul.f32 %v2577_v3, %v2488_v21  ;;  %v811_v26 = vmul.f32 1.442695, %v810_v60  ;;  %v814_v48 = vmul.f32 1.442695, %v813_v11  ;;  %v817_v10 = vmul.f32 1.442695, %v816_v1 }
  0xef   : > { %v2587_v36 = vunpack.c.h.bf16 %v1601_v28  ;;  %v820_v58 = vmul.f32 1.442695, %v819_v49  ;;  %1581 = vst [vmem:[%s2557_s1 + $0x30] sm:$0xff] %v1011_v56  ;;  %v1049_v22 = vadd.f32 %v1048_v43, %v1038_v5  ;;  %v2590_v15 = vunpack.c.l.bf16 %v1605_v4 }
  0xf0   : > { %v2592_v51 = vunpack.c.h.bf16 %v1605_v4  ;;  %1651 = vpow2.f32 %v811_v26 }
  0xf1   : > { %v1086_v59 = vmul.f32 %v2587_v36, %v2491_v50  ;;  %1653 = vpow2.f32 %v814_v48  ;;  %v1060_v32 = vadd.f32 %v1059_v20, %v1049_v22  ;;  %v1097_v21 = vmul.f32 %v2590_v15, %v2494_v8 }
  0xf2   : > { %1655 = vpow2.f32 %v817_v10  ;;  %v1108_v14 = vmul.f32 %v2592_v51, %v2497_v47 }
  0xf3   : > { %v1087_v17 = vadd.f32 %v1086_v59, %v1078_v57  ;;  %1657 = vpow2.f32 %v820_v58  ;;  %1595 = vst [vmem:[%s2557_s1 + $0x40] sm:$0xff] %v1060_v32 }
  0xf5   : > { %v1098_v16 = vadd.f32 %v1097_v21, %v1087_v17 }
  0xf6   : > { %v1650_v41 = vpop.eup %1649 }
  0xf7   : > { %v701_v7 = vmul.f32 %v1650_v41, %v2519_v40  ;;  %v702_v38 = vmul.f32 %v1650_v41, %v2527_v31  ;;  %v703_v50 = vmul.f32 %v1650_v41, %v2533_v6  ;;  %v704_v29 = vmul.f32 %v1650_v41, %v2540_v24 }
  0xf8   : > { %v1109_v61 = vadd.f32 %v1108_v14, %v1098_v16 }
  0xf9   : > { %v835_v8 = vmul.f32 %v2753_v46, %v701_v7  ;;  %v844_v28 = vmul.f32 %v2754_v44, %v702_v38  ;;  %v855_v27 = vmul.f32 %v2755_v35, %v703_v50  ;;  %v866_v47 = vmul.f32 %v2756_v55, %v704_v29 }
  0xfa   : > { %v883_v25 = vmul.f32 %v2468_v12, %v701_v7  ;;  %v892_v23 = vmul.f32 %v2470_v52, %v702_v38  ;;  %v903_v40 = vmul.f32 %v2472_v34, %v703_v50  ;;  %v914_v31 = vmul.f32 %v2474_v19, %v704_v29  ;;  %1609 = vst [vmem:[%s2557_s1 + $0x50] sm:$0xff] %v1109_v61  ;;  %v1652_v6 = vpop.eup %1651 }
  0xfb   : > { %v845_v24 = vadd.f32 %v844_v28, %v835_v8  ;;  %v932_v0 = vmul.f32 %v2476_v37, %v701_v7  ;;  %v941_v2 = vmul.f32 %v2479_v39, %v702_v38  ;;  %v952_v54 = vmul.f32 %v2481_v33, %v703_v50  ;;  %v1654_v43 = vpop.eup %1653 }
  0xfc   : > { %v893_v60 = vadd.f32 %v892_v23, %v883_v25  ;;  %v963_v11 = vmul.f32 %v2483_v42, %v704_v29  ;;  %v981_v1 = vmul.f32 %v2485_v53, %v701_v7  ;;  %v990_v49 = vmul.f32 %v2499_v63, %v702_v38  ;;  %v1656_v4 = vpop.eup %1655 }
  0xfd   : > { %v856_v56 = vadd.f32 %v855_v27, %v845_v24  ;;  %v822_v5 = vadd.f32 %v1654_v43, %v1652_v6  ;;  %v942_v20 = vadd.f32 %v941_v2, %v932_v0  ;;  %v1001_v57 = vmul.f32 %v2501_v45, %v703_v50  ;;  %v1658_v26 = vpop.eup %1657 }
  0xfe   : > { %v904_v48 = vadd.f32 %v903_v40, %v893_v60  ;;  %v991_v10 = vadd.f32 %v990_v49, %v981_v1  ;;  %v1012_v58 = vmul.f32 %v2503_v13, %v704_v29  ;;  %v1030_v22 = vmul.f32 %v2552_v18, %v701_v7 }
  0xff   : > { %v867_v59 = vadd.f32 %v866_v47, %v856_v56  ;;  %v823_v32 = vadd.f32 %v1658_v26, %v1656_v4  ;;  %v953_v21 = vadd.f32 %v952_v54, %v942_v20  ;;  %v1039_v17 = vmul.f32 %v2560_v9, %v702_v38 }
 0x100   : > { %v915_v14 = vadd.f32 %v914_v31, %v904_v48  ;;  %v1002_v16 = vadd.f32 %v1001_v57, %v991_v10  ;;  %v1050_v41 = vmul.f32 %v2562_v62, %v703_v50  ;;  %v1061_v61 = vmul.f32 %v2570_v30, %v704_v29 }
 0x101   : > { %1541 = vst [vmem:[%s2557_s1 + $0x60] sm:$0xff] %v867_v59  ;;  %v824_v8 = vadd.f32 %v823_v32, %v822_v5  ;;  %v964_v28 = vadd.f32 %v963_v11, %v953_v21  ;;  %v1040_v27 = vadd.f32 %v1039_v17, %v1030_v22  ;;  %v1079_v47 = vmul.f32 %v2577_v3, %v701_v7 }
 0x102   : > { %1555 = vst [vmem:[%s2557_s1 + $0x70] sm:$0xff] %v915_v14  ;;  %v1013_v25 = vadd.f32 %v1012_v58, %v1002_v16  ;;  %v1088_v23 = vmul.f32 %v2587_v36, %v702_v38  ;;  %v1099_v40 = vmul.f32 %v2590_v15, %v703_v50  ;;  %v1110_v0 = vmul.f32 %v2592_v51, %v704_v29 }
 0x103   : > { %1659 = vrcp.f32 %v824_v8  ;;  %1569 = vst [vmem:[%s2557_s1 + $0x80] sm:$0xff] %v964_v28  ;;  %v1051_v31 = vadd.f32 %v1050_v41, %v1040_v27 }
 0x104   : > { %1583 = vst [vmem:[%s2557_s1 + $0x90] sm:$0xff] %v1013_v25  ;;  %v1089_v24 = vadd.f32 %v1088_v23, %v1079_v47 }
 0x105   : > { %v1062_v2 = vadd.f32 %v1061_v61, %v1051_v31 }
 0x106   : > { %v1100_v54 = vadd.f32 %v1099_v40, %v1089_v24 }
 0x107   : > { %1597 = vst [vmem:[%s2557_s1 + $0xa0] sm:$0xff] %v1062_v2 }
 0x108   : > { %v1111_v60 = vadd.f32 %v1110_v0, %v1100_v54 }
 0x10a   : > { %1611 = vst [vmem:[%s2557_s1 + $0xb0] sm:$0xff] %v1111_v60 }
 0x10d   : > { %v1660_v11 = vpop.eup %1659 }
 0x10e   : > { %v826_v7 = vmul.f32 %v1660_v11, %v1652_v6  ;;  %v827_v1 = vmul.f32 %v1660_v11, %v1654_v43  ;;  %v828_v49 = vmul.f32 %v1660_v11, %v1656_v4  ;;  %v829_v56 = vmul.f32 %v1660_v11, %v1658_v26 }
 0x110   : > { %v836_v38 = vmul.f32 %v2753_v46, %v826_v7  ;;  %v846_v50 = vmul.f32 %v2754_v44, %v827_v1  ;;  %v857_v5 = vmul.f32 %v2755_v35, %v828_v49  ;;  %v868_v20 = vmul.f32 %v2756_v55, %v829_v56 }
 0x111   : > { %v884_v29 = vmul.f32 %v2468_v12, %v826_v7  ;;  %v894_v57 = vmul.f32 %v2470_v52, %v827_v1  ;;  %v905_v48 = vmul.f32 %v2472_v34, %v828_v49  ;;  %v916_v10 = vmul.f32 %v2474_v19, %v829_v56 }
 0x112   : > { %v847_v6 = vadd.f32 %v846_v50, %v836_v38  ;;  %v933_v43 = vmul.f32 %v2476_v37, %v826_v7  ;;  %v943_v4 = vmul.f32 %v2479_v39, %v827_v1  ;;  %v954_v46 = vmul.f32 %v2481_v33, %v828_v49 }
 0x113   : > { %v895_v44 = vadd.f32 %v894_v57, %v884_v29  ;;  %v965_v35 = vmul.f32 %v2483_v42, %v829_v56  ;;  %v982_v55 = vmul.f32 %v2485_v53, %v826_v7  ;;  %v992_v12 = vmul.f32 %v2499_v63, %v827_v1 }
 0x114   : > { %v858_v26 = vadd.f32 %v857_v5, %v847_v6  ;;  %v944_v52 = vadd.f32 %v943_v4, %v933_v43  ;;  %v1003_v34 = vmul.f32 %v2501_v45, %v828_v49  ;;  %v1014_v19 = vmul.f32 %v2503_v13, %v829_v56 }
 0x115   : > { %v906_v58 = vadd.f32 %v905_v48, %v895_v44  ;;  %v993_v37 = vadd.f32 %v992_v12, %v982_v55  ;;  %v1031_v39 = vmul.f32 %v2552_v18, %v826_v7  ;;  %v1041_v33 = vmul.f32 %v2560_v9, %v827_v1 }
 0x116   : > { %v869_v42 = vadd.f32 %v868_v20, %v858_v26  ;;  %v955_v22 = vadd.f32 %v954_v46, %v944_v52  ;;  %v1052_v53 = vmul.f32 %v2562_v62, %v828_v49  ;;  %v1063_v63 = vmul.f32 %v2570_v30, %v829_v56 }
 0x117   : > { %v917_v59 = vadd.f32 %v916_v10, %v906_v58  ;;  %v1004_v32 = vadd.f32 %v1003_v34, %v993_v37  ;;  %v1042_v45 = vadd.f32 %v1041_v33, %v1031_v39  ;;  %v1080_v13 = vmul.f32 %v2577_v3, %v826_v7 }
 0x118   : > { %1543 = vst [vmem:[%s2557_s1 + $0xc0] sm:$0xff] %v869_v42  ;;  %v966_v21 = vadd.f32 %v965_v35, %v955_v22  ;;  %v1090_v18 = vmul.f32 %v2587_v36, %v827_v1  ;;  %v1101_v9 = vmul.f32 %v2590_v15, %v828_v49  ;;  %v1112_v30 = vmul.f32 %v2592_v51, %v829_v56 }
 0x119   : > { %1557 = vst [vmem:[%s2557_s1 + $0xd0] sm:$0xff] %v917_v59  ;;  %v1015_v17 = vadd.f32 %v1014_v19, %v1004_v32  ;;  %v1053_v14 = vadd.f32 %v1052_v53, %v1042_v45 }
 0x11a   : > { %1571 = vst [vmem:[%s2557_s1 + $0xe0] sm:$0xff] %v966_v21  ;;  %v1091_v62 = vadd.f32 %v1090_v18, %v1080_v13  ;;  %105 = sbr.rel (!%p103_p13) target bundleno = 90 (0x5a), region = 148 }
 0x11b   : > { %1585 = vst [vmem:[%s2557_s1 + $0xf0] sm:$0xff] %v1015_v17  ;;  %v1064_v16 = vadd.f32 %v1063_v63, %v1053_v14 }
 0x11c   : > { %v1102_v41 = vadd.f32 %v1101_v9, %v1091_v62 }
 0x11d   : > { %1599 = vst [vmem:[%s2557_s1 + $0x100] sm:$0xff] %v1064_v16 }
 0x11e   : > { %v1113_v61 = vadd.f32 %v1112_v30, %v1102_v41 }
 0x120   : > { %1613 = vst [vmem:[%s2557_s1 + $0x110] sm:$0xff] %v1113_v61 }
 0x121   :  { %1748 = shalt.err (!%p1745_p4)
}
 0x122   :  { %s2758_s2 = sld [smem:[#allocation35_spill]] }
 0x128   :  { %s1749_s3 = scalar_lea.hbm %s2758_s2, 4608 }
 0x129   :  { %p1750_p5 = scmp.ne.s32.totalorder %s2758_s2, %s1749_s3  ;;  %p1753_p6 = scmp.lt.u32.totalorder %s1749_s3, %s2758_s2 }
 0x12b   :  { %p1755_p7 = pnand %p1753_p6, %p1750_p5 }
 0x12d   :  { %1758 = shalt.err (!%p1755_p7)
}
 0x12e   :  { %s1782_s10 = smov 128   ;;  %s1783_s11 = smov 8  }
 0x12f   :  { %1134 = dma.vmem_to_hbm [thread:$0]  %s1129_s7, 4608, %s2758_s2, [#allocation4], %s1782_s10, %s1782_s10, %s1783_s11  }
 0x130   :  { %1769 = dma.done.wait [#allocation4], 4608  }
 0x131   :  { %1770 = vsyncadd [#allocation4], 4294962688 }
 0x132   :  { %1138 = vsyncpa [#allocation3], 1 }
 0x133   :  { %1139 = vsyncpa [#allocation8], 1 }
 0x134   :  { %1140 = vsyncpa [#allocation4], 1 }
 0x135   :  { %1141 = vsyncpa [#allocation5], 1 }

</bundles_post_ra>
